<compile_context>
chip_gen: v5e
topology: v5e:2x2
jax: 0.10.0
libtpu: 0.0.40
codegen_flags: <defaults>
</compile_context>

<pallas_src>
import functools

import jax
import jax.numpy as jnp
from jax import lax
from jax.experimental import pallas as pl
from jax.experimental.pallas import tpu as pltpu

INPUT_SIZE = 28      # width of one image row == RNN input features
SEQ_LEN = 28         # RNN timesteps == image rows (x is (B, 28, 28))
HIDDEN_SIZE = 128
OUTPUT_SIZE = 28     # predicted noise is (B, 28, 28)
TIMESTEPS = 50
LANE = 128           # TPU lane width; everything is padded to be lane-dense


def _ddpm_kernel(inv_ref, scale_ref, x_ref, h0_ref, wih_ref, whh_ref,
                 bcomb_ref, who_ref, bho_ref, x_out_ref, h_out_ref, pre_ref,
                 *, seq, b_pad, timesteps):
    """Full reverse-diffusion loop (DDPM.forward) in one kernel invocation.

    Layouts (lane dims padded to 128, batch padded to a sublane multiple):
      inv_ref   : (timesteps,)        f32  SMEM  1/sqrt(1-beta), reversed
      scale_ref : (timesteps,)        f32  SMEM  beta/sqrt(1-beta), reversed
      x_ref     : (seq*b_pad, 128)    f32  VMEM  time-major: row t*b_pad+b = x[b,t,:]
      h0_ref    : (b_pad, 128)        f32  VMEM
      wih_ref   : (128, 128)          bf16 VMEM  input->hidden weight, zero-padded rows
      whh_ref   : (128, 128)          bf16 VMEM  hidden->hidden weight
      bcomb_ref : (1, 128)            f32  VMEM  bih + bhh
      who_ref   : (128, seq*128)      bf16 VMEM  who[h, t*128+j] = W_ho[h, t*28+j]
      bho_ref   : (1, seq*128)        f32  VMEM  bho[0, t*128+j] = b_ho[t*28+j]
      x_out_ref : (seq*b_pad, 128)    f32  VMEM  working x and final output
      h_out_ref : (b_pad, 128)        f32  VMEM  final hidden
      pre_ref   : (seq*b_pad, 128)    f32  VMEM  scratch: per-step input projection
    """
    f32, bf16 = jnp.float32, jnp.bfloat16

    # ---- hoisted loop invariants ----
    wih = wih_ref[...]        # (128, H) bf16
    whh = whh_ref[...]        # (H, H)   bf16 — RHS of every recurrence matmul
    who = who_ref[...]        # (H, seq*128) bf16, stays VMEM-resident
    bho = bho_ref[...]        # (1, seq*128) f32
    bcomb = bcomb_ref[...]    # (1, H) f32

    # Working x lives in the output ref (VMEM) for the whole diffusion loop.
    x_out_ref[...] = x_ref[...]

    def diffusion_step(d, h):
        inv_t = inv_ref[d]        # 1/sqrt(1 - beta_t)      (SMEM scalar)
        scale_t = scale_ref[d]    # beta_t/sqrt(1 - beta_t)  (SMEM scalar)

        # (1) Input projection for ALL 28 RNN timesteps in one well-shaped
        #     (seq*b_pad, 128) @ (128, H) bf16 matmul; combined bias folded in
        #     here so it is off the serial recurrence chain.
        pre_ref[...] = (jnp.dot(x_out_ref[...].astype(bf16), wih,
                                preferred_element_type=f32) + bcomb)

        # (2) Serial ReLU recurrence, fully unrolled (seq is static).
        for t in range(seq):
            hh = jnp.dot(h.astype(bf16), whh, preferred_element_type=f32)
            h = jnp.maximum(pre_ref[t * b_pad:(t + 1) * b_pad, :] + hh, 0.0)

        # (3) Output projection of the *last* hidden state as ONE wide matmul;
        #     lanes [t*128, (t+1)*128) hold the predicted-noise row for image
        #     row / RNN timestep t, matching the time-major x layout.
        noise = (jnp.dot(h.astype(bf16), who, preferred_element_type=f32)
                 + bho)                                    # (b_pad, seq*128) f32

        # (4) Fused DDPM update  x = x*inv - scale*noise  (lane slices of
        #     `noise` are vreg-aligned; no transpose, no extra buffers).
        for t in range(seq):
            blk = x_out_ref[t * b_pad:(t + 1) * b_pad, :]
            x_out_ref[t * b_pad:(t + 1) * b_pad, :] = (
                blk * inv_t - scale_t * noise[:, t * LANE:(t + 1) * LANE])
        return h

    h_final = lax.fori_loop(0, timesteps, diffusion_step, h0_ref[...])
    h_out_ref[...] = h_final


def ddpm_forward(x, hidden, params, betas):
    """DDPM.forward.  x: (B, 28, 28), hidden: (B, 128) -> (x', hidden')."""
    wih_t, bih, whh_t, bhh, who_t, bho = params
    B, seq, d_in = x.shape
    assert seq == SEQ_LEN and d_in == INPUT_SIZE
    hdim = whh_t.shape[0]
    timesteps = int(betas.shape[0])
    b_pad = max(8, ((B + 7) // 8) * 8)        # sublane-multiple batch

    f32, bf16 = jnp.float32, jnp.bfloat16

    # ---- host/XLA-side layout prep, done ONCE for all diffusion steps ----
    # time-major + batch-pad + lane-pad x: row t*b_pad + b  <->  x[b, t, :]
    x_p = jnp.zeros((b_pad, seq, d_in), f32).at[:B].set(x.astype(f32))
    x_tm = jnp.transpose(x_p, (1, 0, 2)).reshape(seq * b_pad, d_in)
    x_tm = jnp.pad(x_tm, ((0, 0), (0, LANE - d_in)))

    h0 = jnp.zeros((b_pad, hdim), f32).at[:B].set(hidden.astype(f32))

    # Weights in bf16 for the MXU (f32 accumulation inside the kernel).
    wih_p = jnp.pad(wih_t.astype(f32), ((0, LANE - d_in), (0, 0))).astype(bf16)  # (128,H)
    whh_b = whh_t.astype(bf16)                                                   # (H,H)
    b_comb = (bih + bhh).astype(f32).reshape(1, hdim)

    # hidden->output weight regrouped so one wide matmul emits the noise
    # directly in the time-major x layout:
    #   who_flat[h, t*128 + j] = W_ho^T[h, t*28 + j]   (padded lanes are zero)
    who_flat = jnp.pad(who_t.astype(f32).reshape(hdim, seq, d_in),
                       ((0, 0), (0, 0), (0, LANE - d_in)))
    who_flat = who_flat.reshape(hdim, seq * LANE).astype(bf16)                   # (H, seq*128)
    bho_flat = jnp.pad(bho.astype(f32).reshape(seq, d_in),
                       ((0, 0), (0, LANE - d_in))).reshape(1, seq * LANE)        # (1, seq*128)

    # reversed schedules (torch iterates t = timesteps-1 .. 0)
    betas_rev = betas.astype(f32)[::-1]
    inv_rev = 1.0 / jnp.sqrt(1.0 - betas_rev)
    scale_rev = betas_rev * inv_rev

    smem = pl.BlockSpec(memory_space=pltpu.MemorySpace.SMEM)
    vmem = pl.BlockSpec(memory_space=pltpu.MemorySpace.VMEM)

    kernel = functools.partial(_ddpm_kernel, seq=seq, b_pad=b_pad,
                               timesteps=timesteps)

    # Total VMEM footprint ~2 MiB (well under the scoped limit on v5e/v6e/v7x),
    # so a single grid-less invocation is used.  If B is ever scaled up, add a
    # ("parallel",) grid over batch tiles for v7x's 2 TCs.
    x_out2d, h_out = pl.pallas_call(
        kernel,
        out_shape=(jax.ShapeDtypeStruct((seq * b_pad, LANE), f32),
                   jax.ShapeDtypeStruct((b_pad, hdim), f32)),
        in_specs=[smem, smem, vmem, vmem, vmem, vmem, vmem, vmem, vmem],
        out_specs=(vmem, vmem),
        scratch_shapes=[pltpu.VMEM((seq * b_pad, hdim), f32)],
    )(inv_rev, scale_rev, x_tm, h0, wih_p, whh_b, b_comb, who_flat, bho_flat)

    # undo padding / layout
    x_final = x_out2d[:, :d_in].reshape(seq, b_pad, d_in).transpose(1, 0, 2)[:B]
    h_final = h_out[:B]
    return x_final, h_final


def init_params(key):
    """PyTorch nn.Linear-style init; weights stored transposed as (in, out)."""
    k = jax.random.split(key, 6)

    def lin(kw, kb, fan_in, fan_out):
        bound = 1.0 / (fan_in ** 0.5)
        w = jax.random.uniform(kw, (fan_in, fan_out), jnp.float32, -bound, bound)
        b = jax.random.uniform(kb, (fan_out,), jnp.float32, -bound, bound)
        return w, b

    wih_t, bih = lin(k[0], k[1], INPUT_SIZE, HIDDEN_SIZE)
    whh_t, bhh = lin(k[2], k[3], HIDDEN_SIZE, HIDDEN_SIZE)
    who_t, bho = lin(k[4], k[5], HIDDEN_SIZE, OUTPUT_SIZE * OUTPUT_SIZE)
    return (wih_t, bih, whh_t, bhh, who_t, bho)


def beta_schedule(timesteps, start=0.0001, end=0.02):
    return jnp.linspace(start ** 0.5, end ** 0.5, timesteps, dtype=jnp.float32) ** 2


def reference_forward(x, hidden, params, betas):
    """Pure-JAX reference of DDPM.forward using the same mixed precision as the
    kernel (bf16 matmul operands, f32 accumulation)."""
    wih_t, bih, whh_t, bhh, who_t, bho = params
    f32, bf16 = jnp.float32, jnp.bfloat16
    wih_b, whh_b, who_b = (w.astype(bf16) for w in (wih_t, whh_t, who_t))
    seq = x.shape[1]
    timesteps = betas.shape[0]

    def diff_step(d, carry):
        xx, h = carry
        beta_t = betas[timesteps - 1 - d]

        def rnn_step(t, hh):
            x_t = lax.dynamic_slice_in_dim(xx, t, 1, axis=1)[:, 0, :]
            pre = jnp.dot(x_t.astype(bf16), wih_b, preferred_element_type=f32) + bih
            rec = jnp.dot(hh.astype(bf16), whh_b, preferred_element_type=f32) + bhh
            return jnp.maximum(pre + rec, 0.0)

        h = lax.fori_loop(0, seq, rnn_step, h)
        out = jnp.dot(h.astype(bf16), who_b, preferred_element_type=f32) + bho
        noise = out.reshape(xx.shape)
        xx = (xx - beta_t * noise) / jnp.sqrt(1.0 - beta_t)
        return (xx, h)

    return lax.fori_loop(0, timesteps, diff_step,
                         (x.astype(f32), hidden.astype(f32)))


if __name__ == "__main__":
    key = jax.random.PRNGKey(0)
    kp, kx, kh = jax.random.split(key, 3)

    B = 2
    params = init_params(kp)
    betas = beta_schedule(TIMESTEPS)

    x = jax.random.normal(kx, (B, SEQ_LEN, INPUT_SIZE), jnp.float32)   # (B, 28, 28)
    hidden0 = jax.random.normal(kh, (B, HIDDEN_SIZE), jnp.float32)

    x_out, h_out = jax.jit(ddpm_forward)(x, hidden0, params, betas)
    x_out = jax.block_until_ready(x_out)
    h_out = jax.block_until_ready(h_out)

    x_ref, h_ref = jax.jit(reference_forward)(x, hidden0, params, betas)
    x_ref = jax.block_until_ready(x_ref)
    h_ref = jax.block_until_ready(h_ref)

    assert x_out.shape == (B, OUTPUT_SIZE, OUTPUT_SIZE)
    assert h_out.shape == (B, HIDDEN_SIZE)
    assert bool(jnp.all(jnp.isfinite(x_out))) and bool(jnp.all(jnp.isfinite(h_out)))
    assert jnp.allclose(x_out, x_ref, atol=1e-2, rtol=1e-2), \
        f"max|dx| = {float(jnp.max(jnp.abs(x_out - x_ref)))}"
    assert jnp.allclose(h_out, h_ref, atol=1e-2, rtol=1e-2), \
        f"max|dh| = {float(jnp.max(jnp.abs(h_out - h_ref)))}"

    print("KERNEL_OK")
</pallas_src>

<mosaic_0001>
module attributes {stable_mosaic.version = 11 : i64} {
  func.func @_ddpm_kernel(%arg0: memref<50xf32, #tpu.memory_space<smem>>, %arg1: memref<50xf32, #tpu.memory_space<smem>>, %arg2: memref<224x128xf32, #tpu.memory_space<vmem>>, %arg3: memref<8x128xf32, #tpu.memory_space<vmem>>, %arg4: memref<128x128xbf16, #tpu.memory_space<vmem>>, %arg5: memref<128x128xbf16, #tpu.memory_space<vmem>>, %arg6: memref<1x128xf32, #tpu.memory_space<vmem>>, %arg7: memref<128x3584xbf16, #tpu.memory_space<vmem>>, %arg8: memref<1x3584xf32, #tpu.memory_space<vmem>>, %arg9: memref<224x128xf32, #tpu.memory_space<vmem>>, %arg10: memref<8x128xf32, #tpu.memory_space<vmem>>, %arg11: memref<224x128xf32, #tpu.memory_space<vmem>>) attributes {dimension_semantics = [], scalar_prefetch = 0 : i64, scratch_operands = 1 : i64, tpu.core_type = #tpu.core_type<tc>} {
    %c0 = arith.constant 0 : index
    %c0_0 = arith.constant 0 : index
    %0 = vector.load %arg4[%c0, %c0_0] : memref<128x128xbf16, #tpu.memory_space<vmem>>, vector<128x128xbf16>
    %c0_1 = arith.constant 0 : index
    %c0_2 = arith.constant 0 : index
    %1 = vector.load %arg5[%c0_1, %c0_2] : memref<128x128xbf16, #tpu.memory_space<vmem>>, vector<128x128xbf16>
    %c0_3 = arith.constant 0 : index
    %c0_4 = arith.constant 0 : index
    %2 = vector.load %arg7[%c0_3, %c0_4] : memref<128x3584xbf16, #tpu.memory_space<vmem>>, vector<128x3584xbf16>
    %c0_5 = arith.constant 0 : index
    %c0_6 = arith.constant 0 : index
    %3 = vector.load %arg8[%c0_5, %c0_6] : memref<1x3584xf32, #tpu.memory_space<vmem>>, vector<1x3584xf32>
    %c0_7 = arith.constant 0 : index
    %c0_8 = arith.constant 0 : index
    %4 = vector.load %arg6[%c0_7, %c0_8] : memref<1x128xf32, #tpu.memory_space<vmem>>, vector<1x128xf32>
    %c0_9 = arith.constant 0 : index
    %c0_10 = arith.constant 0 : index
    %5 = vector.load %arg2[%c0_9, %c0_10] : memref<224x128xf32, #tpu.memory_space<vmem>>, vector<224x128xf32>
    %c0_11 = arith.constant 0 : index
    %c0_12 = arith.constant 0 : index
    %6 = vector.load %arg9[%c0_11, %c0_12] : memref<224x128xf32, #tpu.memory_space<vmem>>, vector<224x128xf32>
    tpu.vector_store %arg9[%c0_11, %c0_12], %5 {strides = array<i32>} : memref<224x128xf32, #tpu.memory_space<vmem>>, vector<224x128xf32>,
    %c0_13 = arith.constant 0 : index
    %c0_14 = arith.constant 0 : index
    %7 = vector.load %arg3[%c0_13, %c0_14] : memref<8x128xf32, #tpu.memory_space<vmem>>, vector<8x128xf32>
    %c0_i32 = arith.constant 0 : i32
    %c50_i32 = arith.constant 50 : i32
    %8 = arith.addi %c0_i32, %c50_i32 : i32
    %c1_i32 = arith.constant 1 : i32
    %9 = scf.for %arg12 = %c0_i32 to %8 step %c1_i32 iter_args(%arg13 = %7) -> (vector<8x128xf32>)  : i32 {
      %11 = arith.index_cast %arg12 : i32 to index
      %12 = memref.load %arg0[%11] : memref<50xf32, #tpu.memory_space<smem>>
      %13 = arith.index_cast %arg12 : i32 to index
      %14 = memref.load %arg1[%13] : memref<50xf32, #tpu.memory_space<smem>>
      %c0_18 = arith.constant 0 : index
      %c0_19 = arith.constant 0 : index
      %15 = vector.load %arg9[%c0_18, %c0_19] : memref<224x128xf32, #tpu.memory_space<vmem>>, vector<224x128xf32>
      %16 = arith.truncf %15 : vector<224x128xf32> to vector<224x128xbf16>
      %cst = arith.constant dense<0.000000e+00> : vector<224x128xf32>
      %17 = tpu.matmul %16, %0, %cst {dimension_numbers = #tpu.dot_dimension_numbers<[1], [0], [0], [1], [0, 0, 1, 1], [], []>} : vector<224x128xbf16>, vector<128x128xbf16>, vector<224x128xf32> -> vector<224x128xf32>
      %18 = vector.broadcast %4 : vector<1x128xf32> to vector<224x128xf32>
      %19 = arith.addf %17, %18 : vector<224x128xf32>
      %c0_20 = arith.constant 0 : index
      %c0_21 = arith.constant 0 : index
      %20 = vector.load %arg11[%c0_20, %c0_21] : memref<224x128xf32, #tpu.memory_space<vmem>>, vector<224x128xf32>
      tpu.vector_store %arg11[%c0_20, %c0_21], %19 {strides = array<i32>} : memref<224x128xf32, #tpu.memory_space<vmem>>, vector<224x128xf32>,
      %21 = arith.truncf %arg13 : vector<8x128xf32> to vector<8x128xbf16>
      %cst_22 = arith.constant dense<0.000000e+00> : vector<8x128xf32>
      %22 = tpu.matmul %21, %1, %cst_22 {dimension_numbers = #tpu.dot_dimension_numbers<[1], [0], [0], [1], [0, 0, 1, 1], [], []>} : vector<8x128xbf16>, vector<128x128xbf16>, vector<8x128xf32> -> vector<8x128xf32>
      %c0_23 = arith.constant 0 : index
      %c0_24 = arith.constant 0 : index
      %23 = vector.load %arg11[%c0_23, %c0_24] : memref<224x128xf32, #tpu.memory_space<vmem>>, vector<8x128xf32>
      %24 = arith.addf %23, %22 : vector<8x128xf32>
      %cst_25 = arith.constant 0.000000e+00 : f32
      %25 = vector.broadcast %cst_25 : f32 to vector<8x128xf32>
      %26 = arith.maximumf %24, %25 : vector<8x128xf32>
      %27 = arith.truncf %26 : vector<8x128xf32> to vector<8x128xbf16>
      %cst_26 = arith.constant dense<0.000000e+00> : vector<8x128xf32>
      %28 = tpu.matmul %27, %1, %cst_26 {dimension_numbers = #tpu.dot_dimension_numbers<[1], [0], [0], [1], [0, 0, 1, 1], [], []>} : vector<8x128xbf16>, vector<128x128xbf16>, vector<8x128xf32> -> vector<8x128xf32>
      %c8 = arith.constant 8 : index
      %c0_27 = arith.constant 0 : index
      %29 = vector.load %arg11[%c8, %c0_27] : memref<224x128xf32, #tpu.memory_space<vmem>>, vector<8x128xf32>
      %30 = arith.addf %29, %28 : vector<8x128xf32>
      %cst_28 = arith.constant 0.000000e+00 : f32
      %31 = vector.broadcast %cst_28 : f32 to vector<8x128xf32>
      %32 = arith.maximumf %30, %31 : vector<8x128xf32>
      %33 = arith.truncf %32 : vector<8x128xf32> to vector<8x128xbf16>
      %cst_29 = arith.constant dense<0.000000e+00> : vector<8x128xf32>
      %34 = tpu.matmul %33, %1, %cst_29 {dimension_numbers = #tpu.dot_dimension_numbers<[1], [0], [0], [1], [0, 0, 1, 1], [], []>} : vector<8x128xbf16>, vector<128x128xbf16>, vector<8x128xf32> -> vector<8x128xf32>
      %c16 = arith.constant 16 : index
      %c0_30 = arith.constant 0 : index
      %35 = vector.load %arg11[%c16, %c0_30] : memref<224x128xf32, #tpu.memory_space<vmem>>, vector<8x128xf32>
      %36 = arith.addf %35, %34 : vector<8x128xf32>
      %cst_31 = arith.constant 0.000000e+00 : f32
      %37 = vector.broadcast %cst_31 : f32 to vector<8x128xf32>
      %38 = arith.maximumf %36, %37 : vector<8x128xf32>
      %39 = arith.truncf %38 : vector<8x128xf32> to vector<8x128xbf16>
      %cst_32 = arith.constant dense<0.000000e+00> : vector<8x128xf32>
      %40 = tpu.matmul %39, %1, %cst_32 {dimension_numbers = #tpu.dot_dimension_numbers<[1], [0], [0], [1], [0, 0, 1, 1], [], []>} : vector<8x128xbf16>, vector<128x128xbf16>, vector<8x128xf32> -> vector<8x128xf32>
      %c24 = arith.constant 24 : index
      %c0_33 = arith.constant 0 : index
      %41 = vector.load %arg11[%c24, %c0_33] : memref<224x128xf32, #tpu.memory_space<vmem>>, vector<8x128xf32>
      %42 = arith.addf %41, %40 : vector<8x128xf32>
      %cst_34 = arith.constant 0.000000e+00 : f32
      %43 = vector.broadcast %cst_34 : f32 to vector<8x128xf32>
      %44 = arith.maximumf %42, %43 : vector<8x128xf32>
      %45 = arith.truncf %44 : vector<8x128xf32> to vector<8x128xbf16>
      %cst_35 = arith.constant dense<0.000000e+00> : vector<8x128xf32>
      %46 = tpu.matmul %45, %1, %cst_35 {dimension_numbers = #tpu.dot_dimension_numbers<[1], [0], [0], [1], [0, 0, 1, 1], [], []>} : vector<8x128xbf16>, vector<128x128xbf16>, vector<8x128xf32> -> vector<8x128xf32>
      %c32 = arith.constant 32 : index
      %c0_36 = arith.constant 0 : index
      %47 = vector.load %arg11[%c32, %c0_36] : memref<224x128xf32, #tpu.memory_space<vmem>>, vector<8x128xf32>
      %48 = arith.addf %47, %46 : vector<8x128xf32>
      %cst_37 = arith.constant 0.000000e+00 : f32
      %49 = vector.broadcast %cst_37 : f32 to vector<8x128xf32>
      %50 = arith.maximumf %48, %49 : vector<8x128xf32>
      %51 = arith.truncf %50 : vector<8x128xf32> to vector<8x128xbf16>
      %cst_38 = arith.constant dense<0.000000e+00> : vector<8x128xf32>
      %52 = tpu.matmul %51, %1, %cst_38 {dimension_numbers = #tpu.dot_dimension_numbers<[1], [0], [0], [1], [0, 0, 1, 1], [], []>} : vector<8x128xbf16>, vector<128x128xbf16>, vector<8x128xf32> -> vector<8x128xf32>
      %c40 = arith.constant 40 : index
      %c0_39 = arith.constant 0 : index
      %53 = vector.load %arg11[%c40, %c0_39] : memref<224x128xf32, #tpu.memory_space<vmem>>, vector<8x128xf32>
      %54 = arith.addf %53, %52 : vector<8x128xf32>
      %cst_40 = arith.constant 0.000000e+00 : f32
      %55 = vector.broadcast %cst_40 : f32 to vector<8x128xf32>
      %56 = arith.maximumf %54, %55 : vector<8x128xf32>
      %57 = arith.truncf %56 : vector<8x128xf32> to vector<8x128xbf16>
      %cst_41 = arith.constant dense<0.000000e+00> : vector<8x128xf32>
      %58 = tpu.matmul %57, %1, %cst_41 {dimension_numbers = #tpu.dot_dimension_numbers<[1], [0], [0], [1], [0, 0, 1, 1], [], []>} : vector<8x128xbf16>, vector<128x128xbf16>, vector<8x128xf32> -> vector<8x128xf32>
      %c48 = arith.constant 48 : index
      %c0_42 = arith.constant 0 : index
      %59 = vector.load %arg11[%c48, %c0_42] : memref<224x128xf32, #tpu.memory_space<vmem>>, vector<8x128xf32>
      %60 = arith.addf %59, %58 : vector<8x128xf32>
      %cst_43 = arith.constant 0.000000e+00 : f32
      %61 = vector.broadcast %cst_43 : f32 to vector<8x128xf32>
      %62 = arith.maximumf %60, %61 : vector<8x128xf32>
      %63 = arith.truncf %62 : vector<8x128xf32> to vector<8x128xbf16>
      %cst_44 = arith.constant dense<0.000000e+00> : vector<8x128xf32>
      %64 = tpu.matmul %63, %1, %cst_44 {dimension_numbers = #tpu.dot_dimension_numbers<[1], [0], [0], [1], [0, 0, 1, 1], [], []>} : vector<8x128xbf16>, vector<128x128xbf16>, vector<8x128xf32> -> vector<8x128xf32>
      %c56 = arith.constant 56 : index
      %c0_45 = arith.constant 0 : index
      %65 = vector.load %arg11[%c56, %c0_45] : memref<224x128xf32, #tpu.memory_space<vmem>>, vector<8x128xf32>
      %66 = arith.addf %65, %64 : vector<8x128xf32>
      %cst_46 = arith.constant 0.000000e+00 : f32
      %67 = vector.broadcast %cst_46 : f32 to vector<8x128xf32>
      %68 = arith.maximumf %66, %67 : vector<8x128xf32>
      %69 = arith.truncf %68 : vector<8x128xf32> to vector<8x128xbf16>
      %cst_47 = arith.constant dense<0.000000e+00> : vector<8x128xf32>
      %70 = tpu.matmul %69, %1, %cst_47 {dimension_numbers = #tpu.dot_dimension_numbers<[1], [0], [0], [1], [0, 0, 1, 1], [], []>} : vector<8x128xbf16>, vector<128x128xbf16>, vector<8x128xf32> -> vector<8x128xf32>
      %c64 = arith.constant 64 : index
      %c0_48 = arith.constant 0 : index
      %71 = vector.load %arg11[%c64, %c0_48] : memref<224x128xf32, #tpu.memory_space<vmem>>, vector<8x128xf32>
      %72 = arith.addf %71, %70 : vector<8x128xf32>
      %cst_49 = arith.constant 0.000000e+00 : f32
      %73 = vector.broadcast %cst_49 : f32 to vector<8x128xf32>
      %74 = arith.maximumf %72, %73 : vector<8x128xf32>
      %75 = arith.truncf %74 : vector<8x128xf32> to vector<8x128xbf16>
      %cst_50 = arith.constant dense<0.000000e+00> : vector<8x128xf32>
      %76 = tpu.matmul %75, %1, %cst_50 {dimension_numbers = #tpu.dot_dimension_numbers<[1], [0], [0], [1], [0, 0, 1, 1], [], []>} : vector<8x128xbf16>, vector<128x128xbf16>, vector<8x128xf32> -> vector<8x128xf32>
      %c72 = arith.constant 72 : index
      %c0_51 = arith.constant 0 : index
      %77 = vector.load %arg11[%c72, %c0_51] : memref<224x128xf32, #tpu.memory_space<vmem>>, vector<8x128xf32>
      %78 = arith.addf %77, %76 : vector<8x128xf32>
      %cst_52 = arith.constant 0.000000e+00 : f32
      %79 = vector.broadcast %cst_52 : f32 to vector<8x128xf32>
      %80 = arith.maximumf %78, %79 : vector<8x128xf32>
      %81 = arith.truncf %80 : vector<8x128xf32> to vector<8x128xbf16>
      %cst_53 = arith.constant dense<0.000000e+00> : vector<8x128xf32>
      %82 = tpu.matmul %81, %1, %cst_53 {dimension_numbers = #tpu.dot_dimension_numbers<[1], [0], [0], [1], [0, 0, 1, 1], [], []>} : vector<8x128xbf16>, vector<128x128xbf16>, vector<8x128xf32> -> vector<8x128xf32>
      %c80 = arith.constant 80 : index
      %c0_54 = arith.constant 0 : index
      %83 = vector.load %arg11[%c80, %c0_54] : memref<224x128xf32, #tpu.memory_space<vmem>>, vector<8x128xf32>
      %84 = arith.addf %83, %82 : vector<8x128xf32>
      %cst_55 = arith.constant 0.000000e+00 : f32
      %85 = vector.broadcast %cst_55 : f32 to vector<8x128xf32>
      %86 = arith.maximumf %84, %85 : vector<8x128xf32>
      %87 = arith.truncf %86 : vector<8x128xf32> to vector<8x128xbf16>
      %cst_56 = arith.constant dense<0.000000e+00> : vector<8x128xf32>
      %88 = tpu.matmul %87, %1, %cst_56 {dimension_numbers = #tpu.dot_dimension_numbers<[1], [0], [0], [1], [0, 0, 1, 1], [], []>} : vector<8x128xbf16>, vector<128x128xbf16>, vector<8x128xf32> -> vector<8x128xf32>
      %c88 = arith.constant 88 : index
      %c0_57 = arith.constant 0 : index
      %89 = vector.load %arg11[%c88, %c0_57] : memref<224x128xf32, #tpu.memory_space<vmem>>, vector<8x128xf32>
      %90 = arith.addf %89, %88 : vector<8x128xf32>
      %cst_58 = arith.constant 0.000000e+00 : f32
      %91 = vector.broadcast %cst_58 : f32 to vector<8x128xf32>
      %92 = arith.maximumf %90, %91 : vector<8x128xf32>
      %93 = arith.truncf %92 : vector<8x128xf32> to vector<8x128xbf16>
      %cst_59 = arith.constant dense<0.000000e+00> : vector<8x128xf32>
      %94 = tpu.matmul %93, %1, %cst_59 {dimension_numbers = #tpu.dot_dimension_numbers<[1], [0], [0], [1], [0, 0, 1, 1], [], []>} : vector<8x128xbf16>, vector<128x128xbf16>, vector<8x128xf32> -> vector<8x128xf32>
      %c96 = arith.constant 96 : index
      %c0_60 = arith.constant 0 : index
      %95 = vector.load %arg11[%c96, %c0_60] : memref<224x128xf32, #tpu.memory_space<vmem>>, vector<8x128xf32>
      %96 = arith.addf %95, %94 : vector<8x128xf32>
      %cst_61 = arith.constant 0.000000e+00 : f32
      %97 = vector.broadcast %cst_61 : f32 to vector<8x128xf32>
      %98 = arith.maximumf %96, %97 : vector<8x128xf32>
      %99 = arith.truncf %98 : vector<8x128xf32> to vector<8x128xbf16>
      %cst_62 = arith.constant dense<0.000000e+00> : vector<8x128xf32>
      %100 = tpu.matmul %99, %1, %cst_62 {dimension_numbers = #tpu.dot_dimension_numbers<[1], [0], [0], [1], [0, 0, 1, 1], [], []>} : vector<8x128xbf16>, vector<128x128xbf16>, vector<8x128xf32> -> vector<8x128xf32>
      %c104 = arith.constant 104 : index
      %c0_63 = arith.constant 0 : index
      %101 = vector.load %arg11[%c104, %c0_63] : memref<224x128xf32, #tpu.memory_space<vmem>>, vector<8x128xf32>
      %102 = arith.addf %101, %100 : vector<8x128xf32>
      %cst_64 = arith.constant 0.000000e+00 : f32
      %103 = vector.broadcast %cst_64 : f32 to vector<8x128xf32>
      %104 = arith.maximumf %102, %103 : vector<8x128xf32>
      %105 = arith.truncf %104 : vector<8x128xf32> to vector<8x128xbf16>
      %cst_65 = arith.constant dense<0.000000e+00> : vector<8x128xf32>
      %106 = tpu.matmul %105, %1, %cst_65 {dimension_numbers = #tpu.dot_dimension_numbers<[1], [0], [0], [1], [0, 0, 1, 1], [], []>} : vector<8x128xbf16>, vector<128x128xbf16>, vector<8x128xf32> -> vector<8x128xf32>
      %c112 = arith.constant 112 : index
      %c0_66 = arith.constant 0 : index
      %107 = vector.load %arg11[%c112, %c0_66] : memref<224x128xf32, #tpu.memory_space<vmem>>, vector<8x128xf32>
      %108 = arith.addf %107, %106 : vector<8x128xf32>
      %cst_67 = arith.constant 0.000000e+00 : f32
      %109 = vector.broadcast %cst_67 : f32 to vector<8x128xf32>
      %110 = arith.maximumf %108, %109 : vector<8x128xf32>
      %111 = arith.truncf %110 : vector<8x128xf32> to vector<8x128xbf16>
      %cst_68 = arith.constant dense<0.000000e+00> : vector<8x128xf32>
      %112 = tpu.matmul %111, %1, %cst_68 {dimension_numbers = #tpu.dot_dimension_numbers<[1], [0], [0], [1], [0, 0, 1, 1], [], []>} : vector<8x128xbf16>, vector<128x128xbf16>, vector<8x128xf32> -> vector<8x128xf32>
      %c120 = arith.constant 120 : index
      %c0_69 = arith.constant 0 : index
      %113 = vector.load %arg11[%c120, %c0_69] : memref<224x128xf32, #tpu.memory_space<vmem>>, vector<8x128xf32>
      %114 = arith.addf %113, %112 : vector<8x128xf32>
      %cst_70 = arith.constant 0.000000e+00 : f32
      %115 = vector.broadcast %cst_70 : f32 to vector<8x128xf32>
      %116 = arith.maximumf %114, %115 : vector<8x128xf32>
      %117 = arith.truncf %116 : vector<8x128xf32> to vector<8x128xbf16>
      %cst_71 = arith.constant dense<0.000000e+00> : vector<8x128xf32>
      %118 = tpu.matmul %117, %1, %cst_71 {dimension_numbers = #tpu.dot_dimension_numbers<[1], [0], [0], [1], [0, 0, 1, 1], [], []>} : vector<8x128xbf16>, vector<128x128xbf16>, vector<8x128xf32> -> vector<8x128xf32>
      %c128 = arith.constant 128 : index
      %c0_72 = arith.constant 0 : index
      %119 = vector.load %arg11[%c128, %c0_72] : memref<224x128xf32, #tpu.memory_space<vmem>>, vector<8x128xf32>
      %120 = arith.addf %119, %118 : vector<8x128xf32>
      %cst_73 = arith.constant 0.000000e+00 : f32
      %121 = vector.broadcast %cst_73 : f32 to vector<8x128xf32>
      %122 = arith.maximumf %120, %121 : vector<8x128xf32>
      %123 = arith.truncf %122 : vector<8x128xf32> to vector<8x128xbf16>
      %cst_74 = arith.constant dense<0.000000e+00> : vector<8x128xf32>
      %124 = tpu.matmul %123, %1, %cst_74 {dimension_numbers = #tpu.dot_dimension_numbers<[1], [0], [0], [1], [0, 0, 1, 1], [], []>} : vector<8x128xbf16>, vector<128x128xbf16>, vector<8x128xf32> -> vector<8x128xf32>
      %c136 = arith.constant 136 : index
      %c0_75 = arith.constant 0 : index
      %125 = vector.load %arg11[%c136, %c0_75] : memref<224x128xf32, #tpu.memory_space<vmem>>, vector<8x128xf32>
      %126 = arith.addf %125, %124 : vector<8x128xf32>
      %cst_76 = arith.constant 0.000000e+00 : f32
      %127 = vector.broadcast %cst_76 : f32 to vector<8x128xf32>
      %128 = arith.maximumf %126, %127 : vector<8x128xf32>
      %129 = arith.truncf %128 : vector<8x128xf32> to vector<8x128xbf16>
      %cst_77 = arith.constant dense<0.000000e+00> : vector<8x128xf32>
      %130 = tpu.matmul %129, %1, %cst_77 {dimension_numbers = #tpu.dot_dimension_numbers<[1], [0], [0], [1], [0, 0, 1, 1], [], []>} : vector<8x128xbf16>, vector<128x128xbf16>, vector<8x128xf32> -> vector<8x128xf32>
      %c144 = arith.constant 144 : index
      %c0_78 = arith.constant 0 : index
      %131 = vector.load %arg11[%c144, %c0_78] : memref<224x128xf32, #tpu.memory_space<vmem>>, vector<8x128xf32>
      %132 = arith.addf %131, %130 : vector<8x128xf32>
      %cst_79 = arith.constant 0.000000e+00 : f32
      %133 = vector.broadcast %cst_79 : f32 to vector<8x128xf32>
      %134 = arith.maximumf %132, %133 : vector<8x128xf32>
      %135 = arith.truncf %134 : vector<8x128xf32> to vector<8x128xbf16>
      %cst_80 = arith.constant dense<0.000000e+00> : vector<8x128xf32>
      %136 = tpu.matmul %135, %1, %cst_80 {dimension_numbers = #tpu.dot_dimension_numbers<[1], [0], [0], [1], [0, 0, 1, 1], [], []>} : vector<8x128xbf16>, vector<128x128xbf16>, vector<8x128xf32> -> vector<8x128xf32>
      %c152 = arith.constant 152 : index
      %c0_81 = arith.constant 0 : index
      %137 = vector.load %arg11[%c152, %c0_81] : memref<224x128xf32, #tpu.memory_space<vmem>>, vector<8x128xf32>
      %138 = arith.addf %137, %136 : vector<8x128xf32>
      %cst_82 = arith.constant 0.000000e+00 : f32
      %139 = vector.broadcast %cst_82 : f32 to vector<8x128xf32>
      %140 = arith.maximumf %138, %139 : vector<8x128xf32>
      %141 = arith.truncf %140 : vector<8x128xf32> to vector<8x128xbf16>
      %cst_83 = arith.constant dense<0.000000e+00> : vector<8x128xf32>
      %142 = tpu.matmul %141, %1, %cst_83 {dimension_numbers = #tpu.dot_dimension_numbers<[1], [0], [0], [1], [0, 0, 1, 1], [], []>} : vector<8x128xbf16>, vector<128x128xbf16>, vector<8x128xf32> -> vector<8x128xf32>
      %c160 = arith.constant 160 : index
      %c0_84 = arith.constant 0 : index
      %143 = vector.load %arg11[%c160, %c0_84] : memref<224x128xf32, #tpu.memory_space<vmem>>, vector<8x128xf32>
      %144 = arith.addf %143, %142 : vector<8x128xf32>
      %cst_85 = arith.constant 0.000000e+00 : f32
      %145 = vector.broadcast %cst_85 : f32 to vector<8x128xf32>
      %146 = arith.maximumf %144, %145 : vector<8x128xf32>
      %147 = arith.truncf %146 : vector<8x128xf32> to vector<8x128xbf16>
      %cst_86 = arith.constant dense<0.000000e+00> : vector<8x128xf32>
      %148 = tpu.matmul %147, %1, %cst_86 {dimension_numbers = #tpu.dot_dimension_numbers<[1], [0], [0], [1], [0, 0, 1, 1], [], []>} : vector<8x128xbf16>, vector<128x128xbf16>, vector<8x128xf32> -> vector<8x128xf32>
      %c168 = arith.constant 168 : index
      %c0_87 = arith.constant 0 : index
      %149 = vector.load %arg11[%c168, %c0_87] : memref<224x128xf32, #tpu.memory_space<vmem>>, vector<8x128xf32>
      %150 = arith.addf %149, %148 : vector<8x128xf32>
      %cst_88 = arith.constant 0.000000e+00 : f32
      %151 = vector.broadcast %cst_88 : f32 to vector<8x128xf32>
      %152 = arith.maximumf %150, %151 : vector<8x128xf32>
      %153 = arith.truncf %152 : vector<8x128xf32> to vector<8x128xbf16>
      %cst_89 = arith.constant dense<0.000000e+00> : vector<8x128xf32>
      %154 = tpu.matmul %153, %1, %cst_89 {dimension_numbers = #tpu.dot_dimension_numbers<[1], [0], [0], [1], [0, 0, 1, 1], [], []>} : vector<8x128xbf16>, vector<128x128xbf16>, vector<8x128xf32> -> vector<8x128xf32>
      %c176 = arith.constant 176 : index
      %c0_90 = arith.constant 0 : index
      %155 = vector.load %arg11[%c176, %c0_90] : memref<224x128xf32, #tpu.memory_space<vmem>>, vector<8x128xf32>
      %156 = arith.addf %155, %154 : vector<8x128xf32>
      %cst_91 = arith.constant 0.000000e+00 : f32
      %157 = vector.broadcast %cst_91 : f32 to vector<8x128xf32>
      %158 = arith.maximumf %156, %157 : vector<8x128xf32>
      %159 = arith.truncf %158 : vector<8x128xf32> to vector<8x128xbf16>
      %cst_92 = arith.constant dense<0.000000e+00> : vector<8x128xf32>
      %160 = tpu.matmul %159, %1, %cst_92 {dimension_numbers = #tpu.dot_dimension_numbers<[1], [0], [0], [1], [0, 0, 1, 1], [], []>} : vector<8x128xbf16>, vector<128x128xbf16>, vector<8x128xf32> -> vector<8x128xf32>
      %c184 = arith.constant 184 : index
      %c0_93 = arith.constant 0 : index
      %161 = vector.load %arg11[%c184, %c0_93] : memref<224x128xf32, #tpu.memory_space<vmem>>, vector<8x128xf32>
      %162 = arith.addf %161, %160 : vector<8x128xf32>
      %cst_94 = arith.constant 0.000000e+00 : f32
      %163 = vector.broadcast %cst_94 : f32 to vector<8x128xf32>
      %164 = arith.maximumf %162, %163 : vector<8x128xf32>
      %165 = arith.truncf %164 : vector<8x128xf32> to vector<8x128xbf16>
      %cst_95 = arith.constant dense<0.000000e+00> : vector<8x128xf32>
      %166 = tpu.matmul %165, %1, %cst_95 {dimension_numbers = #tpu.dot_dimension_numbers<[1], [0], [0], [1], [0, 0, 1, 1], [], []>} : vector<8x128xbf16>, vector<128x128xbf16>, vector<8x128xf32> -> vector<8x128xf32>
      %c192 = arith.constant 192 : index
      %c0_96 = arith.constant 0 : index
      %167 = vector.load %arg11[%c192, %c0_96] : memref<224x128xf32, #tpu.memory_space<vmem>>, vector<8x128xf32>
      %168 = arith.addf %167, %166 : vector<8x128xf32>
      %cst_97 = arith.constant 0.000000e+00 : f32
      %169 = vector.broadcast %cst_97 : f32 to vector<8x128xf32>
      %170 = arith.maximumf %168, %169 : vector<8x128xf32>
      %171 = arith.truncf %170 : vector<8x128xf32> to vector<8x128xbf16>
      %cst_98 = arith.constant dense<0.000000e+00> : vector<8x128xf32>
      %172 = tpu.matmul %171, %1, %cst_98 {dimension_numbers = #tpu.dot_dimension_numbers<[1], [0], [0], [1], [0, 0, 1, 1], [], []>} : vector<8x128xbf16>, vector<128x128xbf16>, vector<8x128xf32> -> vector<8x128xf32>
      %c200 = arith.constant 200 : index
      %c0_99 = arith.constant 0 : index
      %173 = vector.load %arg11[%c200, %c0_99] : memref<224x128xf32, #tpu.memory_space<vmem>>, vector<8x128xf32>
      %174 = arith.addf %173, %172 : vector<8x128xf32>
      %cst_100 = arith.constant 0.000000e+00 : f32
      %175 = vector.broadcast %cst_100 : f32 to vector<8x128xf32>
      %176 = arith.maximumf %174, %175 : vector<8x128xf32>
      %177 = arith.truncf %176 : vector<8x128xf32> to vector<8x128xbf16>
      %cst_101 = arith.constant dense<0.000000e+00> : vector<8x128xf32>
      %178 = tpu.matmul %177, %1, %cst_101 {dimension_numbers = #tpu.dot_dimension_numbers<[1], [0], [0], [1], [0, 0, 1, 1], [], []>} : vector<8x128xbf16>, vector<128x128xbf16>, vector<8x128xf32> -> vector<8x128xf32>
      %c208 = arith.constant 208 : index
      %c0_102 = arith.constant 0 : index
      %179 = vector.load %arg11[%c208, %c0_102] : memref<224x128xf32, #tpu.memory_space<vmem>>, vector<8x128xf32>
      %180 = arith.addf %179, %178 : vector<8x128xf32>
      %cst_103 = arith.constant 0.000000e+00 : f32
      %181 = vector.broadcast %cst_103 : f32 to vector<8x128xf32>
      %182 = arith.maximumf %180, %181 : vector<8x128xf32>
      %183 = arith.truncf %182 : vector<8x128xf32> to vector<8x128xbf16>
      %cst_104 = arith.constant dense<0.000000e+00> : vector<8x128xf32>
      %184 = tpu.matmul %183, %1, %cst_104 {dimension_numbers = #tpu.dot_dimension_numbers<[1], [0], [0], [1], [0, 0, 1, 1], [], []>} : vector<8x128xbf16>, vector<128x128xbf16>, vector<8x128xf32> -> vector<8x128xf32>
      %c216 = arith.constant 216 : index
      %c0_105 = arith.constant 0 : index
      %185 = vector.load %arg11[%c216, %c0_105] : memref<224x128xf32, #tpu.memory_space<vmem>>, vector<8x128xf32>
      %186 = arith.addf %185, %184 : vector<8x128xf32>
      %cst_106 = arith.constant 0.000000e+00 : f32
      %187 = vector.broadcast %cst_106 : f32 to vector<8x128xf32>
      %188 = arith.maximumf %186, %187 : vector<8x128xf32>
      %189 = arith.truncf %188 : vector<8x128xf32> to vector<8x128xbf16>
      %cst_107 = arith.constant dense<0.000000e+00> : vector<8x3584xf32>
      %190 = tpu.matmul %189, %2, %cst_107 {dimension_numbers = #tpu.dot_dimension_numbers<[1], [0], [0], [1], [0, 0, 1, 1], [], []>} : vector<8x128xbf16>, vector<128x3584xbf16>, vector<8x3584xf32> -> vector<8x3584xf32>
      %191 = vector.broadcast %3 : vector<1x3584xf32> to vector<8x3584xf32>
      %192 = arith.addf %190, %191 : vector<8x3584xf32>
      %c0_108 = arith.constant 0 : index
      %c0_109 = arith.constant 0 : index
      %193 = vector.load %arg9[%c0_108, %c0_109] : memref<224x128xf32, #tpu.memory_space<vmem>>, vector<8x128xf32>
      %194 = vector.broadcast %12 : f32 to vector<8x128xf32>
      %195 = arith.mulf %193, %194 : vector<8x128xf32>
      %196 = vector.extract_strided_slice %192 {offsets = [0, 0], sizes = [8, 128], strides = [1, 1]} : vector<8x3584xf32> to vector<8x128xf32>
      %197 = vector.broadcast %14 : f32 to vector<8x128xf32>
      %198 = arith.mulf %197, %196 : vector<8x128xf32>
      %199 = arith.subf %195, %198 : vector<8x128xf32>
      %c0_110 = arith.constant 0 : index
      %c0_111 = arith.constant 0 : index
      %200 = vector.load %arg9[%c0_110, %c0_111] : memref<224x128xf32, #tpu.memory_space<vmem>>, vector<8x128xf32>
      tpu.vector_store %arg9[%c0_110, %c0_111], %199 {strides = array<i32>} : memref<224x128xf32, #tpu.memory_space<vmem>>, vector<8x128xf32>,
      %c8_112 = arith.constant 8 : index
      %c0_113 = arith.constant 0 : index
      %201 = vector.load %arg9[%c8_112, %c0_113] : memref<224x128xf32, #tpu.memory_space<vmem>>, vector<8x128xf32>
      %202 = vector.broadcast %12 : f32 to vector<8x128xf32>
      %203 = arith.mulf %201, %202 : vector<8x128xf32>
      %204 = vector.extract_strided_slice %192 {offsets = [0, 128], sizes = [8, 128], strides = [1, 1]} : vector<8x3584xf32> to vector<8x128xf32>
      %205 = vector.broadcast %14 : f32 to vector<8x128xf32>
      %206 = arith.mulf %205, %204 : vector<8x128xf32>
      %207 = arith.subf %203, %206 : vector<8x128xf32>
      %c8_114 = arith.constant 8 : index
      %c0_115 = arith.constant 0 : index
      %208 = vector.load %arg9[%c8_114, %c0_115] : memref<224x128xf32, #tpu.memory_space<vmem>>, vector<8x128xf32>
      tpu.vector_store %arg9[%c8_114, %c0_115], %207 {strides = array<i32>} : memref<224x128xf32, #tpu.memory_space<vmem>>, vector<8x128xf32>,
      %c16_116 = arith.constant 16 : index
      %c0_117 = arith.constant 0 : index
      %209 = vector.load %arg9[%c16_116, %c0_117] : memref<224x128xf32, #tpu.memory_space<vmem>>, vector<8x128xf32>
      %210 = vector.broadcast %12 : f32 to vector<8x128xf32>
      %211 = arith.mulf %209, %210 : vector<8x128xf32>
      %212 = vector.extract_strided_slice %192 {offsets = [0, 256], sizes = [8, 128], strides = [1, 1]} : vector<8x3584xf32> to vector<8x128xf32>
      %213 = vector.broadcast %14 : f32 to vector<8x128xf32>
      %214 = arith.mulf %213, %212 : vector<8x128xf32>
      %215 = arith.subf %211, %214 : vector<8x128xf32>
      %c16_118 = arith.constant 16 : index
      %c0_119 = arith.constant 0 : index
      %216 = vector.load %arg9[%c16_118, %c0_119] : memref<224x128xf32, #tpu.memory_space<vmem>>, vector<8x128xf32>
      tpu.vector_store %arg9[%c16_118, %c0_119], %215 {strides = array<i32>} : memref<224x128xf32, #tpu.memory_space<vmem>>, vector<8x128xf32>,
      %c24_120 = arith.constant 24 : index
      %c0_121 = arith.constant 0 : index
      %217 = vector.load %arg9[%c24_120, %c0_121] : memref<224x128xf32, #tpu.memory_space<vmem>>, vector<8x128xf32>
      %218 = vector.broadcast %12 : f32 to vector<8x128xf32>
      %219 = arith.mulf %217, %218 : vector<8x128xf32>
      %220 = vector.extract_strided_slice %192 {offsets = [0, 384], sizes = [8, 128], strides = [1, 1]} : vector<8x3584xf32> to vector<8x128xf32>
      %221 = vector.broadcast %14 : f32 to vector<8x128xf32>
      %222 = arith.mulf %221, %220 : vector<8x128xf32>
      %223 = arith.subf %219, %222 : vector<8x128xf32>
      %c24_122 = arith.constant 24 : index
      %c0_123 = arith.constant 0 : index
      %224 = vector.load %arg9[%c24_122, %c0_123] : memref<224x128xf32, #tpu.memory_space<vmem>>, vector<8x128xf32>
      tpu.vector_store %arg9[%c24_122, %c0_123], %223 {strides = array<i32>} : memref<224x128xf32, #tpu.memory_space<vmem>>, vector<8x128xf32>,
      %c32_124 = arith.constant 32 : index
      %c0_125 = arith.constant 0 : index
      %225 = vector.load %arg9[%c32_124, %c0_125] : memref<224x128xf32, #tpu.memory_space<vmem>>, vector<8x128xf32>
      %226 = vector.broadcast %12 : f32 to vector<8x128xf32>
      %227 = arith.mulf %225, %226 : vector<8x128xf32>
      %228 = vector.extract_strided_slice %192 {offsets = [0, 512], sizes = [8, 128], strides = [1, 1]} : vector<8x3584xf32> to vector<8x128xf32>
      %229 = vector.broadcast %14 : f32 to vector<8x128xf32>
      %230 = arith.mulf %229, %228 : vector<8x128xf32>
      %231 = arith.subf %227, %230 : vector<8x128xf32>
      %c32_126 = arith.constant 32 : index
      %c0_127 = arith.constant 0 : index
      %232 = vector.load %arg9[%c32_126, %c0_127] : memref<224x128xf32, #tpu.memory_space<vmem>>, vector<8x128xf32>
      tpu.vector_store %arg9[%c32_126, %c0_127], %231 {strides = array<i32>} : memref<224x128xf32, #tpu.memory_space<vmem>>, vector<8x128xf32>,
      %c40_128 = arith.constant 40 : index
      %c0_129 = arith.constant 0 : index
      %233 = vector.load %arg9[%c40_128, %c0_129] : memref<224x128xf32, #tpu.memory_space<vmem>>, vector<8x128xf32>
      %234 = vector.broadcast %12 : f32 to vector<8x128xf32>
      %235 = arith.mulf %233, %234 : vector<8x128xf32>
      %236 = vector.extract_strided_slice %192 {offsets = [0, 640], sizes = [8, 128], strides = [1, 1]} : vector<8x3584xf32> to vector<8x128xf32>
      %237 = vector.broadcast %14 : f32 to vector<8x128xf32>
      %238 = arith.mulf %237, %236 : vector<8x128xf32>
      %239 = arith.subf %235, %238 : vector<8x128xf32>
      %c40_130 = arith.constant 40 : index
      %c0_131 = arith.constant 0 : index
      %240 = vector.load %arg9[%c40_130, %c0_131] : memref<224x128xf32, #tpu.memory_space<vmem>>, vector<8x128xf32>
      tpu.vector_store %arg9[%c40_130, %c0_131], %239 {strides = array<i32>} : memref<224x128xf32, #tpu.memory_space<vmem>>, vector<8x128xf32>,
      %c48_132 = arith.constant 48 : index
      %c0_133 = arith.constant 0 : index
      %241 = vector.load %arg9[%c48_132, %c0_133] : memref<224x128xf32, #tpu.memory_space<vmem>>, vector<8x128xf32>
      %242 = vector.broadcast %12 : f32 to vector<8x128xf32>
      %243 = arith.mulf %241, %242 : vector<8x128xf32>
      %244 = vector.extract_strided_slice %192 {offsets = [0, 768], sizes = [8, 128], strides = [1, 1]} : vector<8x3584xf32> to vector<8x128xf32>
      %245 = vector.broadcast %14 : f32 to vector<8x128xf32>
      %246 = arith.mulf %245, %244 : vector<8x128xf32>
      %247 = arith.subf %243, %246 : vector<8x128xf32>
      %c48_134 = arith.constant 48 : index
      %c0_135 = arith.constant 0 : index
      %248 = vector.load %arg9[%c48_134, %c0_135] : memref<224x128xf32, #tpu.memory_space<vmem>>, vector<8x128xf32>
      tpu.vector_store %arg9[%c48_134, %c0_135], %247 {strides = array<i32>} : memref<224x128xf32, #tpu.memory_space<vmem>>, vector<8x128xf32>,
      %c56_136 = arith.constant 56 : index
      %c0_137 = arith.constant 0 : index
      %249 = vector.load %arg9[%c56_136, %c0_137] : memref<224x128xf32, #tpu.memory_space<vmem>>, vector<8x128xf32>
      %250 = vector.broadcast %12 : f32 to vector<8x128xf32>
      %251 = arith.mulf %249, %250 : vector<8x128xf32>
      %252 = vector.extract_strided_slice %192 {offsets = [0, 896], sizes = [8, 128], strides = [1, 1]} : vector<8x3584xf32> to vector<8x128xf32>
      %253 = vector.broadcast %14 : f32 to vector<8x128xf32>
      %254 = arith.mulf %253, %252 : vector<8x128xf32>
      %255 = arith.subf %251, %254 : vector<8x128xf32>
      %c56_138 = arith.constant 56 : index
      %c0_139 = arith.constant 0 : index
      %256 = vector.load %arg9[%c56_138, %c0_139] : memref<224x128xf32, #tpu.memory_space<vmem>>, vector<8x128xf32>
      tpu.vector_store %arg9[%c56_138, %c0_139], %255 {strides = array<i32>} : memref<224x128xf32, #tpu.memory_space<vmem>>, vector<8x128xf32>,
      %c64_140 = arith.constant 64 : index
      %c0_141 = arith.constant 0 : index
      %257 = vector.load %arg9[%c64_140, %c0_141] : memref<224x128xf32, #tpu.memory_space<vmem>>, vector<8x128xf32>
      %258 = vector.broadcast %12 : f32 to vector<8x128xf32>
      %259 = arith.mulf %257, %258 : vector<8x128xf32>
      %260 = vector.extract_strided_slice %192 {offsets = [0, 1024], sizes = [8, 128], strides = [1, 1]} : vector<8x3584xf32> to vector<8x128xf32>
      %261 = vector.broadcast %14 : f32 to vector<8x128xf32>
      %262 = arith.mulf %261, %260 : vector<8x128xf32>
      %263 = arith.subf %259, %262 : vector<8x128xf32>
      %c64_142 = arith.constant 64 : index
      %c0_143 = arith.constant 0 : index
      %264 = vector.load %arg9[%c64_142, %c0_143] : memref<224x128xf32, #tpu.memory_space<vmem>>, vector<8x128xf32>
      tpu.vector_store %arg9[%c64_142, %c0_143], %263 {strides = array<i32>} : memref<224x128xf32, #tpu.memory_space<vmem>>, vector<8x128xf32>,
      %c72_144 = arith.constant 72 : index
      %c0_145 = arith.constant 0 : index
      %265 = vector.load %arg9[%c72_144, %c0_145] : memref<224x128xf32, #tpu.memory_space<vmem>>, vector<8x128xf32>
      %266 = vector.broadcast %12 : f32 to vector<8x128xf32>
      %267 = arith.mulf %265, %266 : vector<8x128xf32>
      %268 = vector.extract_strided_slice %192 {offsets = [0, 1152], sizes = [8, 128], strides = [1, 1]} : vector<8x3584xf32> to vector<8x128xf32>
      %269 = vector.broadcast %14 : f32 to vector<8x128xf32>
      %270 = arith.mulf %269, %268 : vector<8x128xf32>
      %271 = arith.subf %267, %270 : vector<8x128xf32>
      %c72_146 = arith.constant 72 : index
      %c0_147 = arith.constant 0 : index
      %272 = vector.load %arg9[%c72_146, %c0_147] : memref<224x128xf32, #tpu.memory_space<vmem>>, vector<8x128xf32>
      tpu.vector_store %arg9[%c72_146, %c0_147], %271 {strides = array<i32>} : memref<224x128xf32, #tpu.memory_space<vmem>>, vector<8x128xf32>,
      %c80_148 = arith.constant 80 : index
      %c0_149 = arith.constant 0 : index
      %273 = vector.load %arg9[%c80_148, %c0_149] : memref<224x128xf32, #tpu.memory_space<vmem>>, vector<8x128xf32>
      %274 = vector.broadcast %12 : f32 to vector<8x128xf32>
      %275 = arith.mulf %273, %274 : vector<8x128xf32>
      %276 = vector.extract_strided_slice %192 {offsets = [0, 1280], sizes = [8, 128], strides = [1, 1]} : vector<8x3584xf32> to vector<8x128xf32>
      %277 = vector.broadcast %14 : f32 to vector<8x128xf32>
      %278 = arith.mulf %277, %276 : vector<8x128xf32>
      %279 = arith.subf %275, %278 : vector<8x128xf32>
      %c80_150 = arith.constant 80 : index
      %c0_151 = arith.constant 0 : index
      %280 = vector.load %arg9[%c80_150, %c0_151] : memref<224x128xf32, #tpu.memory_space<vmem>>, vector<8x128xf32>
      tpu.vector_store %arg9[%c80_150, %c0_151], %279 {strides = array<i32>} : memref<224x128xf32, #tpu.memory_space<vmem>>, vector<8x128xf32>,
      %c88_152 = arith.constant 88 : index
      %c0_153 = arith.constant 0 : index
      %281 = vector.load %arg9[%c88_152, %c0_153] : memref<224x128xf32, #tpu.memory_space<vmem>>, vector<8x128xf32>
      %282 = vector.broadcast %12 : f32 to vector<8x128xf32>
      %283 = arith.mulf %281, %282 : vector<8x128xf32>
      %284 = vector.extract_strided_slice %192 {offsets = [0, 1408], sizes = [8, 128], strides = [1, 1]} : vector<8x3584xf32> to vector<8x128xf32>
      %285 = vector.broadcast %14 : f32 to vector<8x128xf32>
      %286 = arith.mulf %285, %284 : vector<8x128xf32>
      %287 = arith.subf %283, %286 : vector<8x128xf32>
      %c88_154 = arith.constant 88 : index
      %c0_155 = arith.constant 0 : index
      %288 = vector.load %arg9[%c88_154, %c0_155] : memref<224x128xf32, #tpu.memory_space<vmem>>, vector<8x128xf32>
      tpu.vector_store %arg9[%c88_154, %c0_155], %287 {strides = array<i32>} : memref<224x128xf32, #tpu.memory_space<vmem>>, vector<8x128xf32>,
      %c96_156 = arith.constant 96 : index
      %c0_157 = arith.constant 0 : index
      %289 = vector.load %arg9[%c96_156, %c0_157] : memref<224x128xf32, #tpu.memory_space<vmem>>, vector<8x128xf32>
      %290 = vector.broadcast %12 : f32 to vector<8x128xf32>
      %291 = arith.mulf %289, %290 : vector<8x128xf32>
      %292 = vector.extract_strided_slice %192 {offsets = [0, 1536], sizes = [8, 128], strides = [1, 1]} : vector<8x3584xf32> to vector<8x128xf32>
      %293 = vector.broadcast %14 : f32 to vector<8x128xf32>
      %294 = arith.mulf %293, %292 : vector<8x128xf32>
      %295 = arith.subf %291, %294 : vector<8x128xf32>
      %c96_158 = arith.constant 96 : index
      %c0_159 = arith.constant 0 : index
      %296 = vector.load %arg9[%c96_158, %c0_159] : memref<224x128xf32, #tpu.memory_space<vmem>>, vector<8x128xf32>
      tpu.vector_store %arg9[%c96_158, %c0_159], %295 {strides = array<i32>} : memref<224x128xf32, #tpu.memory_space<vmem>>, vector<8x128xf32>,
      %c104_160 = arith.constant 104 : index
      %c0_161 = arith.constant 0 : index
      %297 = vector.load %arg9[%c104_160, %c0_161] : memref<224x128xf32, #tpu.memory_space<vmem>>, vector<8x128xf32>
      %298 = vector.broadcast %12 : f32 to vector<8x128xf32>
      %299 = arith.mulf %297, %298 : vector<8x128xf32>
      %300 = vector.extract_strided_slice %192 {offsets = [0, 1664], sizes = [8, 128], strides = [1, 1]} : vector<8x3584xf32> to vector<8x128xf32>
      %301 = vector.broadcast %14 : f32 to vector<8x128xf32>
      %302 = arith.mulf %301, %300 : vector<8x128xf32>
      %303 = arith.subf %299, %302 : vector<8x128xf32>
      %c104_162 = arith.constant 104 : index
      %c0_163 = arith.constant 0 : index
      %304 = vector.load %arg9[%c104_162, %c0_163] : memref<224x128xf32, #tpu.memory_space<vmem>>, vector<8x128xf32>
      tpu.vector_store %arg9[%c104_162, %c0_163], %303 {strides = array<i32>} : memref<224x128xf32, #tpu.memory_space<vmem>>, vector<8x128xf32>,
      %c112_164 = arith.constant 112 : index
      %c0_165 = arith.constant 0 : index
      %305 = vector.load %arg9[%c112_164, %c0_165] : memref<224x128xf32, #tpu.memory_space<vmem>>, vector<8x128xf32>
      %306 = vector.broadcast %12 : f32 to vector<8x128xf32>
      %307 = arith.mulf %305, %306 : vector<8x128xf32>
      %308 = vector.extract_strided_slice %192 {offsets = [0, 1792], sizes = [8, 128], strides = [1, 1]} : vector<8x3584xf32> to vector<8x128xf32>
      %309 = vector.broadcast %14 : f32 to vector<8x128xf32>
      %310 = arith.mulf %309, %308 : vector<8x128xf32>
      %311 = arith.subf %307, %310 : vector<8x128xf32>
      %c112_166 = arith.constant 112 : index
      %c0_167 = arith.constant 0 : index
      %312 = vector.load %arg9[%c112_166, %c0_167] : memref<224x128xf32, #tpu.memory_space<vmem>>, vector<8x128xf32>
      tpu.vector_store %arg9[%c112_166, %c0_167], %311 {strides = array<i32>} : memref<224x128xf32, #tpu.memory_space<vmem>>, vector<8x128xf32>,
      %c120_168 = arith.constant 120 : index
      %c0_169 = arith.constant 0 : index
      %313 = vector.load %arg9[%c120_168, %c0_169] : memref<224x128xf32, #tpu.memory_space<vmem>>, vector<8x128xf32>
      %314 = vector.broadcast %12 : f32 to vector<8x128xf32>
      %315 = arith.mulf %313, %314 : vector<8x128xf32>
      %316 = vector.extract_strided_slice %192 {offsets = [0, 1920], sizes = [8, 128], strides = [1, 1]} : vector<8x3584xf32> to vector<8x128xf32>
      %317 = vector.broadcast %14 : f32 to vector<8x128xf32>
      %318 = arith.mulf %317, %316 : vector<8x128xf32>
      %319 = arith.subf %315, %318 : vector<8x128xf32>
      %c120_170 = arith.constant 120 : index
      %c0_171 = arith.constant 0 : index
      %320 = vector.load %arg9[%c120_170, %c0_171] : memref<224x128xf32, #tpu.memory_space<vmem>>, vector<8x128xf32>
      tpu.vector_store %arg9[%c120_170, %c0_171], %319 {strides = array<i32>} : memref<224x128xf32, #tpu.memory_space<vmem>>, vector<8x128xf32>,
      %c128_172 = arith.constant 128 : index
      %c0_173 = arith.constant 0 : index
      %321 = vector.load %arg9[%c128_172, %c0_173] : memref<224x128xf32, #tpu.memory_space<vmem>>, vector<8x128xf32>
      %322 = vector.broadcast %12 : f32 to vector<8x128xf32>
      %323 = arith.mulf %321, %322 : vector<8x128xf32>
      %324 = vector.extract_strided_slice %192 {offsets = [0, 2048], sizes = [8, 128], strides = [1, 1]} : vector<8x3584xf32> to vector<8x128xf32>
      %325 = vector.broadcast %14 : f32 to vector<8x128xf32>
      %326 = arith.mulf %325, %324 : vector<8x128xf32>
      %327 = arith.subf %323, %326 : vector<8x128xf32>
      %c128_174 = arith.constant 128 : index
      %c0_175 = arith.constant 0 : index
      %328 = vector.load %arg9[%c128_174, %c0_175] : memref<224x128xf32, #tpu.memory_space<vmem>>, vector<8x128xf32>
      tpu.vector_store %arg9[%c128_174, %c0_175], %327 {strides = array<i32>} : memref<224x128xf32, #tpu.memory_space<vmem>>, vector<8x128xf32>,
      %c136_176 = arith.constant 136 : index
      %c0_177 = arith.constant 0 : index
      %329 = vector.load %arg9[%c136_176, %c0_177] : memref<224x128xf32, #tpu.memory_space<vmem>>, vector<8x128xf32>
      %330 = vector.broadcast %12 : f32 to vector<8x128xf32>
      %331 = arith.mulf %329, %330 : vector<8x128xf32>
      %332 = vector.extract_strided_slice %192 {offsets = [0, 2176], sizes = [8, 128], strides = [1, 1]} : vector<8x3584xf32> to vector<8x128xf32>
      %333 = vector.broadcast %14 : f32 to vector<8x128xf32>
      %334 = arith.mulf %333, %332 : vector<8x128xf32>
      %335 = arith.subf %331, %334 : vector<8x128xf32>
      %c136_178 = arith.constant 136 : index
      %c0_179 = arith.constant 0 : index
      %336 = vector.load %arg9[%c136_178, %c0_179] : memref<224x128xf32, #tpu.memory_space<vmem>>, vector<8x128xf32>
      tpu.vector_store %arg9[%c136_178, %c0_179], %335 {strides = array<i32>} : memref<224x128xf32, #tpu.memory_space<vmem>>, vector<8x128xf32>,
      %c144_180 = arith.constant 144 : index
      %c0_181 = arith.constant 0 : index
      %337 = vector.load %arg9[%c144_180, %c0_181] : memref<224x128xf32, #tpu.memory_space<vmem>>, vector<8x128xf32>
      %338 = vector.broadcast %12 : f32 to vector<8x128xf32>
      %339 = arith.mulf %337, %338 : vector<8x128xf32>
      %340 = vector.extract_strided_slice %192 {offsets = [0, 2304], sizes = [8, 128], strides = [1, 1]} : vector<8x3584xf32> to vector<8x128xf32>
      %341 = vector.broadcast %14 : f32 to vector<8x128xf32>
      %342 = arith.mulf %341, %340 : vector<8x128xf32>
      %343 = arith.subf %339, %342 : vector<8x128xf32>
      %c144_182 = arith.constant 144 : index
      %c0_183 = arith.constant 0 : index
      %344 = vector.load %arg9[%c144_182, %c0_183] : memref<224x128xf32, #tpu.memory_space<vmem>>, vector<8x128xf32>
      tpu.vector_store %arg9[%c144_182, %c0_183], %343 {strides = array<i32>} : memref<224x128xf32, #tpu.memory_space<vmem>>, vector<8x128xf32>,
      %c152_184 = arith.constant 152 : index
      %c0_185 = arith.constant 0 : index
      %345 = vector.load %arg9[%c152_184, %c0_185] : memref<224x128xf32, #tpu.memory_space<vmem>>, vector<8x128xf32>
      %346 = vector.broadcast %12 : f32 to vector<8x128xf32>
      %347 = arith.mulf %345, %346 : vector<8x128xf32>
      %348 = vector.extract_strided_slice %192 {offsets = [0, 2432], sizes = [8, 128], strides = [1, 1]} : vector<8x3584xf32> to vector<8x128xf32>
      %349 = vector.broadcast %14 : f32 to vector<8x128xf32>
      %350 = arith.mulf %349, %348 : vector<8x128xf32>
      %351 = arith.subf %347, %350 : vector<8x128xf32>
      %c152_186 = arith.constant 152 : index
      %c0_187 = arith.constant 0 : index
      %352 = vector.load %arg9[%c152_186, %c0_187] : memref<224x128xf32, #tpu.memory_space<vmem>>, vector<8x128xf32>
      tpu.vector_store %arg9[%c152_186, %c0_187], %351 {strides = array<i32>} : memref<224x128xf32, #tpu.memory_space<vmem>>, vector<8x128xf32>,
      %c160_188 = arith.constant 160 : index
      %c0_189 = arith.constant 0 : index
      %353 = vector.load %arg9[%c160_188, %c0_189] : memref<224x128xf32, #tpu.memory_space<vmem>>, vector<8x128xf32>
      %354 = vector.broadcast %12 : f32 to vector<8x128xf32>
      %355 = arith.mulf %353, %354 : vector<8x128xf32>
      %356 = vector.extract_strided_slice %192 {offsets = [0, 2560], sizes = [8, 128], strides = [1, 1]} : vector<8x3584xf32> to vector<8x128xf32>
      %357 = vector.broadcast %14 : f32 to vector<8x128xf32>
      %358 = arith.mulf %357, %356 : vector<8x128xf32>
      %359 = arith.subf %355, %358 : vector<8x128xf32>
      %c160_190 = arith.constant 160 : index
      %c0_191 = arith.constant 0 : index
      %360 = vector.load %arg9[%c160_190, %c0_191] : memref<224x128xf32, #tpu.memory_space<vmem>>, vector<8x128xf32>
      tpu.vector_store %arg9[%c160_190, %c0_191], %359 {strides = array<i32>} : memref<224x128xf32, #tpu.memory_space<vmem>>, vector<8x128xf32>,
      %c168_192 = arith.constant 168 : index
      %c0_193 = arith.constant 0 : index
      %361 = vector.load %arg9[%c168_192, %c0_193] : memref<224x128xf32, #tpu.memory_space<vmem>>, vector<8x128xf32>
      %362 = vector.broadcast %12 : f32 to vector<8x128xf32>
      %363 = arith.mulf %361, %362 : vector<8x128xf32>
      %364 = vector.extract_strided_slice %192 {offsets = [0, 2688], sizes = [8, 128], strides = [1, 1]} : vector<8x3584xf32> to vector<8x128xf32>
      %365 = vector.broadcast %14 : f32 to vector<8x128xf32>
      %366 = arith.mulf %365, %364 : vector<8x128xf32>
      %367 = arith.subf %363, %366 : vector<8x128xf32>
      %c168_194 = arith.constant 168 : index
      %c0_195 = arith.constant 0 : index
      %368 = vector.load %arg9[%c168_194, %c0_195] : memref<224x128xf32, #tpu.memory_space<vmem>>, vector<8x128xf32>
      tpu.vector_store %arg9[%c168_194, %c0_195], %367 {strides = array<i32>} : memref<224x128xf32, #tpu.memory_space<vmem>>, vector<8x128xf32>,
      %c176_196 = arith.constant 176 : index
      %c0_197 = arith.constant 0 : index
      %369 = vector.load %arg9[%c176_196, %c0_197] : memref<224x128xf32, #tpu.memory_space<vmem>>, vector<8x128xf32>
      %370 = vector.broadcast %12 : f32 to vector<8x128xf32>
      %371 = arith.mulf %369, %370 : vector<8x128xf32>
      %372 = vector.extract_strided_slice %192 {offsets = [0, 2816], sizes = [8, 128], strides = [1, 1]} : vector<8x3584xf32> to vector<8x128xf32>
      %373 = vector.broadcast %14 : f32 to vector<8x128xf32>
      %374 = arith.mulf %373, %372 : vector<8x128xf32>
      %375 = arith.subf %371, %374 : vector<8x128xf32>
      %c176_198 = arith.constant 176 : index
      %c0_199 = arith.constant 0 : index
      %376 = vector.load %arg9[%c176_198, %c0_199] : memref<224x128xf32, #tpu.memory_space<vmem>>, vector<8x128xf32>
      tpu.vector_store %arg9[%c176_198, %c0_199], %375 {strides = array<i32>} : memref<224x128xf32, #tpu.memory_space<vmem>>, vector<8x128xf32>,
      %c184_200 = arith.constant 184 : index
      %c0_201 = arith.constant 0 : index
      %377 = vector.load %arg9[%c184_200, %c0_201] : memref<224x128xf32, #tpu.memory_space<vmem>>, vector<8x128xf32>
      %378 = vector.broadcast %12 : f32 to vector<8x128xf32>
      %379 = arith.mulf %377, %378 : vector<8x128xf32>
      %380 = vector.extract_strided_slice %192 {offsets = [0, 2944], sizes = [8, 128], strides = [1, 1]} : vector<8x3584xf32> to vector<8x128xf32>
      %381 = vector.broadcast %14 : f32 to vector<8x128xf32>
      %382 = arith.mulf %381, %380 : vector<8x128xf32>
      %383 = arith.subf %379, %382 : vector<8x128xf32>
      %c184_202 = arith.constant 184 : index
      %c0_203 = arith.constant 0 : index
      %384 = vector.load %arg9[%c184_202, %c0_203] : memref<224x128xf32, #tpu.memory_space<vmem>>, vector<8x128xf32>
      tpu.vector_store %arg9[%c184_202, %c0_203], %383 {strides = array<i32>} : memref<224x128xf32, #tpu.memory_space<vmem>>, vector<8x128xf32>,
      %c192_204 = arith.constant 192 : index
      %c0_205 = arith.constant 0 : index
      %385 = vector.load %arg9[%c192_204, %c0_205] : memref<224x128xf32, #tpu.memory_space<vmem>>, vector<8x128xf32>
      %386 = vector.broadcast %12 : f32 to vector<8x128xf32>
      %387 = arith.mulf %385, %386 : vector<8x128xf32>
      %388 = vector.extract_strided_slice %192 {offsets = [0, 3072], sizes = [8, 128], strides = [1, 1]} : vector<8x3584xf32> to vector<8x128xf32>
      %389 = vector.broadcast %14 : f32 to vector<8x128xf32>
      %390 = arith.mulf %389, %388 : vector<8x128xf32>
      %391 = arith.subf %387, %390 : vector<8x128xf32>
      %c192_206 = arith.constant 192 : index
      %c0_207 = arith.constant 0 : index
      %392 = vector.load %arg9[%c192_206, %c0_207] : memref<224x128xf32, #tpu.memory_space<vmem>>, vector<8x128xf32>
      tpu.vector_store %arg9[%c192_206, %c0_207], %391 {strides = array<i32>} : memref<224x128xf32, #tpu.memory_space<vmem>>, vector<8x128xf32>,
      %c200_208 = arith.constant 200 : index
      %c0_209 = arith.constant 0 : index
      %393 = vector.load %arg9[%c200_208, %c0_209] : memref<224x128xf32, #tpu.memory_space<vmem>>, vector<8x128xf32>
      %394 = vector.broadcast %12 : f32 to vector<8x128xf32>
      %395 = arith.mulf %393, %394 : vector<8x128xf32>
      %396 = vector.extract_strided_slice %192 {offsets = [0, 3200], sizes = [8, 128], strides = [1, 1]} : vector<8x3584xf32> to vector<8x128xf32>
      %397 = vector.broadcast %14 : f32 to vector<8x128xf32>
      %398 = arith.mulf %397, %396 : vector<8x128xf32>
      %399 = arith.subf %395, %398 : vector<8x128xf32>
      %c200_210 = arith.constant 200 : index
      %c0_211 = arith.constant 0 : index
      %400 = vector.load %arg9[%c200_210, %c0_211] : memref<224x128xf32, #tpu.memory_space<vmem>>, vector<8x128xf32>
      tpu.vector_store %arg9[%c200_210, %c0_211], %399 {strides = array<i32>} : memref<224x128xf32, #tpu.memory_space<vmem>>, vector<8x128xf32>,
      %c208_212 = arith.constant 208 : index
      %c0_213 = arith.constant 0 : index
      %401 = vector.load %arg9[%c208_212, %c0_213] : memref<224x128xf32, #tpu.memory_space<vmem>>, vector<8x128xf32>
      %402 = vector.broadcast %12 : f32 to vector<8x128xf32>
      %403 = arith.mulf %401, %402 : vector<8x128xf32>
      %404 = vector.extract_strided_slice %192 {offsets = [0, 3328], sizes = [8, 128], strides = [1, 1]} : vector<8x3584xf32> to vector<8x128xf32>
      %405 = vector.broadcast %14 : f32 to vector<8x128xf32>
      %406 = arith.mulf %405, %404 : vector<8x128xf32>
      %407 = arith.subf %403, %406 : vector<8x128xf32>
      %c208_214 = arith.constant 208 : index
      %c0_215 = arith.constant 0 : index
      %408 = vector.load %arg9[%c208_214, %c0_215] : memref<224x128xf32, #tpu.memory_space<vmem>>, vector<8x128xf32>
      tpu.vector_store %arg9[%c208_214, %c0_215], %407 {strides = array<i32>} : memref<224x128xf32, #tpu.memory_space<vmem>>, vector<8x128xf32>,
      %c216_216 = arith.constant 216 : index
      %c0_217 = arith.constant 0 : index
      %409 = vector.load %arg9[%c216_216, %c0_217] : memref<224x128xf32, #tpu.memory_space<vmem>>, vector<8x128xf32>
      %410 = vector.broadcast %12 : f32 to vector<8x128xf32>
      %411 = arith.mulf %409, %410 : vector<8x128xf32>
      %412 = vector.extract_strided_slice %192 {offsets = [0, 3456], sizes = [8, 128], strides = [1, 1]} : vector<8x3584xf32> to vector<8x128xf32>
      %413 = vector.broadcast %14 : f32 to vector<8x128xf32>
      %414 = arith.mulf %413, %412 : vector<8x128xf32>
      %415 = arith.subf %411, %414 : vector<8x128xf32>
      %c216_218 = arith.constant 216 : index
      %c0_219 = arith.constant 0 : index
      %416 = vector.load %arg9[%c216_218, %c0_219] : memref<224x128xf32, #tpu.memory_space<vmem>>, vector<8x128xf32>
      tpu.vector_store %arg9[%c216_218, %c0_219], %415 {strides = array<i32>} : memref<224x128xf32, #tpu.memory_space<vmem>>, vector<8x128xf32>,
      scf.yield %188 : vector<8x128xf32>
    }
    %c50_i32_15 = arith.constant 50 : i32
    %c0_16 = arith.constant 0 : index
    %c0_17 = arith.constant 0 : index
    %10 = vector.load %arg10[%c0_16, %c0_17] : memref<8x128xf32, #tpu.memory_space<vmem>>, vector<8x128xf32>
    tpu.vector_store %arg10[%c0_16, %c0_17], %9 {strides = array<i32>} : memref<8x128xf32, #tpu.memory_space<vmem>>, vector<8x128xf32>,
    return
  }
}

</mosaic_0001>

<bundles_post_ra>
// kernel: ddpm_forward.1
= control target key start
LH: loop header
LB: loop body
LE: loop exit
PB: predicated region body
PF: predicated region fallthrough
CT: control target
= control target key end

     0   :  { %16 = vsyncpa [#allocation4], 0  ;;  %s7888_s0 = inlined_call_operand.vmem [shape: f32[50], index: 0, kind: input, shape index: {}]   ;;  %s7889_s1 = inlined_call_operand.vmem [shape: f32[50], index: 1, kind: input, shape index: {}]   ;;  %s7890_s2 = inlined_call_operand.vmem [shape: f32[224,128], index: 2, kind: input, shape index: {}]   ;;  %s7891_s3 = inlined_call_operand.vmem [shape: f32[8,128], index: 3, kind: input, shape index: {}]   ;;  %s7892_s4 = inlined_call_operand.vmem [shape: bf16[128,128], index: 4, kind: input, shape index: {}]   ;;  %s7893_s5 = inlined_call_operand.vmem [shape: bf16[128,128], index: 5, kind: input, shape index: {}]   ;;  %s7894_s6 = inlined_call_operand.vmem [shape: f32[1,128], index: 6, kind: input, shape index: {}]   ;;  %s7895_s7 = inlined_call_operand.vmem [shape: bf16[128,3584], index: 7, kind: input, shape index: {}]   ;;  %s7896_s8 = inlined_call_operand.vmem [shape: f32[1,3584], index: 8, kind: input, shape index: {}]   ;;  %s7897_s9 = inlined_call_operand.vmem [shape: f32[224,128], index: 9, kind: output, shape index: {0}]   ;;  %s7898_s10 = inlined_call_operand.vmem [shape: f32[8,128], index: 10, kind: output, shape index: {1}]  }
   0x1   :  { %s23_s15 = sshll.u32 %s7888_s0, 4  ;;  %s24_s15 = int_to_ptr.vmem [resolvable:$true] %s23_s15 }
   0x2   :  { %17 = vsyncpa [#allocation6], 0  ;;  %s32_s18 = sshll.u32 %s7889_s1, 4  ;;  %s4078_s19 = smov [#allocation3]   ;;  %s33_s18 = int_to_ptr.vmem [resolvable:$true] %s32_s18 }
   0x3   :  { %26 = dma.vmem_to_smem %s24_s15, 16, %s4078_s19, [#allocation4]  }
   0x4   :  { %s4079_s20 = smov [#allocation5]  }
   0x5   :  { %35 = dma.vmem_to_smem %s33_s18, 16, %s4079_s20, [#allocation6]  }
   0x6   :  { %4066 = dma.done.wait [#allocation4], 16  }
   0x7   :  { %4067 = vsyncadd [#allocation4], 4294967280 }
   0x8   :  { %4068 = dma.done.wait [#allocation6], 16  }
   0x9   :  { %4069 = vsyncadd [#allocation6], 4294967280 }
   0xa   :  { %58 = sfence }
   0xb   :  { %v4144_v0 = vld [vmem:[%s7892_s4] sm:$0xf]  ;;  %v4149_v1 = vld [vmem:[%s7892_s4] sm:$0xf0]  ;;  %v4154_v2 = vld [vmem:[%s7892_s4 + $0x8] sm:$0xf] }
   0xc   :  { %7903 = vst [vmem:[#allocation9_spill] sm:$0xff] %v4144_v0  ;;  %v4159_v3 = vld [vmem:[%s7892_s4 + $0x8] sm:$0xf0]  ;;  %v4164_v4 = vld [vmem:[%s7892_s4 + $0x10] sm:$0xf] }
   0xd   :  { %7904 = vst [vmem:[#allocation10_spill] sm:$0xff] %v4149_v1  ;;  %v4169_v5 = vld [vmem:[%s7892_s4 + $0x10] sm:$0xf0]  ;;  %v4174_v6 = vld [vmem:[%s7892_s4 + $0x18] sm:$0xf] }
   0xe   :  { %7905 = vst [vmem:[#allocation11_spill] sm:$0xff] %v4154_v2  ;;  %v4179_v7 = vld [vmem:[%s7892_s4 + $0x18] sm:$0xf0]  ;;  %v4184_v8 = vld [vmem:[%s7892_s4 + $0x20] sm:$0xf] }
   0xf   :  { %7906 = vst [vmem:[#allocation12_spill] sm:$0xff] %v4159_v3  ;;  %v4189_v9 = vld [vmem:[%s7892_s4 + $0x20] sm:$0xf0]  ;;  %v4194_v10 = vld [vmem:[%s7892_s4 + $0x28] sm:$0xf] }
  0x10   :  { %7907 = vst [vmem:[#allocation13_spill] sm:$0xff] %v4164_v4  ;;  %v4199_v11 = vld [vmem:[%s7892_s4 + $0x28] sm:$0xf0]  ;;  %v4204_v12 = vld [vmem:[%s7892_s4 + $0x30] sm:$0xf] }
  0x11   :  { %7908 = vst [vmem:[#allocation14_spill] sm:$0xff] %v4169_v5  ;;  %v4209_v13 = vld [vmem:[%s7892_s4 + $0x30] sm:$0xf0]  ;;  %v4214_v14 = vld [vmem:[%s7892_s4 + $0x38] sm:$0xf] }
  0x12   :  { %7909 = vst [vmem:[#allocation15_spill] sm:$0xff] %v4174_v6  ;;  %v4219_v15 = vld [vmem:[%s7892_s4 + $0x38] sm:$0xf0]  ;;  %v4224_v16 = vld [vmem:[%s7893_s5] sm:$0xf] }
  0x13   :  { %7910 = vst [vmem:[#allocation16_spill] sm:$0xff] %v4179_v7  ;;  %v4229_v17 = vld [vmem:[%s7893_s5] sm:$0xf0]  ;;  %v4234_v18 = vld [vmem:[%s7893_s5 + $0x8] sm:$0xf] }
  0x14   :  { %7911 = vst [vmem:[#allocation17_spill] sm:$0xff] %v4184_v8  ;;  %v4239_v19 = vld [vmem:[%s7893_s5 + $0x8] sm:$0xf0]  ;;  %v4244_v20 = vld [vmem:[%s7893_s5 + $0x10] sm:$0xf] }
  0x15   :  { %7912 = vst [vmem:[#allocation18_spill] sm:$0xff] %v4189_v9  ;;  %v4249_v21 = vld [vmem:[%s7893_s5 + $0x10] sm:$0xf0]  ;;  %v4254_v22 = vld [vmem:[%s7893_s5 + $0x18] sm:$0xf] }
  0x16   :  { %7913 = vst [vmem:[#allocation19_spill] sm:$0xff] %v4194_v10  ;;  %v4259_v23 = vld [vmem:[%s7893_s5 + $0x18] sm:$0xf0]  ;;  %v4264_v24 = vld [vmem:[%s7893_s5 + $0x20] sm:$0xf] }
  0x17   :  { %7914 = vst [vmem:[#allocation20_spill] sm:$0xff] %v4199_v11  ;;  %v4269_v25 = vld [vmem:[%s7893_s5 + $0x20] sm:$0xf0]  ;;  %v4274_v26 = vld [vmem:[%s7893_s5 + $0x28] sm:$0xf] }
  0x18   :  { %7915 = vst [vmem:[#allocation21_spill] sm:$0xff] %v4204_v12  ;;  %v4279_v27 = vld [vmem:[%s7893_s5 + $0x28] sm:$0xf0]  ;;  %v4284_v28 = vld [vmem:[%s7893_s5 + $0x30] sm:$0xf] }
  0x19   :  { %7916 = vst [vmem:[#allocation22_spill] sm:$0xff] %v4209_v13  ;;  %v4289_v29 = vld [vmem:[%s7893_s5 + $0x30] sm:$0xf0]  ;;  %v4294_v30 = vld [vmem:[%s7893_s5 + $0x38] sm:$0xf] }
  0x1a   :  { %7917 = vst [vmem:[#allocation23_spill] sm:$0xff] %v4214_v14  ;;  %v4299_v31 = vld [vmem:[%s7893_s5 + $0x38] sm:$0xf0]  ;;  %v4304_v32 = vld [vmem:[%s7895_s7 + $0x4] sm:$0xf] }
  0x1b   :  { %7918 = vst [vmem:[#allocation24_spill] sm:$0xff] %v4219_v15  ;;  %v4309_v33 = vld [vmem:[%s7895_s7] sm:$0xf]  ;;  %v4314_v34 = vld [vmem:[%s7895_s7 + $0xc] sm:$0xf] }
  0x1c   :  { %7919 = vst [vmem:[#allocation25_spill] sm:$0xff] %v4224_v16  ;;  %v4319_v35 = vld [vmem:[%s7895_s7 + $0x8] sm:$0xf]  ;;  %v4324_v36 = vld [vmem:[%s7895_s7 + $0x14] sm:$0xf] }
  0x1d   :  { %7920 = vst [vmem:[#allocation26_spill] sm:$0xff] %v4229_v17  ;;  %v4329_v37 = vld [vmem:[%s7895_s7 + $0x10] sm:$0xf]  ;;  %v4334_v38 = vld [vmem:[%s7895_s7 + $0x1c] sm:$0xf] }
  0x1e   :  { %7921 = vst [vmem:[#allocation27_spill] sm:$0xff] %v4234_v18  ;;  %v4339_v39 = vld [vmem:[%s7895_s7 + $0x18] sm:$0xf]  ;;  %v4344_v40 = vld [vmem:[%s7895_s7 + $0x24] sm:$0xf] }
  0x1f   :  { %7922 = vst [vmem:[#allocation28_spill] sm:$0xff] %v4239_v19  ;;  %v4349_v41 = vld [vmem:[%s7895_s7 + $0x20] sm:$0xf]  ;;  %v4354_v42 = vld [vmem:[%s7895_s7 + $0x2c] sm:$0xf] }
  0x20   :  { %7923 = vst [vmem:[#allocation29_spill] sm:$0xff] %v4244_v20  ;;  %v4359_v43 = vld [vmem:[%s7895_s7 + $0x28] sm:$0xf]  ;;  %v4364_v44 = vld [vmem:[%s7895_s7 + $0x34] sm:$0xf] }
  0x21   :  { %7924 = vst [vmem:[#allocation30_spill] sm:$0xff] %v4249_v21  ;;  %v4369_v45 = vld [vmem:[%s7895_s7 + $0x30] sm:$0xf]  ;;  %v4374_v46 = vld [vmem:[%s7895_s7 + $0x3c] sm:$0xf] }
  0x22   :  { %7925 = vst [vmem:[#allocation31_spill] sm:$0xff] %v4254_v22  ;;  %v4379_v47 = vld [vmem:[%s7895_s7 + $0x38] sm:$0xf]  ;;  %v4384_v48 = vld [vmem:[%s7895_s7 + $0x44] sm:$0xf] }
  0x23   :  { %7926 = vst [vmem:[#allocation32_spill] sm:$0xff] %v4259_v23  ;;  %v4389_v49 = vld [vmem:[%s7895_s7 + $0x40] sm:$0xf]  ;;  %v4394_v50 = vld [vmem:[%s7895_s7 + $0x4c] sm:$0xf] }
  0x24   :  { %7927 = vst [vmem:[#allocation33_spill] sm:$0xff] %v4304_v32  ;;  %v4399_v51 = vld [vmem:[%s7895_s7 + $0x48] sm:$0xf]  ;;  %v4404_v52 = vld [vmem:[%s7895_s7 + $0x54] sm:$0xf] }
  0x25   :  { %7928 = vst [vmem:[#allocation34_spill] sm:$0xff] %v4309_v33  ;;  %v4409_v53 = vld [vmem:[%s7895_s7 + $0x50] sm:$0xf]  ;;  %v4414_v54 = vld [vmem:[%s7895_s7 + $0x5c] sm:$0xf] }
  0x26   :  { %7929 = vst [vmem:[#allocation35_spill] sm:$0xff] %v4314_v34  ;;  %v4419_v55 = vld [vmem:[%s7895_s7 + $0x58] sm:$0xf]  ;;  %v4424_v56 = vld [vmem:[%s7895_s7 + $0x64] sm:$0xf] }
  0x27   :  { %7930 = vst [vmem:[#allocation36_spill] sm:$0xff] %v4319_v35  ;;  %v4429_v57 = vld [vmem:[%s7895_s7 + $0x60] sm:$0xf]  ;;  %v4434_v58 = vld [vmem:[%s7895_s7 + $0x6c] sm:$0xf] }
  0x28   :  { %7931 = vst [vmem:[#allocation37_spill] sm:$0xff] %v4324_v36  ;;  %v4439_v59 = vld [vmem:[%s7895_s7 + $0x68] sm:$0xf]  ;;  %v4444_v60 = vld [vmem:[%s7895_s7 + $0x70] sm:$0xf0] }
  0x29   :  { %7932 = vst [vmem:[#allocation38_spill] sm:$0xff] %v4329_v37  ;;  %v4449_v61 = vld [vmem:[%s7895_s7 + $0x6c] sm:$0xf0]  ;;  %v4454_v62 = vld [vmem:[%s7895_s7 + $0x78] sm:$0xf0] }
  0x2a   :  { %7933 = vst [vmem:[#allocation39_spill] sm:$0xff] %v4334_v38  ;;  %v4459_v63 = vld [vmem:[%s7895_s7 + $0x74] sm:$0xf0]  ;;  %v4764_v38 = vld [vmem:[%s7895_s7 + $0x170] sm:$0xf0] }
  0x2b   :  { %7934 = vst [vmem:[#allocation40_spill] sm:$0xff] %v4339_v39  ;;  %v4779_v39 = vld [vmem:[%s7895_s7 + $0x174] sm:$0xf0]  ;;  %v4784_v36 = vld [vmem:[%s7895_s7 + $0x180] sm:$0xf0] }
  0x2c   :  { %7935 = vst [vmem:[#allocation41_spill] sm:$0xff] %v4344_v40  ;;  %v4644_v40 = vld [vmem:[%s7895_s7 + $0x114] sm:$0xf]  ;;  %v4899_v37 = vld [vmem:[%s7895_s7 + $0x1d8] sm:$0xf] }
  0x2d   :  { %7936 = vst [vmem:[#allocation42_spill] sm:$0xff] %v4349_v41  ;;  %v4659_v41 = vld [vmem:[%s7895_s7 + $0x118] sm:$0xf]  ;;  %v5184_v34 = vld [vmem:[%s7895_s7 + $0x2c4] sm:$0xf] }
  0x2e   :  { %7937 = vst [vmem:[#allocation43_spill] sm:$0xff] %v4354_v42  ;;  %v4624_v42 = vld [vmem:[%s7895_s7 + $0x104] sm:$0xf]  ;;  %v5319_v35 = vld [vmem:[%s7895_s7 + $0x324] sm:$0xf0] }
  0x2f   :  { %7938 = vst [vmem:[#allocation44_spill] sm:$0xff] %v4359_v43  ;;  %v4639_v43 = vld [vmem:[%s7895_s7 + $0x108] sm:$0xf]  ;;  %v5324_v32 = vld [vmem:[%s7895_s7 + $0x330] sm:$0xf0] }
  0x30   :  { %7939 = vst [vmem:[#allocation45_spill] sm:$0xff] %v4364_v44  ;;  %v4534_v44 = vld [vmem:[%s7895_s7 + $0xb8] sm:$0xf0]  ;;  %v5459_v33 = vld [vmem:[%s7895_s7 + $0x398] sm:$0xf] }
  0x31   :  { %7940 = vst [vmem:[#allocation46_spill] sm:$0xff] %v4369_v45  ;;  %v4619_v45 = vld [vmem:[%s7895_s7 + $0xf8] sm:$0xf] }
  0x32   :  { %7941 = vst [vmem:[#allocation47_spill] sm:$0xff] %v4374_v46  ;;  %v4524_v46 = vld [vmem:[%s7895_s7 + $0xb0] sm:$0xf0] }
  0x33   :  { %7942 = vst [vmem:[#allocation48_spill] sm:$0xff] %v4379_v47  ;;  %v4529_v47 = vld [vmem:[%s7895_s7 + $0xac] sm:$0xf0] }
  0x34   :  { %7943 = vst [vmem:[#allocation49_spill] sm:$0xff] %v4384_v48  ;;  %v4514_v48 = vld [vmem:[%s7895_s7 + $0xa8] sm:$0xf0] }
  0x35   :  { %7944 = vst [vmem:[#allocation50_spill] sm:$0xff] %v4389_v49  ;;  %v4519_v49 = vld [vmem:[%s7895_s7 + $0xa4] sm:$0xf0] }
  0x36   :  { %7945 = vst [vmem:[#allocation51_spill] sm:$0xff] %v4394_v50  ;;  %v4504_v50 = vld [vmem:[%s7895_s7 + $0xa0] sm:$0xf0] }
  0x37   :  { %7946 = vst [vmem:[#allocation52_spill] sm:$0xff] %v4399_v51  ;;  %v4509_v51 = vld [vmem:[%s7895_s7 + $0x9c] sm:$0xf0] }
  0x38   :  { %7947 = vst [vmem:[#allocation53_spill] sm:$0xff] %v4404_v52  ;;  %v4494_v52 = vld [vmem:[%s7895_s7 + $0x98] sm:$0xf0] }
  0x39   :  { %7948 = vst [vmem:[#allocation54_spill] sm:$0xff] %v4409_v53  ;;  %v4499_v53 = vld [vmem:[%s7895_s7 + $0x94] sm:$0xf0] }
  0x3a   :  { %7949 = vst [vmem:[#allocation55_spill] sm:$0xff] %v4414_v54  ;;  %v4484_v54 = vld [vmem:[%s7895_s7 + $0x90] sm:$0xf0] }
  0x3b   :  { %7950 = vst [vmem:[#allocation56_spill] sm:$0xff] %v4419_v55  ;;  %v4489_v55 = vld [vmem:[%s7895_s7 + $0x8c] sm:$0xf0] }
  0x3c   :  { %7951 = vst [vmem:[#allocation57_spill] sm:$0xff] %v4424_v56  ;;  %v4474_v56 = vld [vmem:[%s7895_s7 + $0x88] sm:$0xf0] }
  0x3d   :  { %7952 = vst [vmem:[#allocation58_spill] sm:$0xff] %v4429_v57  ;;  %v4479_v57 = vld [vmem:[%s7895_s7 + $0x84] sm:$0xf0] }
  0x3e   :  { %7953 = vst [vmem:[#allocation59_spill] sm:$0xff] %v4434_v58  ;;  %v4464_v58 = vld [vmem:[%s7895_s7 + $0x80] sm:$0xf0] }
  0x3f   :  { %7954 = vst [vmem:[#allocation60_spill] sm:$0xff] %v4439_v59  ;;  %v4469_v59 = vld [vmem:[%s7895_s7 + $0x7c] sm:$0xf0] }
  0x40   :  { %7955 = vst [vmem:[#allocation61_spill] sm:$0xff] %v4444_v60  ;;  %v5449_v60 = vld [vmem:[%s7895_s7 + $0x390] sm:$0xf] }
  0x41   :  { %7956 = vst [vmem:[#allocation62_spill] sm:$0xff] %v4449_v61  ;;  %v5454_v61 = vld [vmem:[%s7895_s7 + $0x39c] sm:$0xf] }
  0x42   :  { %7957 = vst [vmem:[#allocation63_spill] sm:$0xff] %v4454_v62  ;;  %v5309_v62 = vld [vmem:[%s7895_s7 + $0x31c] sm:$0xf0] }
  0x43   :  { %7958 = vst [vmem:[#allocation64_spill] sm:$0xff] %v4459_v63  ;;  %v5314_v63 = vld [vmem:[%s7895_s7 + $0x328] sm:$0xf0] }
  0x44   :  { %7959 = vst [vmem:[#allocation65_spill] sm:$0xff] %v4464_v58  ;;  %v4889_v58 = vld [vmem:[%s7895_s7 + $0x1d0] sm:$0xf] }
  0x45   :  { %7960 = vst [vmem:[#allocation66_spill] sm:$0xff] %v4469_v59  ;;  %v4894_v59 = vld [vmem:[%s7895_s7 + $0x1dc] sm:$0xf] }
  0x46   :  { %7961 = vst [vmem:[#allocation67_spill] sm:$0xff] %v4474_v56  ;;  %v4769_v56 = vld [vmem:[%s7895_s7 + $0x16c] sm:$0xf0] }
  0x47   :  { %7962 = vst [vmem:[#allocation68_spill] sm:$0xff] %v4479_v57  ;;  %v4774_v57 = vld [vmem:[%s7895_s7 + $0x178] sm:$0xf0] }
  0x48   :  { %7963 = vst [vmem:[#allocation69_spill] sm:$0xff] %v4484_v54  ;;  %v4649_v54 = vld [vmem:[%s7895_s7 + $0x110] sm:$0xf] }
  0x49   :  { %7964 = vst [vmem:[#allocation70_spill] sm:$0xff] %v4489_v55  ;;  %v4654_v55 = vld [vmem:[%s7895_s7 + $0x11c] sm:$0xf] }
  0x4a   :  { %7965 = vst [vmem:[#allocation71_spill] sm:$0xff] %v4494_v52  ;;  %v4629_v52 = vld [vmem:[%s7895_s7 + $0x100] sm:$0xf] }
  0x4b   :  { %7966 = vst [vmem:[#allocation72_spill] sm:$0xff] %v4499_v53  ;;  %v4634_v53 = vld [vmem:[%s7895_s7 + $0x10c] sm:$0xf] }
  0x4c   :  { %7967 = vst [vmem:[#allocation73_spill] sm:$0xff] %v4504_v50  ;;  %v4609_v50 = vld [vmem:[%s7895_s7 + $0xf0] sm:$0xf] }
  0x4d   :  { %7968 = vst [vmem:[#allocation74_spill] sm:$0xff] %v4509_v51  ;;  %v4614_v51 = vld [vmem:[%s7895_s7 + $0xfc] sm:$0xf] }
  0x4e   :  { %7969 = vst [vmem:[#allocation75_spill] sm:$0xff] %v4514_v48  ;;  %v4539_v48 = vld [vmem:[%s7895_s7 + $0xb4] sm:$0xf0] }
  0x4f   :  { %7970 = vst [vmem:[#allocation76_spill] sm:$0xff] %v4519_v49  ;;  %v4544_v49 = vld [vmem:[%s7895_s7 + $0xc0] sm:$0xf0] }
  0x50   :  { %7971 = vst [vmem:[#allocation77_spill] sm:$0xff] %v4524_v46  ;;  %v4549_v46 = vld [vmem:[%s7895_s7 + $0xbc] sm:$0xf0] }
  0x51   :  { %7972 = vst [vmem:[#allocation78_spill] sm:$0xff] %v4529_v47  ;;  %v4554_v47 = vld [vmem:[%s7895_s7 + $0xc8] sm:$0xf0] }
  0x52   :  { %7973 = vst [vmem:[#allocation79_spill] sm:$0xff] %v4534_v44  ;;  %v4559_v44 = vld [vmem:[%s7895_s7 + $0xc4] sm:$0xf0] }
  0x53   :  { %7974 = vst [vmem:[#allocation80_spill] sm:$0xff] %v4539_v48  ;;  %v4564_v48 = vld [vmem:[%s7895_s7 + $0xd0] sm:$0xf0] }
  0x54   :  { %7975 = vst [vmem:[#allocation81_spill] sm:$0xff] %v4544_v49  ;;  %v4569_v49 = vld [vmem:[%s7895_s7 + $0xcc] sm:$0xf0] }
  0x55   :  { %7976 = vst [vmem:[#allocation82_spill] sm:$0xff] %v4549_v46  ;;  %v4574_v46 = vld [vmem:[%s7895_s7 + $0xd8] sm:$0xf0] }
  0x56   :  { %7977 = vst [vmem:[#allocation83_spill] sm:$0xff] %v4554_v47  ;;  %v4579_v47 = vld [vmem:[%s7895_s7 + $0xd4] sm:$0xf0] }
  0x57   :  { %7978 = vst [vmem:[#allocation84_spill] sm:$0xff] %v4559_v44  ;;  %v4584_v44 = vld [vmem:[%s7895_s7 + $0xe4] sm:$0xf] }
  0x58   :  { %7979 = vst [vmem:[#allocation85_spill] sm:$0xff] %v4564_v48  ;;  %v4589_v48 = vld [vmem:[%s7895_s7 + $0xe0] sm:$0xf] }
  0x59   :  { %7980 = vst [vmem:[#allocation86_spill] sm:$0xff] %v4569_v49  ;;  %v4594_v49 = vld [vmem:[%s7895_s7 + $0xec] sm:$0xf] }
  0x5a   :  { %7981 = vst [vmem:[#allocation87_spill] sm:$0xff] %v4574_v46  ;;  %v4599_v46 = vld [vmem:[%s7895_s7 + $0xe8] sm:$0xf] }
  0x5b   :  { %7982 = vst [vmem:[#allocation88_spill] sm:$0xff] %v4579_v47  ;;  %v4604_v47 = vld [vmem:[%s7895_s7 + $0xf4] sm:$0xf] }
  0x5c   :  { %7983 = vst [vmem:[#allocation89_spill] sm:$0xff] %v4584_v44  ;;  %v5604_v44 = vld [vmem:[%s7895_s7 + $0x410] sm:$0xf0] }
  0x5d   :  { %7984 = vst [vmem:[#allocation90_spill] sm:$0xff] %v4589_v48  ;;  %v5739_v48 = vld [vmem:[%s7895_s7 + $0x478] sm:$0xf] }
  0x5e   :  { %7985 = vst [vmem:[#allocation91_spill] sm:$0xff] %v4594_v49  ;;  %v5464_v49 = vld [vmem:[%s7895_s7 + $0x3a4] sm:$0xf] }
  0x5f   :  { %7986 = vst [vmem:[#allocation92_spill] sm:$0xff] %v4599_v46  ;;  %v5599_v46 = vld [vmem:[%s7895_s7 + $0x404] sm:$0xf0] }
  0x60   :  { %7987 = vst [vmem:[#allocation93_spill] sm:$0xff] %v4604_v47  ;;  %v4924_v47 = vld [vmem:[%s7895_s7 + $0x1f4] sm:$0xf] }
  0x61   :  { %7988 = vst [vmem:[#allocation94_spill] sm:$0xff] %v4609_v50  ;;  %v5039_v50 = vld [vmem:[%s7895_s7 + $0x244] sm:$0xf0] }
  0x62   :  { %7989 = vst [vmem:[#allocation95_spill] sm:$0xff] %v4614_v51  ;;  %v4904_v51 = vld [vmem:[%s7895_s7 + $0x1e4] sm:$0xf] }
  0x63   :  { %7990 = vst [vmem:[#allocation96_spill] sm:$0xff] %v4619_v45  ;;  %v4919_v45 = vld [vmem:[%s7895_s7 + $0x1e8] sm:$0xf] }
  0x64   :  { %7991 = vst [vmem:[#allocation97_spill] sm:$0xff] %v4624_v42  ;;  %v4754_v42 = vld [vmem:[%s7895_s7 + $0x168] sm:$0xf0] }
  0x65   :  { %7992 = vst [vmem:[#allocation98_spill] sm:$0xff] %v4629_v52  ;;  %v4759_v52 = vld [vmem:[%s7895_s7 + $0x164] sm:$0xf0] }
  0x66   :  { %7993 = vst [vmem:[#allocation99_spill] sm:$0xff] %v4634_v53  ;;  %v4664_v53 = vld [vmem:[%s7895_s7 + $0x124] sm:$0xf] }
  0x67   :  { %7994 = vst [vmem:[#allocation100_spill] sm:$0xff] %v4639_v43  ;;  %v4749_v43 = vld [vmem:[%s7895_s7 + $0x15c] sm:$0xf0] }
  0x68   :  { %7995 = vst [vmem:[#allocation101_spill] sm:$0xff] %v4644_v40  ;;  %v4669_v40 = vld [vmem:[%s7895_s7 + $0x120] sm:$0xf] }
  0x69   :  { %7996 = vst [vmem:[#allocation102_spill] sm:$0xff] %v4649_v54  ;;  %v4674_v54 = vld [vmem:[%s7895_s7 + $0x12c] sm:$0xf] }
  0x6a   :  { %7997 = vst [vmem:[#allocation103_spill] sm:$0xff] %v4654_v55  ;;  %v4679_v55 = vld [vmem:[%s7895_s7 + $0x128] sm:$0xf] }
  0x6b   :  { %7998 = vst [vmem:[#allocation104_spill] sm:$0xff] %v4659_v41  ;;  %v4684_v41 = vld [vmem:[%s7895_s7 + $0x134] sm:$0xf] }
  0x6c   :  { %7999 = vst [vmem:[#allocation105_spill] sm:$0xff] %v4664_v53  ;;  %v4689_v53 = vld [vmem:[%s7895_s7 + $0x130] sm:$0xf] }
  0x6d   :  { %8000 = vst [vmem:[#allocation106_spill] sm:$0xff] %v4669_v40  ;;  %v4694_v40 = vld [vmem:[%s7895_s7 + $0x13c] sm:$0xf] }
  0x6e   :  { %8001 = vst [vmem:[#allocation107_spill] sm:$0xff] %v4674_v54  ;;  %v4699_v54 = vld [vmem:[%s7895_s7 + $0x138] sm:$0xf] }
  0x6f   :  { %8002 = vst [vmem:[#allocation108_spill] sm:$0xff] %v4679_v55  ;;  %v4704_v55 = vld [vmem:[%s7895_s7 + $0x144] sm:$0xf] }
  0x70   :  { %8003 = vst [vmem:[#allocation109_spill] sm:$0xff] %v4684_v41  ;;  %v4709_v41 = vld [vmem:[%s7895_s7 + $0x140] sm:$0xf] }
  0x71   :  { %8004 = vst [vmem:[#allocation110_spill] sm:$0xff] %v4689_v53  ;;  %v4714_v53 = vld [vmem:[%s7895_s7 + $0x14c] sm:$0xf] }
  0x72   :  { %8005 = vst [vmem:[#allocation111_spill] sm:$0xff] %v4694_v40  ;;  %v4719_v40 = vld [vmem:[%s7895_s7 + $0x148] sm:$0xf] }
  0x73   :  { %8006 = vst [vmem:[#allocation112_spill] sm:$0xff] %v4699_v54  ;;  %v4724_v54 = vld [vmem:[%s7895_s7 + $0x150] sm:$0xf0] }
  0x74   :  { %8007 = vst [vmem:[#allocation113_spill] sm:$0xff] %v4704_v55  ;;  %v4729_v55 = vld [vmem:[%s7895_s7 + $0x14c] sm:$0xf0] }
  0x75   :  { %8008 = vst [vmem:[#allocation114_spill] sm:$0xff] %v4709_v41  ;;  %v4734_v41 = vld [vmem:[%s7895_s7 + $0x158] sm:$0xf0] }
  0x76   :  { %8009 = vst [vmem:[#allocation115_spill] sm:$0xff] %v4714_v53  ;;  %v4739_v53 = vld [vmem:[%s7895_s7 + $0x154] sm:$0xf0] }
  0x77   :  { %8010 = vst [vmem:[#allocation116_spill] sm:$0xff] %v4719_v40  ;;  %v4744_v40 = vld [vmem:[%s7895_s7 + $0x160] sm:$0xf0] }
  0x78   :  { %8011 = vst [vmem:[#allocation117_spill] sm:$0xff] %v4724_v54  ;;  %v5729_v54 = vld [vmem:[%s7895_s7 + $0x470] sm:$0xf] }
  0x79   :  { %8012 = vst [vmem:[#allocation118_spill] sm:$0xff] %v4729_v55  ;;  %v5734_v55 = vld [vmem:[%s7895_s7 + $0x47c] sm:$0xf] }
  0x7a   :  { %8013 = vst [vmem:[#allocation119_spill] sm:$0xff] %v4734_v41  ;;  %v5589_v41 = vld [vmem:[%s7895_s7 + $0x3fc] sm:$0xf0] }
  0x7b   :  { %8014 = vst [vmem:[#allocation120_spill] sm:$0xff] %v4739_v53  ;;  %v5594_v53 = vld [vmem:[%s7895_s7 + $0x408] sm:$0xf0] }
  0x7c   :  { %8015 = vst [vmem:[#allocation121_spill] sm:$0xff] %v4744_v40  ;;  %v5029_v40 = vld [vmem:[%s7895_s7 + $0x23c] sm:$0xf0] }
  0x7d   :  { %8016 = vst [vmem:[#allocation122_spill] sm:$0xff] %v4749_v43  ;;  %v5034_v43 = vld [vmem:[%s7895_s7 + $0x248] sm:$0xf0] }
  0x7e   :  { %8017 = vst [vmem:[#allocation123_spill] sm:$0xff] %v4754_v42  ;;  %v4909_v42 = vld [vmem:[%s7895_s7 + $0x1e0] sm:$0xf] }
  0x7f   :  { %8018 = vst [vmem:[#allocation124_spill] sm:$0xff] %v4759_v52  ;;  %v4914_v52 = vld [vmem:[%s7895_s7 + $0x1ec] sm:$0xf] }
  0x80   :  { %8019 = vst [vmem:[#allocation125_spill] sm:$0xff] %v4764_v38  ;;  %v4789_v38 = vld [vmem:[%s7895_s7 + $0x17c] sm:$0xf0] }
  0x81   :  { %8020 = vst [vmem:[#allocation126_spill] sm:$0xff] %v4769_v56  ;;  %v4794_v56 = vld [vmem:[%s7895_s7 + $0x188] sm:$0xf0] }
  0x82   :  { %8021 = vst [vmem:[#allocation127_spill] sm:$0xff] %v4774_v57  ;;  %v4799_v57 = vld [vmem:[%s7895_s7 + $0x184] sm:$0xf0] }
  0x83   :  { %8022 = vst [vmem:[#allocation128_spill] sm:$0xff] %v4779_v39  ;;  %v4804_v39 = vld [vmem:[%s7895_s7 + $0x190] sm:$0xf0] }
  0x84   :  { %8023 = vst [vmem:[#allocation129_spill] sm:$0xff] %v4784_v36  ;;  %v4809_v36 = vld [vmem:[%s7895_s7 + $0x18c] sm:$0xf0] }
  0x85   :  { %8024 = vst [vmem:[#allocation130_spill] sm:$0xff] %v4789_v38  ;;  %v4814_v38 = vld [vmem:[%s7895_s7 + $0x198] sm:$0xf0] }
  0x86   :  { %8025 = vst [vmem:[#allocation131_spill] sm:$0xff] %v4794_v56  ;;  %v4819_v56 = vld [vmem:[%s7895_s7 + $0x194] sm:$0xf0] }
  0x87   :  { %8026 = vst [vmem:[#allocation132_spill] sm:$0xff] %v4799_v57  ;;  %v4824_v57 = vld [vmem:[%s7895_s7 + $0x1a0] sm:$0xf0] }
  0x88   :  { %8027 = vst [vmem:[#allocation133_spill] sm:$0xff] %v4804_v39  ;;  %v4829_v39 = vld [vmem:[%s7895_s7 + $0x19c] sm:$0xf0] }
  0x89   :  { %8028 = vst [vmem:[#allocation134_spill] sm:$0xff] %v4809_v36  ;;  %v4834_v36 = vld [vmem:[%s7895_s7 + $0x1a8] sm:$0xf0] }
  0x8a   :  { %8029 = vst [vmem:[#allocation135_spill] sm:$0xff] %v4814_v38  ;;  %v4839_v38 = vld [vmem:[%s7895_s7 + $0x1a4] sm:$0xf0] }
  0x8b   :  { %8030 = vst [vmem:[#allocation136_spill] sm:$0xff] %v4819_v56  ;;  %v4844_v56 = vld [vmem:[%s7895_s7 + $0x1b0] sm:$0xf0] }
  0x8c   :  { %8031 = vst [vmem:[#allocation137_spill] sm:$0xff] %v4824_v57  ;;  %v4849_v57 = vld [vmem:[%s7895_s7 + $0x1ac] sm:$0xf0] }
  0x8d   :  { %8032 = vst [vmem:[#allocation138_spill] sm:$0xff] %v4829_v39  ;;  %v4854_v39 = vld [vmem:[%s7895_s7 + $0x1b8] sm:$0xf0] }
  0x8e   :  { %8033 = vst [vmem:[#allocation139_spill] sm:$0xff] %v4834_v36  ;;  %v4859_v36 = vld [vmem:[%s7895_s7 + $0x1b4] sm:$0xf0] }
  0x8f   :  { %8034 = vst [vmem:[#allocation140_spill] sm:$0xff] %v4839_v38  ;;  %v4864_v38 = vld [vmem:[%s7895_s7 + $0x1c4] sm:$0xf] }
  0x90   :  { %8035 = vst [vmem:[#allocation141_spill] sm:$0xff] %v4844_v56  ;;  %v4869_v56 = vld [vmem:[%s7895_s7 + $0x1c0] sm:$0xf] }
  0x91   :  { %8036 = vst [vmem:[#allocation142_spill] sm:$0xff] %v4849_v57  ;;  %v4874_v57 = vld [vmem:[%s7895_s7 + $0x1cc] sm:$0xf] }
  0x92   :  { %8037 = vst [vmem:[#allocation143_spill] sm:$0xff] %v4854_v39  ;;  %v4879_v39 = vld [vmem:[%s7895_s7 + $0x1c8] sm:$0xf] }
  0x93   :  { %8038 = vst [vmem:[#allocation144_spill] sm:$0xff] %v4859_v36  ;;  %v4884_v36 = vld [vmem:[%s7895_s7 + $0x1d4] sm:$0xf] }
  0x94   :  { %8039 = vst [vmem:[#allocation145_spill] sm:$0xff] %v4864_v38  ;;  %v5884_v38 = vld [vmem:[%s7895_s7 + $0x4f0] sm:$0xf0] }
  0x95   :  { %8040 = vst [vmem:[#allocation146_spill] sm:$0xff] %v4869_v56  ;;  %v6019_v56 = vld [vmem:[%s7895_s7 + $0x558] sm:$0xf] }
  0x96   :  { %8041 = vst [vmem:[#allocation147_spill] sm:$0xff] %v4874_v57  ;;  %v5744_v57 = vld [vmem:[%s7895_s7 + $0x484] sm:$0xf] }
  0x97   :  { %8042 = vst [vmem:[#allocation148_spill] sm:$0xff] %v4879_v39  ;;  %v5879_v39 = vld [vmem:[%s7895_s7 + $0x4e4] sm:$0xf0] }
  0x98   :  { %8043 = vst [vmem:[#allocation149_spill] sm:$0xff] %v4884_v36  ;;  %v5054_v36 = vld [vmem:[%s7895_s7 + $0x258] sm:$0xf0] }
  0x99   :  { %8044 = vst [vmem:[#allocation150_spill] sm:$0xff] %v4889_v58  ;;  %v5179_v58 = vld [vmem:[%s7895_s7 + $0x2b8] sm:$0xf] }
  0x9a   :  { %8045 = vst [vmem:[#allocation151_spill] sm:$0xff] %v4894_v59  ;;  %v5044_v59 = vld [vmem:[%s7895_s7 + $0x250] sm:$0xf0] }
  0x9b   :  { %8046 = vst [vmem:[#allocation152_spill] sm:$0xff] %v4899_v37  ;;  %v5049_v37 = vld [vmem:[%s7895_s7 + $0x24c] sm:$0xf0] }
  0x9c   :  { %8047 = vst [vmem:[#allocation153_spill] sm:$0xff] %v4904_v51  ;;  %v4929_v51 = vld [vmem:[%s7895_s7 + $0x1f0] sm:$0xf] }
  0x9d   :  { %8048 = vst [vmem:[#allocation154_spill] sm:$0xff] %v4909_v42  ;;  %v4934_v42 = vld [vmem:[%s7895_s7 + $0x1fc] sm:$0xf] }
  0x9e   :  { %8049 = vst [vmem:[#allocation155_spill] sm:$0xff] %v4914_v52  ;;  %v4939_v52 = vld [vmem:[%s7895_s7 + $0x1f8] sm:$0xf] }
  0x9f   :  { %8050 = vst [vmem:[#allocation156_spill] sm:$0xff] %v4919_v45  ;;  %v4944_v45 = vld [vmem:[%s7895_s7 + $0x204] sm:$0xf] }
  0xa0   :  { %8051 = vst [vmem:[#allocation157_spill] sm:$0xff] %v4924_v47  ;;  %v4949_v47 = vld [vmem:[%s7895_s7 + $0x200] sm:$0xf] }
  0xa1   :  { %8052 = vst [vmem:[#allocation158_spill] sm:$0xff] %v4929_v51  ;;  %v4954_v51 = vld [vmem:[%s7895_s7 + $0x20c] sm:$0xf] }
  0xa2   :  { %8053 = vst [vmem:[#allocation159_spill] sm:$0xff] %v4934_v42  ;;  %v4959_v42 = vld [vmem:[%s7895_s7 + $0x208] sm:$0xf] }
  0xa3   :  { %8054 = vst [vmem:[#allocation160_spill] sm:$0xff] %v4939_v52  ;;  %v4964_v52 = vld [vmem:[%s7895_s7 + $0x214] sm:$0xf] }
  0xa4   :  { %8055 = vst [vmem:[#allocation161_spill] sm:$0xff] %v4944_v45  ;;  %v4969_v45 = vld [vmem:[%s7895_s7 + $0x210] sm:$0xf] }
  0xa5   :  { %8056 = vst [vmem:[#allocation162_spill] sm:$0xff] %v4949_v47  ;;  %v4974_v47 = vld [vmem:[%s7895_s7 + $0x21c] sm:$0xf] }
  0xa6   :  { %8057 = vst [vmem:[#allocation163_spill] sm:$0xff] %v4954_v51  ;;  %v4979_v51 = vld [vmem:[%s7895_s7 + $0x218] sm:$0xf] }
  0xa7   :  { %8058 = vst [vmem:[#allocation164_spill] sm:$0xff] %v4959_v42  ;;  %v4984_v42 = vld [vmem:[%s7895_s7 + $0x224] sm:$0xf] }
  0xa8   :  { %8059 = vst [vmem:[#allocation165_spill] sm:$0xff] %v4964_v52  ;;  %v4989_v52 = vld [vmem:[%s7895_s7 + $0x220] sm:$0xf] }
  0xa9   :  { %8060 = vst [vmem:[#allocation166_spill] sm:$0xff] %v4969_v45  ;;  %v4994_v45 = vld [vmem:[%s7895_s7 + $0x22c] sm:$0xf] }
  0xaa   :  { %8061 = vst [vmem:[#allocation167_spill] sm:$0xff] %v4974_v47  ;;  %v4999_v47 = vld [vmem:[%s7895_s7 + $0x228] sm:$0xf] }
  0xab   :  { %8062 = vst [vmem:[#allocation168_spill] sm:$0xff] %v4979_v51  ;;  %v5004_v51 = vld [vmem:[%s7895_s7 + $0x230] sm:$0xf0] }
  0xac   :  { %8063 = vst [vmem:[#allocation169_spill] sm:$0xff] %v4984_v42  ;;  %v5009_v42 = vld [vmem:[%s7895_s7 + $0x22c] sm:$0xf0] }
  0xad   :  { %8064 = vst [vmem:[#allocation170_spill] sm:$0xff] %v4989_v52  ;;  %v5014_v52 = vld [vmem:[%s7895_s7 + $0x238] sm:$0xf0] }
  0xae   :  { %8065 = vst [vmem:[#allocation171_spill] sm:$0xff] %v4994_v45  ;;  %v5019_v45 = vld [vmem:[%s7895_s7 + $0x234] sm:$0xf0] }
  0xaf   :  { %8066 = vst [vmem:[#allocation172_spill] sm:$0xff] %v4999_v47  ;;  %v5024_v47 = vld [vmem:[%s7895_s7 + $0x240] sm:$0xf0] }
  0xb0   :  { %8067 = vst [vmem:[#allocation173_spill] sm:$0xff] %v5004_v51  ;;  %v6009_v51 = vld [vmem:[%s7895_s7 + $0x550] sm:$0xf] }
  0xb1   :  { %8068 = vst [vmem:[#allocation174_spill] sm:$0xff] %v5009_v42  ;;  %v6014_v42 = vld [vmem:[%s7895_s7 + $0x55c] sm:$0xf] }
  0xb2   :  { %8069 = vst [vmem:[#allocation175_spill] sm:$0xff] %v5014_v52  ;;  %v5869_v52 = vld [vmem:[%s7895_s7 + $0x4dc] sm:$0xf0] }
  0xb3   :  { %8070 = vst [vmem:[#allocation176_spill] sm:$0xff] %v5019_v45  ;;  %v5874_v45 = vld [vmem:[%s7895_s7 + $0x4e8] sm:$0xf0] }
  0xb4   :  { %8071 = vst [vmem:[#allocation177_spill] sm:$0xff] %v5024_v47  ;;  %v5169_v47 = vld [vmem:[%s7895_s7 + $0x2b0] sm:$0xf] }
  0xb5   :  { %8072 = vst [vmem:[#allocation178_spill] sm:$0xff] %v5029_v40  ;;  %v5174_v40 = vld [vmem:[%s7895_s7 + $0x2bc] sm:$0xf] }
  0xb6   :  { %8073 = vst [vmem:[#allocation179_spill] sm:$0xff] %v5034_v43  ;;  %v5059_v43 = vld [vmem:[%s7895_s7 + $0x254] sm:$0xf0] }
  0xb7   :  { %8074 = vst [vmem:[#allocation180_spill] sm:$0xff] %v5039_v50  ;;  %v5064_v50 = vld [vmem:[%s7895_s7 + $0x260] sm:$0xf0] }
  0xb8   :  { %8075 = vst [vmem:[#allocation181_spill] sm:$0xff] %v5044_v59  ;;  %v5069_v59 = vld [vmem:[%s7895_s7 + $0x25c] sm:$0xf0] }
  0xb9   :  { %8076 = vst [vmem:[#allocation182_spill] sm:$0xff] %v5049_v37  ;;  %v5074_v37 = vld [vmem:[%s7895_s7 + $0x268] sm:$0xf0] }
  0xba   :  { %8077 = vst [vmem:[#allocation183_spill] sm:$0xff] %v5054_v36  ;;  %v5079_v36 = vld [vmem:[%s7895_s7 + $0x264] sm:$0xf0] }
  0xbb   :  { %8078 = vst [vmem:[#allocation184_spill] sm:$0xff] %v5059_v43  ;;  %v5084_v43 = vld [vmem:[%s7895_s7 + $0x270] sm:$0xf0] }
  0xbc   :  { %8079 = vst [vmem:[#allocation185_spill] sm:$0xff] %v5064_v50  ;;  %v5089_v50 = vld [vmem:[%s7895_s7 + $0x26c] sm:$0xf0] }
  0xbd   :  { %8080 = vst [vmem:[#allocation186_spill] sm:$0xff] %v5069_v59  ;;  %v5094_v59 = vld [vmem:[%s7895_s7 + $0x278] sm:$0xf0] }
  0xbe   :  { %8081 = vst [vmem:[#allocation187_spill] sm:$0xff] %v5074_v37  ;;  %v5099_v37 = vld [vmem:[%s7895_s7 + $0x274] sm:$0xf0] }
  0xbf   :  { %8082 = vst [vmem:[#allocation188_spill] sm:$0xff] %v5079_v36  ;;  %v5104_v36 = vld [vmem:[%s7895_s7 + $0x280] sm:$0xf0] }
  0xc0   :  { %8083 = vst [vmem:[#allocation189_spill] sm:$0xff] %v5084_v43  ;;  %v5109_v43 = vld [vmem:[%s7895_s7 + $0x27c] sm:$0xf0] }
  0xc1   :  { %8084 = vst [vmem:[#allocation190_spill] sm:$0xff] %v5089_v50  ;;  %v5114_v50 = vld [vmem:[%s7895_s7 + $0x288] sm:$0xf0] }
  0xc2   :  { %8085 = vst [vmem:[#allocation191_spill] sm:$0xff] %v5094_v59  ;;  %v5119_v59 = vld [vmem:[%s7895_s7 + $0x284] sm:$0xf0] }
  0xc3   :  { %8086 = vst [vmem:[#allocation192_spill] sm:$0xff] %v5099_v37  ;;  %v5124_v37 = vld [vmem:[%s7895_s7 + $0x290] sm:$0xf0] }
  0xc4   :  { %8087 = vst [vmem:[#allocation193_spill] sm:$0xff] %v5104_v36  ;;  %v5129_v36 = vld [vmem:[%s7895_s7 + $0x28c] sm:$0xf0] }
  0xc5   :  { %8088 = vst [vmem:[#allocation194_spill] sm:$0xff] %v5109_v43  ;;  %v5134_v43 = vld [vmem:[%s7895_s7 + $0x298] sm:$0xf0] }
  0xc6   :  { %8089 = vst [vmem:[#allocation195_spill] sm:$0xff] %v5114_v50  ;;  %v5139_v50 = vld [vmem:[%s7895_s7 + $0x294] sm:$0xf0] }
  0xc7   :  { %8090 = vst [vmem:[#allocation196_spill] sm:$0xff] %v5119_v59  ;;  %v5144_v59 = vld [vmem:[%s7895_s7 + $0x2a4] sm:$0xf] }
  0xc8   :  { %8091 = vst [vmem:[#allocation197_spill] sm:$0xff] %v5124_v37  ;;  %v5149_v37 = vld [vmem:[%s7895_s7 + $0x2a0] sm:$0xf] }
  0xc9   :  { %8092 = vst [vmem:[#allocation198_spill] sm:$0xff] %v5129_v36  ;;  %v5154_v36 = vld [vmem:[%s7895_s7 + $0x2ac] sm:$0xf] }
  0xca   :  { %8093 = vst [vmem:[#allocation199_spill] sm:$0xff] %v5134_v43  ;;  %v5159_v43 = vld [vmem:[%s7895_s7 + $0x2a8] sm:$0xf] }
  0xcb   :  { %8094 = vst [vmem:[#allocation200_spill] sm:$0xff] %v5139_v50  ;;  %v5164_v50 = vld [vmem:[%s7895_s7 + $0x2b4] sm:$0xf] }
  0xcc   :  { %8095 = vst [vmem:[#allocation201_spill] sm:$0xff] %v5144_v59  ;;  %v6164_v59 = vld [vmem:[%s7895_s7 + $0x5d0] sm:$0xf0] }
  0xcd   :  { %8096 = vst [vmem:[#allocation202_spill] sm:$0xff] %v5149_v37  ;;  %v6299_v37 = vld [vmem:[%s7895_s7 + $0x638] sm:$0xf] }
  0xce   :  { %8097 = vst [vmem:[#allocation203_spill] sm:$0xff] %v5154_v36  ;;  %v6024_v36 = vld [vmem:[%s7895_s7 + $0x564] sm:$0xf] }
  0xcf   :  { %8098 = vst [vmem:[#allocation204_spill] sm:$0xff] %v5159_v43  ;;  %v6159_v43 = vld [vmem:[%s7895_s7 + $0x5c4] sm:$0xf0] }
  0xd0   :  { %8099 = vst [vmem:[#allocation205_spill] sm:$0xff] %v5164_v50  ;;  %v5189_v50 = vld [vmem:[%s7895_s7 + $0x2c0] sm:$0xf] }
  0xd1   :  { %8100 = vst [vmem:[#allocation206_spill] sm:$0xff] %v5169_v47  ;;  %v5194_v47 = vld [vmem:[%s7895_s7 + $0x2cc] sm:$0xf] }
  0xd2   :  { %8101 = vst [vmem:[#allocation207_spill] sm:$0xff] %v5174_v40  ;;  %v5199_v40 = vld [vmem:[%s7895_s7 + $0x2c8] sm:$0xf] }
  0xd3   :  { %8102 = vst [vmem:[#allocation208_spill] sm:$0xff] %v5179_v58  ;;  %v5204_v58 = vld [vmem:[%s7895_s7 + $0x2d4] sm:$0xf] }
  0xd4   :  { %8103 = vst [vmem:[#allocation209_spill] sm:$0xff] %v5184_v34  ;;  %v5209_v34 = vld [vmem:[%s7895_s7 + $0x2d0] sm:$0xf] }
  0xd5   :  { %8104 = vst [vmem:[#allocation210_spill] sm:$0xff] %v5189_v50  ;;  %v5214_v50 = vld [vmem:[%s7895_s7 + $0x2dc] sm:$0xf] }
  0xd6   :  { %8105 = vst [vmem:[#allocation211_spill] sm:$0xff] %v5194_v47  ;;  %v5219_v47 = vld [vmem:[%s7895_s7 + $0x2d8] sm:$0xf] }
  0xd7   :  { %8106 = vst [vmem:[#allocation212_spill] sm:$0xff] %v5199_v40  ;;  %v5224_v40 = vld [vmem:[%s7895_s7 + $0x2e4] sm:$0xf] }
  0xd8   :  { %8107 = vst [vmem:[#allocation213_spill] sm:$0xff] %v5204_v58  ;;  %v5229_v58 = vld [vmem:[%s7895_s7 + $0x2e0] sm:$0xf] }
  0xd9   :  { %8108 = vst [vmem:[#allocation214_spill] sm:$0xff] %v5209_v34  ;;  %v5234_v34 = vld [vmem:[%s7895_s7 + $0x2ec] sm:$0xf] }
  0xda   :  { %8109 = vst [vmem:[#allocation215_spill] sm:$0xff] %v5214_v50  ;;  %v5239_v50 = vld [vmem:[%s7895_s7 + $0x2e8] sm:$0xf] }
  0xdb   :  { %8110 = vst [vmem:[#allocation216_spill] sm:$0xff] %v5219_v47  ;;  %v5244_v47 = vld [vmem:[%s7895_s7 + $0x2f4] sm:$0xf] }
  0xdc   :  { %8111 = vst [vmem:[#allocation217_spill] sm:$0xff] %v5224_v40  ;;  %v5249_v40 = vld [vmem:[%s7895_s7 + $0x2f0] sm:$0xf] }
  0xdd   :  { %8112 = vst [vmem:[#allocation218_spill] sm:$0xff] %v5229_v58  ;;  %v5254_v58 = vld [vmem:[%s7895_s7 + $0x2fc] sm:$0xf] }
  0xde   :  { %8113 = vst [vmem:[#allocation219_spill] sm:$0xff] %v5234_v34  ;;  %v5259_v34 = vld [vmem:[%s7895_s7 + $0x2f8] sm:$0xf] }
  0xdf   :  { %8114 = vst [vmem:[#allocation220_spill] sm:$0xff] %v5239_v50  ;;  %v5264_v50 = vld [vmem:[%s7895_s7 + $0x304] sm:$0xf] }
  0xe0   :  { %8115 = vst [vmem:[#allocation221_spill] sm:$0xff] %v5244_v47  ;;  %v5269_v47 = vld [vmem:[%s7895_s7 + $0x300] sm:$0xf] }
  0xe1   :  { %8116 = vst [vmem:[#allocation222_spill] sm:$0xff] %v5249_v40  ;;  %v5274_v40 = vld [vmem:[%s7895_s7 + $0x30c] sm:$0xf] }
  0xe2   :  { %8117 = vst [vmem:[#allocation223_spill] sm:$0xff] %v5254_v58  ;;  %v5279_v58 = vld [vmem:[%s7895_s7 + $0x308] sm:$0xf] }
  0xe3   :  { %8118 = vst [vmem:[#allocation224_spill] sm:$0xff] %v5259_v34  ;;  %v5284_v34 = vld [vmem:[%s7895_s7 + $0x310] sm:$0xf0] }
  0xe4   :  { %8119 = vst [vmem:[#allocation225_spill] sm:$0xff] %v5264_v50  ;;  %v5289_v50 = vld [vmem:[%s7895_s7 + $0x30c] sm:$0xf0] }
  0xe5   :  { %8120 = vst [vmem:[#allocation226_spill] sm:$0xff] %v5269_v47  ;;  %v5294_v47 = vld [vmem:[%s7895_s7 + $0x318] sm:$0xf0] }
  0xe6   :  { %8121 = vst [vmem:[#allocation227_spill] sm:$0xff] %v5274_v40  ;;  %v5299_v40 = vld [vmem:[%s7895_s7 + $0x314] sm:$0xf0] }
  0xe7   :  { %8122 = vst [vmem:[#allocation228_spill] sm:$0xff] %v5279_v58  ;;  %v5304_v58 = vld [vmem:[%s7895_s7 + $0x320] sm:$0xf0] }
  0xe8   :  { %8123 = vst [vmem:[#allocation229_spill] sm:$0xff] %v5284_v34  ;;  %v6289_v34 = vld [vmem:[%s7895_s7 + $0x630] sm:$0xf] }
  0xe9   :  { %8124 = vst [vmem:[#allocation230_spill] sm:$0xff] %v5289_v50  ;;  %v6294_v50 = vld [vmem:[%s7895_s7 + $0x63c] sm:$0xf] }
  0xea   :  { %8125 = vst [vmem:[#allocation231_spill] sm:$0xff] %v5294_v47  ;;  %v6149_v47 = vld [vmem:[%s7895_s7 + $0x5bc] sm:$0xf0] }
  0xeb   :  { %8126 = vst [vmem:[#allocation232_spill] sm:$0xff] %v5299_v40  ;;  %v6154_v40 = vld [vmem:[%s7895_s7 + $0x5c8] sm:$0xf0] }
  0xec   :  { %8127 = vst [vmem:[#allocation233_spill] sm:$0xff] %v5304_v58  ;;  %v5329_v58 = vld [vmem:[%s7895_s7 + $0x32c] sm:$0xf0] }
  0xed   :  { %8128 = vst [vmem:[#allocation234_spill] sm:$0xff] %v5309_v62  ;;  %v5334_v62 = vld [vmem:[%s7895_s7 + $0x338] sm:$0xf0] }
  0xee   :  { %8129 = vst [vmem:[#allocation235_spill] sm:$0xff] %v5314_v63  ;;  %v5339_v63 = vld [vmem:[%s7895_s7 + $0x334] sm:$0xf0] }
  0xef   :  { %8130 = vst [vmem:[#allocation236_spill] sm:$0xff] %v5319_v35  ;;  %v5344_v35 = vld [vmem:[%s7895_s7 + $0x340] sm:$0xf0] }
  0xf0   :  { %8131 = vst [vmem:[#allocation237_spill] sm:$0xff] %v5324_v32  ;;  %v5349_v32 = vld [vmem:[%s7895_s7 + $0x33c] sm:$0xf0] }
  0xf1   :  { %8132 = vst [vmem:[#allocation238_spill] sm:$0xff] %v5329_v58  ;;  %v5354_v58 = vld [vmem:[%s7895_s7 + $0x348] sm:$0xf0] }
  0xf2   :  { %8133 = vst [vmem:[#allocation239_spill] sm:$0xff] %v5334_v62  ;;  %v5359_v62 = vld [vmem:[%s7895_s7 + $0x344] sm:$0xf0] }
  0xf3   :  { %8134 = vst [vmem:[#allocation240_spill] sm:$0xff] %v5339_v63  ;;  %v5364_v63 = vld [vmem:[%s7895_s7 + $0x350] sm:$0xf0] }
  0xf4   :  { %8135 = vst [vmem:[#allocation241_spill] sm:$0xff] %v5344_v35  ;;  %v5369_v35 = vld [vmem:[%s7895_s7 + $0x34c] sm:$0xf0] }
  0xf5   :  { %8136 = vst [vmem:[#allocation242_spill] sm:$0xff] %v5349_v32  ;;  %v5374_v32 = vld [vmem:[%s7895_s7 + $0x358] sm:$0xf0] }
  0xf6   :  { %8137 = vst [vmem:[#allocation243_spill] sm:$0xff] %v5354_v58  ;;  %v5379_v58 = vld [vmem:[%s7895_s7 + $0x354] sm:$0xf0] }
  0xf7   :  { %8138 = vst [vmem:[#allocation244_spill] sm:$0xff] %v5359_v62  ;;  %v5384_v62 = vld [vmem:[%s7895_s7 + $0x360] sm:$0xf0] }
  0xf8   :  { %8139 = vst [vmem:[#allocation245_spill] sm:$0xff] %v5364_v63  ;;  %v5389_v63 = vld [vmem:[%s7895_s7 + $0x35c] sm:$0xf0] }
  0xf9   :  { %8140 = vst [vmem:[#allocation246_spill] sm:$0xff] %v5369_v35  ;;  %v5394_v35 = vld [vmem:[%s7895_s7 + $0x368] sm:$0xf0] }
  0xfa   :  { %8141 = vst [vmem:[#allocation247_spill] sm:$0xff] %v5374_v32  ;;  %v5399_v32 = vld [vmem:[%s7895_s7 + $0x364] sm:$0xf0] }
  0xfb   :  { %8142 = vst [vmem:[#allocation248_spill] sm:$0xff] %v5379_v58  ;;  %v5404_v58 = vld [vmem:[%s7895_s7 + $0x370] sm:$0xf0] }
  0xfc   :  { %8143 = vst [vmem:[#allocation249_spill] sm:$0xff] %v5384_v62  ;;  %v5409_v62 = vld [vmem:[%s7895_s7 + $0x36c] sm:$0xf0] }
  0xfd   :  { %8144 = vst [vmem:[#allocation250_spill] sm:$0xff] %v5389_v63  ;;  %v5414_v63 = vld [vmem:[%s7895_s7 + $0x378] sm:$0xf0] }
  0xfe   :  { %8145 = vst [vmem:[#allocation251_spill] sm:$0xff] %v5394_v35  ;;  %v5419_v35 = vld [vmem:[%s7895_s7 + $0x374] sm:$0xf0] }
  0xff   :  { %8146 = vst [vmem:[#allocation252_spill] sm:$0xff] %v5399_v32  ;;  %v5424_v32 = vld [vmem:[%s7895_s7 + $0x384] sm:$0xf] }
 0x100   :  { %8147 = vst [vmem:[#allocation253_spill] sm:$0xff] %v5404_v58  ;;  %v5429_v58 = vld [vmem:[%s7895_s7 + $0x380] sm:$0xf] }
 0x101   :  { %8148 = vst [vmem:[#allocation254_spill] sm:$0xff] %v5409_v62  ;;  %v5434_v62 = vld [vmem:[%s7895_s7 + $0x38c] sm:$0xf] }
 0x102   :  { %8149 = vst [vmem:[#allocation255_spill] sm:$0xff] %v5414_v63  ;;  %v5439_v63 = vld [vmem:[%s7895_s7 + $0x388] sm:$0xf] }
 0x103   :  { %8150 = vst [vmem:[#allocation256_spill] sm:$0xff] %v5419_v35  ;;  %v5444_v35 = vld [vmem:[%s7895_s7 + $0x394] sm:$0xf] }
 0x104   :  { %8151 = vst [vmem:[#allocation257_spill] sm:$0xff] %v5424_v32  ;;  %v6444_v32 = vld [vmem:[%s7895_s7 + $0x6b0] sm:$0xf0] }
 0x105   :  { %8152 = vst [vmem:[#allocation258_spill] sm:$0xff] %v5434_v62  ;;  %v6304_v62 = vld [vmem:[%s7895_s7 + $0x644] sm:$0xf] }
 0x106   :  { %8153 = vst [vmem:[#allocation259_spill] sm:$0xff] %v5439_v63  ;;  %v6439_v63 = vld [vmem:[%s7895_s7 + $0x6a4] sm:$0xf0] }
 0x107   :  { %8154 = vst [vmem:[#allocation260_spill] sm:$0xff] %v5444_v35  ;;  %v5469_v35 = vld [vmem:[%s7895_s7 + $0x3a0] sm:$0xf] }
 0x108   :  { %8155 = vst [vmem:[#allocation261_spill] sm:$0xff] %v5449_v60  ;;  %v5474_v60 = vld [vmem:[%s7895_s7 + $0x3ac] sm:$0xf] }
 0x109   :  { %8156 = vst [vmem:[#allocation262_spill] sm:$0xff] %v5454_v61  ;;  %v5479_v61 = vld [vmem:[%s7895_s7 + $0x3a8] sm:$0xf] }
 0x10a   :  { %8157 = vst [vmem:[#allocation263_spill] sm:$0xff] %v5459_v33  ;;  %v5484_v33 = vld [vmem:[%s7895_s7 + $0x3b4] sm:$0xf] }
 0x10b   :  { %8158 = vst [vmem:[#allocation264_spill] sm:$0xff] %v5464_v49  ;;  %v5489_v49 = vld [vmem:[%s7895_s7 + $0x3b0] sm:$0xf] }
 0x10c   :  { %8159 = vst [vmem:[#allocation265_spill] sm:$0xff] %v5469_v35  ;;  %v5494_v35 = vld [vmem:[%s7895_s7 + $0x3bc] sm:$0xf] }
 0x10d   :  { %8160 = vst [vmem:[#allocation266_spill] sm:$0xff] %v5474_v60  ;;  %v5499_v60 = vld [vmem:[%s7895_s7 + $0x3b8] sm:$0xf] }
 0x10e   :  { %8161 = vst [vmem:[#allocation267_spill] sm:$0xff] %v5479_v61  ;;  %v5504_v61 = vld [vmem:[%s7895_s7 + $0x3c4] sm:$0xf] }
 0x10f   :  { %8162 = vst [vmem:[#allocation268_spill] sm:$0xff] %v5484_v33  ;;  %v5509_v33 = vld [vmem:[%s7895_s7 + $0x3c0] sm:$0xf] }
 0x110   :  { %8163 = vst [vmem:[#allocation269_spill] sm:$0xff] %v5489_v49  ;;  %v5514_v49 = vld [vmem:[%s7895_s7 + $0x3cc] sm:$0xf] }
 0x111   :  { %8164 = vst [vmem:[#allocation270_spill] sm:$0xff] %v5494_v35  ;;  %v5519_v35 = vld [vmem:[%s7895_s7 + $0x3c8] sm:$0xf] }
 0x112   :  { %8165 = vst [vmem:[#allocation271_spill] sm:$0xff] %v5499_v60  ;;  %v5524_v60 = vld [vmem:[%s7895_s7 + $0x3d4] sm:$0xf] }
 0x113   :  { %8166 = vst [vmem:[#allocation272_spill] sm:$0xff] %v5504_v61  ;;  %v5529_v61 = vld [vmem:[%s7895_s7 + $0x3d0] sm:$0xf] }
 0x114   :  { %8167 = vst [vmem:[#allocation273_spill] sm:$0xff] %v5509_v33  ;;  %v5534_v33 = vld [vmem:[%s7895_s7 + $0x3dc] sm:$0xf] }
 0x115   :  { %8168 = vst [vmem:[#allocation274_spill] sm:$0xff] %v5514_v49  ;;  %v5539_v49 = vld [vmem:[%s7895_s7 + $0x3d8] sm:$0xf] }
 0x116   :  { %8169 = vst [vmem:[#allocation275_spill] sm:$0xff] %v5519_v35  ;;  %v5544_v35 = vld [vmem:[%s7895_s7 + $0x3e4] sm:$0xf] }
 0x117   :  { %8170 = vst [vmem:[#allocation276_spill] sm:$0xff] %v5524_v60  ;;  %v5549_v60 = vld [vmem:[%s7895_s7 + $0x3e0] sm:$0xf] }
 0x118   :  { %8171 = vst [vmem:[#allocation277_spill] sm:$0xff] %v5529_v61  ;;  %v5554_v61 = vld [vmem:[%s7895_s7 + $0x3ec] sm:$0xf] }
 0x119   :  { %8172 = vst [vmem:[#allocation278_spill] sm:$0xff] %v5534_v33  ;;  %v5559_v33 = vld [vmem:[%s7895_s7 + $0x3e8] sm:$0xf] }
 0x11a   :  { %8173 = vst [vmem:[#allocation279_spill] sm:$0xff] %v5539_v49  ;;  %v5564_v49 = vld [vmem:[%s7895_s7 + $0x3f0] sm:$0xf0] }
 0x11b   :  { %8174 = vst [vmem:[#allocation280_spill] sm:$0xff] %v5544_v35  ;;  %v5569_v35 = vld [vmem:[%s7895_s7 + $0x3ec] sm:$0xf0] }
 0x11c   :  { %8175 = vst [vmem:[#allocation281_spill] sm:$0xff] %v5549_v60  ;;  %v5574_v60 = vld [vmem:[%s7895_s7 + $0x3f8] sm:$0xf0] }
 0x11d   :  { %8176 = vst [vmem:[#allocation282_spill] sm:$0xff] %v5554_v61  ;;  %v5579_v61 = vld [vmem:[%s7895_s7 + $0x3f4] sm:$0xf0] }
 0x11e   :  { %8177 = vst [vmem:[#allocation283_spill] sm:$0xff] %v5559_v33  ;;  %v5584_v33 = vld [vmem:[%s7895_s7 + $0x400] sm:$0xf0] }
 0x11f   :  { %8178 = vst [vmem:[#allocation284_spill] sm:$0xff] %v5564_v49  ;;  %v325_v49 = vld [vmem:[%s7890_s2 + $0x28] sm:$0xff] }
 0x120   :  { %8179 = vst [vmem:[#allocation285_spill] sm:$0xff] %v5569_v35  ;;  %v376_v35 = vld [vmem:[%s7891_s3] sm:$0xff]   ;;  %s6739_s3 = smov 0  }
 0x121   :  { %8180 = vst [vmem:[#allocation286_spill] sm:$0xff] %v5574_v60  ;;  %v6429_v60 = vld [vmem:[%s7895_s7 + $0x69c] sm:$0xf0] }
 0x122   :  { %8181 = vst [vmem:[#allocation287_spill] sm:$0xff] %v5579_v61  ;;  %v6434_v61 = vld [vmem:[%s7895_s7 + $0x6a8] sm:$0xf0] }
 0x123   :  { %8182 = vst [vmem:[#allocation288_spill] sm:$0xff] %v5584_v33  ;;  %v5609_v33 = vld [vmem:[%s7895_s7 + $0x40c] sm:$0xf0] }
 0x124   :  { %8183 = vst [vmem:[#allocation289_spill] sm:$0xff] %v5589_v41  ;;  %v5614_v41 = vld [vmem:[%s7895_s7 + $0x418] sm:$0xf0] }
 0x125   :  { %8184 = vst [vmem:[#allocation290_spill] sm:$0xff] %v5594_v53  ;;  %v5619_v53 = vld [vmem:[%s7895_s7 + $0x414] sm:$0xf0] }
 0x126   :  { %8185 = vst [vmem:[#allocation291_spill] sm:$0xff] %v5599_v46  ;;  %v5624_v46 = vld [vmem:[%s7895_s7 + $0x420] sm:$0xf0] }
 0x127   :  { %8186 = vst [vmem:[#allocation292_spill] sm:$0xff] %v5604_v44  ;;  %v5629_v44 = vld [vmem:[%s7895_s7 + $0x41c] sm:$0xf0] }
 0x128   :  { %8187 = vst [vmem:[#allocation293_spill] sm:$0xff] %v5609_v33  ;;  %v5634_v33 = vld [vmem:[%s7895_s7 + $0x428] sm:$0xf0] }
 0x129   :  { %8188 = vst [vmem:[#allocation294_spill] sm:$0xff] %v5614_v41  ;;  %v5639_v41 = vld [vmem:[%s7895_s7 + $0x424] sm:$0xf0] }
 0x12a   :  { %8189 = vst [vmem:[#allocation295_spill] sm:$0xff] %v5619_v53  ;;  %v5644_v53 = vld [vmem:[%s7895_s7 + $0x430] sm:$0xf0] }
 0x12b   :  { %8190 = vst [vmem:[#allocation296_spill] sm:$0xff] %v5624_v46  ;;  %v5649_v46 = vld [vmem:[%s7895_s7 + $0x42c] sm:$0xf0] }
 0x12c   :  { %8191 = vst [vmem:[#allocation297_spill] sm:$0xff] %v5629_v44  ;;  %v5654_v44 = vld [vmem:[%s7895_s7 + $0x438] sm:$0xf0] }
 0x12d   :  { %8192 = vst [vmem:[#allocation298_spill] sm:$0xff] %v5634_v33  ;;  %v5659_v33 = vld [vmem:[%s7895_s7 + $0x434] sm:$0xf0] }
 0x12e   :  { %8193 = vst [vmem:[#allocation299_spill] sm:$0xff] %v5639_v41  ;;  %v5664_v41 = vld [vmem:[%s7895_s7 + $0x440] sm:$0xf0] }
 0x12f   :  { %8194 = vst [vmem:[#allocation300_spill] sm:$0xff] %v5644_v53  ;;  %v5669_v53 = vld [vmem:[%s7895_s7 + $0x43c] sm:$0xf0] }
 0x130   :  { %8195 = vst [vmem:[#allocation301_spill] sm:$0xff] %v5649_v46  ;;  %v5674_v46 = vld [vmem:[%s7895_s7 + $0x448] sm:$0xf0] }
 0x131   :  { %8196 = vst [vmem:[#allocation302_spill] sm:$0xff] %v5654_v44  ;;  %v5679_v44 = vld [vmem:[%s7895_s7 + $0x444] sm:$0xf0] }
 0x132   :  { %8197 = vst [vmem:[#allocation303_spill] sm:$0xff] %v5659_v33  ;;  %v5684_v33 = vld [vmem:[%s7895_s7 + $0x450] sm:$0xf0] }
 0x133   :  { %8198 = vst [vmem:[#allocation304_spill] sm:$0xff] %v5664_v41  ;;  %v5689_v41 = vld [vmem:[%s7895_s7 + $0x44c] sm:$0xf0] }
 0x134   :  { %8199 = vst [vmem:[#allocation305_spill] sm:$0xff] %v5669_v53  ;;  %v5694_v53 = vld [vmem:[%s7895_s7 + $0x458] sm:$0xf0] }
 0x135   :  { %8200 = vst [vmem:[#allocation306_spill] sm:$0xff] %v5674_v46  ;;  %v5699_v46 = vld [vmem:[%s7895_s7 + $0x454] sm:$0xf0] }
 0x136   :  { %8201 = vst [vmem:[#allocation307_spill] sm:$0xff] %v5679_v44  ;;  %v5704_v44 = vld [vmem:[%s7895_s7 + $0x464] sm:$0xf] }
 0x137   :  { %8202 = vst [vmem:[#allocation308_spill] sm:$0xff] %v5684_v33  ;;  %v5709_v33 = vld [vmem:[%s7895_s7 + $0x460] sm:$0xf] }
 0x138   :  { %8203 = vst [vmem:[#allocation309_spill] sm:$0xff] %v5689_v41  ;;  %v5714_v41 = vld [vmem:[%s7895_s7 + $0x46c] sm:$0xf] }
 0x139   :  { %8204 = vst [vmem:[#allocation310_spill] sm:$0xff] %v5694_v53  ;;  %v5719_v53 = vld [vmem:[%s7895_s7 + $0x468] sm:$0xf] }
 0x13a   :  { %8205 = vst [vmem:[#allocation311_spill] sm:$0xff] %v5699_v46  ;;  %v5724_v46 = vld [vmem:[%s7895_s7 + $0x474] sm:$0xf] }
 0x13b   :  { %8206 = vst [vmem:[#allocation312_spill] sm:$0xff] %v5724_v46  ;;  %v5749_v46 = vld [vmem:[%s7895_s7 + $0x480] sm:$0xf] }
 0x13c   :  { %8207 = vst [vmem:[#allocation313_spill] sm:$0xff] %v5729_v54  ;;  %v5754_v54 = vld [vmem:[%s7895_s7 + $0x48c] sm:$0xf] }
 0x13d   :  { %8208 = vst [vmem:[#allocation314_spill] sm:$0xff] %v5734_v55  ;;  %v5759_v55 = vld [vmem:[%s7895_s7 + $0x488] sm:$0xf] }
 0x13e   :  { %8209 = vst [vmem:[#allocation315_spill] sm:$0xff] %v5739_v48  ;;  %v5764_v48 = vld [vmem:[%s7895_s7 + $0x494] sm:$0xf] }
 0x13f   :  { %8210 = vst [vmem:[#allocation316_spill] sm:$0xff] %v5744_v57  ;;  %v5769_v57 = vld [vmem:[%s7895_s7 + $0x490] sm:$0xf] }
 0x140   :  { %8211 = vst [vmem:[#allocation317_spill] sm:$0xff] %v5749_v46  ;;  %v5774_v46 = vld [vmem:[%s7895_s7 + $0x49c] sm:$0xf] }
 0x141   :  { %8212 = vst [vmem:[#allocation318_spill] sm:$0xff] %v5754_v54  ;;  %v5779_v54 = vld [vmem:[%s7895_s7 + $0x498] sm:$0xf] }
 0x142   :  { %8213 = vst [vmem:[#allocation319_spill] sm:$0xff] %v5759_v55  ;;  %v5784_v55 = vld [vmem:[%s7895_s7 + $0x4a4] sm:$0xf] }
 0x143   :  { %8214 = vst [vmem:[#allocation320_spill] sm:$0xff] %v5764_v48  ;;  %v5789_v48 = vld [vmem:[%s7895_s7 + $0x4a0] sm:$0xf] }
 0x144   :  { %8215 = vst [vmem:[#allocation321_spill] sm:$0xff] %v5769_v57  ;;  %v5794_v57 = vld [vmem:[%s7895_s7 + $0x4ac] sm:$0xf] }
 0x145   :  { %8216 = vst [vmem:[#allocation322_spill] sm:$0xff] %v5774_v46  ;;  %v5799_v46 = vld [vmem:[%s7895_s7 + $0x4a8] sm:$0xf] }
 0x146   :  { %8217 = vst [vmem:[#allocation323_spill] sm:$0xff] %v5779_v54  ;;  %v5804_v54 = vld [vmem:[%s7895_s7 + $0x4b4] sm:$0xf] }
 0x147   :  { %8218 = vst [vmem:[#allocation324_spill] sm:$0xff] %v5784_v55  ;;  %v5809_v55 = vld [vmem:[%s7895_s7 + $0x4b0] sm:$0xf] }
 0x148   :  { %8219 = vst [vmem:[#allocation325_spill] sm:$0xff] %v5789_v48  ;;  %v5814_v48 = vld [vmem:[%s7895_s7 + $0x4bc] sm:$0xf] }
 0x149   :  { %8220 = vst [vmem:[#allocation326_spill] sm:$0xff] %v5794_v57  ;;  %v5819_v57 = vld [vmem:[%s7895_s7 + $0x4b8] sm:$0xf] }
 0x14a   :  { %8221 = vst [vmem:[#allocation327_spill] sm:$0xff] %v5799_v46  ;;  %v5824_v46 = vld [vmem:[%s7895_s7 + $0x4c4] sm:$0xf] }
 0x14b   :  { %8222 = vst [vmem:[#allocation328_spill] sm:$0xff] %v5804_v54  ;;  %v5829_v54 = vld [vmem:[%s7895_s7 + $0x4c0] sm:$0xf] }
 0x14c   :  { %8223 = vst [vmem:[#allocation329_spill] sm:$0xff] %v5809_v55  ;;  %v5834_v55 = vld [vmem:[%s7895_s7 + $0x4cc] sm:$0xf] }
 0x14d   :  { %8224 = vst [vmem:[#allocation330_spill] sm:$0xff] %v5814_v48  ;;  %v5839_v48 = vld [vmem:[%s7895_s7 + $0x4c8] sm:$0xf] }
 0x14e   :  { %8225 = vst [vmem:[#allocation331_spill] sm:$0xff] %v5819_v57  ;;  %v5844_v57 = vld [vmem:[%s7895_s7 + $0x4d0] sm:$0xf0] }
 0x14f   :  { %8226 = vst [vmem:[#allocation332_spill] sm:$0xff] %v5824_v46  ;;  %v5849_v46 = vld [vmem:[%s7895_s7 + $0x4cc] sm:$0xf0] }
 0x150   :  { %8227 = vst [vmem:[#allocation333_spill] sm:$0xff] %v5829_v54  ;;  %v5854_v54 = vld [vmem:[%s7895_s7 + $0x4d8] sm:$0xf0] }
 0x151   :  { %8228 = vst [vmem:[#allocation334_spill] sm:$0xff] %v5834_v55  ;;  %v5859_v55 = vld [vmem:[%s7895_s7 + $0x4d4] sm:$0xf0] }
 0x152   :  { %8229 = vst [vmem:[#allocation335_spill] sm:$0xff] %v5839_v48  ;;  %v5864_v48 = vld [vmem:[%s7895_s7 + $0x4e0] sm:$0xf0] }
 0x153   :  { %8230 = vst [vmem:[#allocation336_spill] sm:$0xff] %v5864_v48  ;;  %v5889_v48 = vld [vmem:[%s7895_s7 + $0x4ec] sm:$0xf0] }
 0x154   :  { %8231 = vst [vmem:[#allocation337_spill] sm:$0xff] %v5869_v52  ;;  %v5894_v52 = vld [vmem:[%s7895_s7 + $0x4f8] sm:$0xf0] }
 0x155   :  { %8232 = vst [vmem:[#allocation338_spill] sm:$0xff] %v5874_v45  ;;  %v5899_v45 = vld [vmem:[%s7895_s7 + $0x4f4] sm:$0xf0] }
 0x156   :  { %8233 = vst [vmem:[#allocation339_spill] sm:$0xff] %v5879_v39  ;;  %v5904_v39 = vld [vmem:[%s7895_s7 + $0x500] sm:$0xf0] }
 0x157   :  { %8234 = vst [vmem:[#allocation340_spill] sm:$0xff] %v5884_v38  ;;  %v5909_v38 = vld [vmem:[%s7895_s7 + $0x4fc] sm:$0xf0] }
 0x158   :  { %8235 = vst [vmem:[#allocation341_spill] sm:$0xff] %v5889_v48  ;;  %v5914_v48 = vld [vmem:[%s7895_s7 + $0x508] sm:$0xf0] }
 0x159   :  { %8236 = vst [vmem:[#allocation342_spill] sm:$0xff] %v5894_v52  ;;  %v5919_v52 = vld [vmem:[%s7895_s7 + $0x504] sm:$0xf0] }
 0x15a   :  { %8237 = vst [vmem:[#allocation343_spill] sm:$0xff] %v5899_v45  ;;  %v5924_v45 = vld [vmem:[%s7895_s7 + $0x510] sm:$0xf0] }
 0x15b   :  { %8238 = vst [vmem:[#allocation344_spill] sm:$0xff] %v5904_v39  ;;  %v5929_v39 = vld [vmem:[%s7895_s7 + $0x50c] sm:$0xf0] }
 0x15c   :  { %8239 = vst [vmem:[#allocation345_spill] sm:$0xff] %v5909_v38  ;;  %v5934_v38 = vld [vmem:[%s7895_s7 + $0x518] sm:$0xf0] }
 0x15d   :  { %8240 = vst [vmem:[#allocation346_spill] sm:$0xff] %v5914_v48  ;;  %v5939_v48 = vld [vmem:[%s7895_s7 + $0x514] sm:$0xf0] }
 0x15e   :  { %8241 = vst [vmem:[#allocation347_spill] sm:$0xff] %v5919_v52  ;;  %v5944_v52 = vld [vmem:[%s7895_s7 + $0x520] sm:$0xf0] }
 0x15f   :  { %8242 = vst [vmem:[#allocation348_spill] sm:$0xff] %v5924_v45  ;;  %v5949_v45 = vld [vmem:[%s7895_s7 + $0x51c] sm:$0xf0] }
 0x160   :  { %8243 = vst [vmem:[#allocation349_spill] sm:$0xff] %v5929_v39  ;;  %v5954_v39 = vld [vmem:[%s7895_s7 + $0x528] sm:$0xf0] }
 0x161   :  { %8244 = vst [vmem:[#allocation350_spill] sm:$0xff] %v5934_v38  ;;  %v5959_v38 = vld [vmem:[%s7895_s7 + $0x524] sm:$0xf0] }
 0x162   :  { %8245 = vst [vmem:[#allocation351_spill] sm:$0xff] %v5939_v48  ;;  %v5964_v48 = vld [vmem:[%s7895_s7 + $0x530] sm:$0xf0] }
 0x163   :  { %8246 = vst [vmem:[#allocation352_spill] sm:$0xff] %v5944_v52  ;;  %v5969_v52 = vld [vmem:[%s7895_s7 + $0x52c] sm:$0xf0] }
 0x164   :  { %8247 = vst [vmem:[#allocation353_spill] sm:$0xff] %v5949_v45  ;;  %v5974_v45 = vld [vmem:[%s7895_s7 + $0x538] sm:$0xf0] }
 0x165   :  { %8248 = vst [vmem:[#allocation354_spill] sm:$0xff] %v5954_v39  ;;  %v5979_v39 = vld [vmem:[%s7895_s7 + $0x534] sm:$0xf0] }
 0x166   :  { %8249 = vst [vmem:[#allocation355_spill] sm:$0xff] %v5959_v38  ;;  %v5984_v38 = vld [vmem:[%s7895_s7 + $0x544] sm:$0xf] }
 0x167   :  { %8250 = vst [vmem:[#allocation356_spill] sm:$0xff] %v5964_v48  ;;  %v5989_v48 = vld [vmem:[%s7895_s7 + $0x540] sm:$0xf] }
 0x168   :  { %8251 = vst [vmem:[#allocation357_spill] sm:$0xff] %v5969_v52  ;;  %v5994_v52 = vld [vmem:[%s7895_s7 + $0x54c] sm:$0xf] }
 0x169   :  { %8252 = vst [vmem:[#allocation358_spill] sm:$0xff] %v5974_v45  ;;  %v5999_v45 = vld [vmem:[%s7895_s7 + $0x548] sm:$0xf] }
 0x16a   :  { %8253 = vst [vmem:[#allocation359_spill] sm:$0xff] %v5979_v39  ;;  %v6004_v39 = vld [vmem:[%s7895_s7 + $0x554] sm:$0xf] }
 0x16b   :  { %8254 = vst [vmem:[#allocation360_spill] sm:$0xff] %v6004_v39  ;;  %v6029_v39 = vld [vmem:[%s7895_s7 + $0x560] sm:$0xf] }
 0x16c   :  { %8255 = vst [vmem:[#allocation361_spill] sm:$0xff] %v6009_v51  ;;  %v6034_v51 = vld [vmem:[%s7895_s7 + $0x56c] sm:$0xf] }
 0x16d   :  { %8256 = vst [vmem:[#allocation362_spill] sm:$0xff] %v6014_v42  ;;  %v6039_v42 = vld [vmem:[%s7895_s7 + $0x568] sm:$0xf] }
 0x16e   :  { %8257 = vst [vmem:[#allocation363_spill] sm:$0xff] %v6019_v56  ;;  %v6044_v56 = vld [vmem:[%s7895_s7 + $0x574] sm:$0xf] }
 0x16f   :  { %8258 = vst [vmem:[#allocation364_spill] sm:$0xff] %v6024_v36  ;;  %v6049_v36 = vld [vmem:[%s7895_s7 + $0x570] sm:$0xf] }
 0x170   :  { %8259 = vst [vmem:[#allocation365_spill] sm:$0xff] %v6029_v39  ;;  %v6054_v39 = vld [vmem:[%s7895_s7 + $0x57c] sm:$0xf] }
 0x171   :  { %8260 = vst [vmem:[#allocation366_spill] sm:$0xff] %v6034_v51  ;;  %v6059_v51 = vld [vmem:[%s7895_s7 + $0x578] sm:$0xf] }
 0x172   :  { %8261 = vst [vmem:[#allocation367_spill] sm:$0xff] %v6039_v42  ;;  %v6064_v42 = vld [vmem:[%s7895_s7 + $0x584] sm:$0xf] }
 0x173   :  { %8262 = vst [vmem:[#allocation368_spill] sm:$0xff] %v6044_v56  ;;  %v6069_v56 = vld [vmem:[%s7895_s7 + $0x580] sm:$0xf] }
 0x174   :  { %8263 = vst [vmem:[#allocation369_spill] sm:$0xff] %v6049_v36  ;;  %v6074_v36 = vld [vmem:[%s7895_s7 + $0x58c] sm:$0xf] }
 0x175   :  { %8264 = vst [vmem:[#allocation370_spill] sm:$0xff] %v6054_v39  ;;  %v6079_v39 = vld [vmem:[%s7895_s7 + $0x588] sm:$0xf] }
 0x176   :  { %8265 = vst [vmem:[#allocation371_spill] sm:$0xff] %v6059_v51  ;;  %v6084_v51 = vld [vmem:[%s7895_s7 + $0x594] sm:$0xf] }
 0x177   :  { %8266 = vst [vmem:[#allocation372_spill] sm:$0xff] %v6064_v42  ;;  %v6089_v42 = vld [vmem:[%s7895_s7 + $0x590] sm:$0xf] }
 0x178   :  { %8267 = vst [vmem:[#allocation373_spill] sm:$0xff] %v6069_v56  ;;  %v6094_v56 = vld [vmem:[%s7895_s7 + $0x59c] sm:$0xf] }
 0x179   :  { %8268 = vst [vmem:[#allocation374_spill] sm:$0xff] %v6074_v36  ;;  %v6099_v36 = vld [vmem:[%s7895_s7 + $0x598] sm:$0xf] }
 0x17a   :  { %8269 = vst [vmem:[#allocation375_spill] sm:$0xff] %v6079_v39  ;;  %v6104_v39 = vld [vmem:[%s7895_s7 + $0x5a4] sm:$0xf] }
 0x17b   :  { %8270 = vst [vmem:[#allocation376_spill] sm:$0xff] %v6084_v51  ;;  %v6109_v51 = vld [vmem:[%s7895_s7 + $0x5a0] sm:$0xf] }
 0x17c   :  { %8271 = vst [vmem:[#allocation377_spill] sm:$0xff] %v6089_v42  ;;  %v6114_v42 = vld [vmem:[%s7895_s7 + $0x5ac] sm:$0xf] }
 0x17d   :  { %8272 = vst [vmem:[#allocation378_spill] sm:$0xff] %v6094_v56  ;;  %v6119_v56 = vld [vmem:[%s7895_s7 + $0x5a8] sm:$0xf] }
 0x17e   :  { %8273 = vst [vmem:[#allocation379_spill] sm:$0xff] %v6099_v36  ;;  %v6124_v36 = vld [vmem:[%s7895_s7 + $0x5b0] sm:$0xf0] }
 0x17f   :  { %8274 = vst [vmem:[#allocation380_spill] sm:$0xff] %v6104_v39  ;;  %v6129_v39 = vld [vmem:[%s7895_s7 + $0x5ac] sm:$0xf0] }
 0x180   :  { %8275 = vst [vmem:[#allocation381_spill] sm:$0xff] %v6109_v51  ;;  %v6134_v51 = vld [vmem:[%s7895_s7 + $0x5b8] sm:$0xf0] }
 0x181   :  { %8276 = vst [vmem:[#allocation382_spill] sm:$0xff] %v6114_v42  ;;  %v6139_v42 = vld [vmem:[%s7895_s7 + $0x5b4] sm:$0xf0] }
 0x182   :  { %8277 = vst [vmem:[#allocation383_spill] sm:$0xff] %v6119_v56  ;;  %v6144_v56 = vld [vmem:[%s7895_s7 + $0x5c0] sm:$0xf0] }
 0x183   :  { %8278 = vst [vmem:[#allocation384_spill] sm:$0xff] %v6144_v56  ;;  %v6169_v56 = vld [vmem:[%s7895_s7 + $0x5cc] sm:$0xf0] }
 0x184   :  { %8279 = vst [vmem:[#allocation385_spill] sm:$0xff] %v6149_v47  ;;  %v6174_v47 = vld [vmem:[%s7895_s7 + $0x5d8] sm:$0xf0] }
 0x185   :  { %8280 = vst [vmem:[#allocation386_spill] sm:$0xff] %v6154_v40  ;;  %v6179_v40 = vld [vmem:[%s7895_s7 + $0x5d4] sm:$0xf0] }
 0x186   :  { %8281 = vst [vmem:[#allocation387_spill] sm:$0xff] %v6159_v43  ;;  %v6184_v43 = vld [vmem:[%s7895_s7 + $0x5e0] sm:$0xf0] }
 0x187   :  { %8282 = vst [vmem:[#allocation388_spill] sm:$0xff] %v6164_v59  ;;  %v6189_v59 = vld [vmem:[%s7895_s7 + $0x5dc] sm:$0xf0] }
 0x188   :  { %8283 = vst [vmem:[#allocation389_spill] sm:$0xff] %v6169_v56  ;;  %v6194_v56 = vld [vmem:[%s7895_s7 + $0x5e8] sm:$0xf0] }
 0x189   :  { %8284 = vst [vmem:[#allocation390_spill] sm:$0xff] %v6174_v47  ;;  %v6199_v47 = vld [vmem:[%s7895_s7 + $0x5e4] sm:$0xf0] }
 0x18a   :  { %8285 = vst [vmem:[#allocation391_spill] sm:$0xff] %v6179_v40  ;;  %v6204_v40 = vld [vmem:[%s7895_s7 + $0x5f0] sm:$0xf0] }
 0x18b   :  { %8286 = vst [vmem:[#allocation392_spill] sm:$0xff] %v6184_v43  ;;  %v6209_v43 = vld [vmem:[%s7895_s7 + $0x5ec] sm:$0xf0] }
 0x18c   :  { %8287 = vst [vmem:[#allocation393_spill] sm:$0xff] %v6189_v59  ;;  %v6214_v59 = vld [vmem:[%s7895_s7 + $0x5f8] sm:$0xf0] }
 0x18d   :  { %8288 = vst [vmem:[#allocation394_spill] sm:$0xff] %v6194_v56  ;;  %v6219_v56 = vld [vmem:[%s7895_s7 + $0x5f4] sm:$0xf0] }
 0x18e   :  { %8289 = vst [vmem:[#allocation395_spill] sm:$0xff] %v6199_v47  ;;  %v6224_v47 = vld [vmem:[%s7895_s7 + $0x600] sm:$0xf0] }
 0x18f   :  { %8290 = vst [vmem:[#allocation396_spill] sm:$0xff] %v6204_v40  ;;  %v6229_v40 = vld [vmem:[%s7895_s7 + $0x5fc] sm:$0xf0] }
 0x190   :  { %8291 = vst [vmem:[#allocation397_spill] sm:$0xff] %v6209_v43  ;;  %v6234_v43 = vld [vmem:[%s7895_s7 + $0x608] sm:$0xf0] }
 0x191   :  { %8292 = vst [vmem:[#allocation398_spill] sm:$0xff] %v6214_v59  ;;  %v6239_v59 = vld [vmem:[%s7895_s7 + $0x604] sm:$0xf0] }
 0x192   :  { %8293 = vst [vmem:[#allocation399_spill] sm:$0xff] %v6219_v56  ;;  %v6244_v56 = vld [vmem:[%s7895_s7 + $0x610] sm:$0xf0] }
 0x193   :  { %8294 = vst [vmem:[#allocation400_spill] sm:$0xff] %v6224_v47  ;;  %v6249_v47 = vld [vmem:[%s7895_s7 + $0x60c] sm:$0xf0] }
 0x194   :  { %8295 = vst [vmem:[#allocation401_spill] sm:$0xff] %v6229_v40  ;;  %v6254_v40 = vld [vmem:[%s7895_s7 + $0x618] sm:$0xf0] }
 0x195   :  { %8296 = vst [vmem:[#allocation402_spill] sm:$0xff] %v6234_v43  ;;  %v6259_v43 = vld [vmem:[%s7895_s7 + $0x614] sm:$0xf0] }
 0x196   :  { %8297 = vst [vmem:[#allocation403_spill] sm:$0xff] %v6239_v59  ;;  %v6264_v59 = vld [vmem:[%s7895_s7 + $0x624] sm:$0xf] }
 0x197   :  { %8298 = vst [vmem:[#allocation404_spill] sm:$0xff] %v6244_v56  ;;  %v6269_v56 = vld [vmem:[%s7895_s7 + $0x620] sm:$0xf] }
 0x198   :  { %8299 = vst [vmem:[#allocation405_spill] sm:$0xff] %v6249_v47  ;;  %v6274_v47 = vld [vmem:[%s7895_s7 + $0x62c] sm:$0xf] }
 0x199   :  { %8300 = vst [vmem:[#allocation406_spill] sm:$0xff] %v6254_v40  ;;  %v6279_v40 = vld [vmem:[%s7895_s7 + $0x628] sm:$0xf] }
 0x19a   :  { %8301 = vst [vmem:[#allocation407_spill] sm:$0xff] %v6259_v43  ;;  %v6284_v43 = vld [vmem:[%s7895_s7 + $0x634] sm:$0xf] }
 0x19b   :  { %8302 = vst [vmem:[#allocation408_spill] sm:$0xff] %v6284_v43  ;;  %v6309_v43 = vld [vmem:[%s7895_s7 + $0x640] sm:$0xf] }
 0x19c   :  { %8303 = vst [vmem:[#allocation409_spill] sm:$0xff] %v6289_v34  ;;  %v6314_v34 = vld [vmem:[%s7895_s7 + $0x64c] sm:$0xf] }
 0x19d   :  { %8304 = vst [vmem:[#allocation410_spill] sm:$0xff] %v6294_v50  ;;  %v6319_v50 = vld [vmem:[%s7895_s7 + $0x648] sm:$0xf] }
 0x19e   :  { %8305 = vst [vmem:[#allocation411_spill] sm:$0xff] %v6299_v37  ;;  %v6324_v37 = vld [vmem:[%s7895_s7 + $0x654] sm:$0xf] }
 0x19f   :  { %8306 = vst [vmem:[#allocation412_spill] sm:$0xff] %v6304_v62  ;;  %v6329_v62 = vld [vmem:[%s7895_s7 + $0x650] sm:$0xf] }
 0x1a0   :  { %8307 = vst [vmem:[#allocation413_spill] sm:$0xff] %v6309_v43  ;;  %v6334_v43 = vld [vmem:[%s7895_s7 + $0x65c] sm:$0xf] }
 0x1a1   :  { %8308 = vst [vmem:[#allocation414_spill] sm:$0xff] %v6314_v34  ;;  %v6339_v34 = vld [vmem:[%s7895_s7 + $0x658] sm:$0xf] }
 0x1a2   :  { %8309 = vst [vmem:[#allocation415_spill] sm:$0xff] %v6319_v50  ;;  %v6344_v50 = vld [vmem:[%s7895_s7 + $0x664] sm:$0xf] }
 0x1a3   :  { %8310 = vst [vmem:[#allocation416_spill] sm:$0xff] %v6324_v37  ;;  %v6349_v37 = vld [vmem:[%s7895_s7 + $0x660] sm:$0xf] }
 0x1a4   :  { %8311 = vst [vmem:[#allocation417_spill] sm:$0xff] %v6329_v62  ;;  %v6354_v62 = vld [vmem:[%s7895_s7 + $0x66c] sm:$0xf] }
 0x1a5   :  { %8312 = vst [vmem:[#allocation418_spill] sm:$0xff] %v6334_v43  ;;  %v6359_v43 = vld [vmem:[%s7895_s7 + $0x668] sm:$0xf] }
 0x1a6   :  { %8313 = vst [vmem:[#allocation419_spill] sm:$0xff] %v6339_v34  ;;  %v6364_v34 = vld [vmem:[%s7895_s7 + $0x674] sm:$0xf] }
 0x1a7   :  { %8314 = vst [vmem:[#allocation420_spill] sm:$0xff] %v6344_v50  ;;  %v6369_v50 = vld [vmem:[%s7895_s7 + $0x670] sm:$0xf] }
 0x1a8   :  { %8315 = vst [vmem:[#allocation421_spill] sm:$0xff] %v6349_v37  ;;  %v6374_v37 = vld [vmem:[%s7895_s7 + $0x67c] sm:$0xf] }
 0x1a9   :  { %8316 = vst [vmem:[#allocation422_spill] sm:$0xff] %v6354_v62  ;;  %v6379_v62 = vld [vmem:[%s7895_s7 + $0x678] sm:$0xf] }
 0x1aa   :  { %8317 = vst [vmem:[#allocation423_spill] sm:$0xff] %v6359_v43  ;;  %v6384_v43 = vld [vmem:[%s7895_s7 + $0x684] sm:$0xf] }
 0x1ab   :  { %8318 = vst [vmem:[#allocation424_spill] sm:$0xff] %v6364_v34  ;;  %v6389_v34 = vld [vmem:[%s7895_s7 + $0x680] sm:$0xf] }
 0x1ac   :  { %8319 = vst [vmem:[#allocation425_spill] sm:$0xff] %v6369_v50  ;;  %v6394_v50 = vld [vmem:[%s7895_s7 + $0x68c] sm:$0xf] }
 0x1ad   :  { %8320 = vst [vmem:[#allocation426_spill] sm:$0xff] %v6374_v37  ;;  %v6399_v37 = vld [vmem:[%s7895_s7 + $0x688] sm:$0xf] }
 0x1ae   :  { %8321 = vst [vmem:[#allocation427_spill] sm:$0xff] %v6379_v62  ;;  %v6404_v62 = vld [vmem:[%s7895_s7 + $0x690] sm:$0xf0] }
 0x1af   :  { %8322 = vst [vmem:[#allocation428_spill] sm:$0xff] %v6384_v43  ;;  %v6409_v43 = vld [vmem:[%s7895_s7 + $0x68c] sm:$0xf0] }
 0x1b0   :  { %8323 = vst [vmem:[#allocation429_spill] sm:$0xff] %v6389_v34  ;;  %v6414_v34 = vld [vmem:[%s7895_s7 + $0x698] sm:$0xf0] }
 0x1b1   :  { %8324 = vst [vmem:[#allocation430_spill] sm:$0xff] %v6394_v50  ;;  %v6419_v50 = vld [vmem:[%s7895_s7 + $0x694] sm:$0xf0] }
 0x1b2   :  { %8325 = vst [vmem:[#allocation431_spill] sm:$0xff] %v6399_v37  ;;  %v6424_v37 = vld [vmem:[%s7895_s7 + $0x6a0] sm:$0xf0] }
 0x1b3   :  { %8326 = vst [vmem:[#allocation432_spill] sm:$0xff] %v6424_v37  ;;  %v6449_v37 = vld [vmem:[%s7895_s7 + $0x6ac] sm:$0xf0] }
 0x1b4   :  { %8327 = vst [vmem:[#allocation433_spill] sm:$0xff] %v6429_v60  ;;  %v6454_v60 = vld [vmem:[%s7895_s7 + $0x6b8] sm:$0xf0] }
 0x1b5   :  { %8328 = vst [vmem:[#allocation434_spill] sm:$0xff] %v6434_v61  ;;  %v6459_v61 = vld [vmem:[%s7895_s7 + $0x6b4] sm:$0xf0] }
 0x1b6   :  { %8329 = vst [vmem:[#allocation435_spill] sm:$0xff] %v6439_v63  ;;  %v6464_v63 = vld [vmem:[%s7895_s7 + $0x6c0] sm:$0xf0] }
 0x1b7   :  { %8330 = vst [vmem:[#allocation436_spill] sm:$0xff] %v6444_v32  ;;  %v6469_v32 = vld [vmem:[%s7895_s7 + $0x6bc] sm:$0xf0] }
 0x1b8   :  { %8331 = vst [vmem:[#allocation437_spill] sm:$0xff] %v6449_v37  ;;  %v6474_v37 = vld [vmem:[%s7895_s7 + $0x6c8] sm:$0xf0] }
 0x1b9   :  { %8332 = vst [vmem:[#allocation438_spill] sm:$0xff] %v6454_v60  ;;  %v6479_v60 = vld [vmem:[%s7895_s7 + $0x6c4] sm:$0xf0] }
 0x1ba   :  { %8333 = vst [vmem:[#allocation439_spill] sm:$0xff] %v6459_v61  ;;  %v6484_v61 = vld [vmem:[%s7895_s7 + $0x6d0] sm:$0xf0] }
 0x1bb   :  { %8334 = vst [vmem:[#allocation440_spill] sm:$0xff] %v6464_v63  ;;  %v6489_v63 = vld [vmem:[%s7895_s7 + $0x6cc] sm:$0xf0] }
 0x1bc   :  { %8335 = vst [vmem:[#allocation441_spill] sm:$0xff] %v6469_v32  ;;  %v6494_v32 = vld [vmem:[%s7895_s7 + $0x6d8] sm:$0xf0] }
 0x1bd   :  { %8336 = vst [vmem:[#allocation442_spill] sm:$0xff] %v6474_v37  ;;  %v6499_v37 = vld [vmem:[%s7895_s7 + $0x6d4] sm:$0xf0] }
 0x1be   :  { %8337 = vst [vmem:[#allocation443_spill] sm:$0xff] %v6479_v60  ;;  %v6504_v60 = vld [vmem:[%s7895_s7 + $0x6e0] sm:$0xf0] }
 0x1bf   :  { %8338 = vst [vmem:[#allocation444_spill] sm:$0xff] %v6484_v61  ;;  %v6509_v61 = vld [vmem:[%s7895_s7 + $0x6dc] sm:$0xf0] }
 0x1c0   :  { %8339 = vst [vmem:[#allocation445_spill] sm:$0xff] %v6489_v63  ;;  %v6514_v63 = vld [vmem:[%s7895_s7 + $0x6e8] sm:$0xf0] }
 0x1c1   :  { %8340 = vst [vmem:[#allocation446_spill] sm:$0xff] %v6494_v32  ;;  %v6519_v32 = vld [vmem:[%s7895_s7 + $0x6e4] sm:$0xf0] }
 0x1c2   :  { %8341 = vst [vmem:[#allocation447_spill] sm:$0xff] %v6499_v37  ;;  %v6524_v37 = vld [vmem:[%s7895_s7 + $0x6f0] sm:$0xf0] }
 0x1c3   :  { %8342 = vst [vmem:[#allocation448_spill] sm:$0xff] %v6504_v60  ;;  %v6529_v60 = vld [vmem:[%s7895_s7 + $0x6ec] sm:$0xf0] }
 0x1c4   :  { %8343 = vst [vmem:[#allocation449_spill] sm:$0xff] %v6509_v61  ;;  %v6534_v61 = vld [vmem:[%s7895_s7 + $0x6f8] sm:$0xf0] }
 0x1c5   :  { %8344 = vst [vmem:[#allocation450_spill] sm:$0xff] %v6514_v63  ;;  %v6539_v63 = vld [vmem:[%s7895_s7 + $0x6f4] sm:$0xf0] }
 0x1c6   :  { %8345 = vst [vmem:[#allocation451_spill] sm:$0xff] %v6519_v32  ;;  %v6544_v32 = vld [vmem:[%s7896_s8] sm:$0xff] }
 0x1c7   :  { %8346 = vst [vmem:[#allocation452_spill] sm:$0xff] %v6524_v37  ;;  %v6549_v37 = vld [vmem:[%s7896_s8 + $0x8] sm:$0xff] }
 0x1c8   :  { %8347 = vst [vmem:[#allocation453_spill] sm:$0xff] %v6529_v60  ;;  %v6554_v60 = vld [vmem:[%s7896_s8 + $0x10] sm:$0xff] }
 0x1c9   :  { %8348 = vst [vmem:[#allocation454_spill] sm:$0xff] %v6534_v61  ;;  %v6559_v61 = vld [vmem:[%s7896_s8 + $0x18] sm:$0xf] }
 0x1ca   :  { %8349 = vst [vmem:[#allocation455_spill] sm:$0xff] %v6539_v63  ;;  %v6564_v63 = vld [vmem:[%s7894_s6] sm:$0x1] }
 0x1cb   :  { %8350 = vst [vmem:[#allocation456_spill] sm:$0xff] %v6544_v32  ;;  %v320_v32 = vld [vmem:[%s7890_s2] sm:$0xff] }
 0x1cc   :  { %8351 = vst [vmem:[#allocation457_spill] sm:$0xff] %v6549_v37  ;;  %v323_v37 = vld [vmem:[%s7890_s2 + $0x18] sm:$0xff] }
 0x1cd   :  { %8352 = vst [vmem:[#allocation458_spill] sm:$0xff] %v6554_v60  ;;  %v321_v60 = vld [vmem:[%s7890_s2 + $0x8] sm:$0xff] }
 0x1ce   :  { %8353 = vst [vmem:[#allocation459_spill] sm:$0xff] %v6559_v61  ;;  %v322_v61 = vld [vmem:[%s7890_s2 + $0x10] sm:$0xff] }
 0x1cf   :  { %348 = vst [vmem:[%s7897_s9] sm:$0xff] %v320_v32  ;;  %v324_v32 = vld [vmem:[%s7890_s2 + $0x20] sm:$0xff] }
 0x1d0   :  { %349 = vst [vmem:[%s7897_s9 + $0x8] sm:$0xff] %v321_v60  ;;  %v326_v60 = vld [vmem:[%s7890_s2 + $0x30] sm:$0xff] }
 0x1d1   :  { %350 = vst [vmem:[%s7897_s9 + $0x10] sm:$0xff] %v322_v61  ;;  %v327_v61 = vld [vmem:[%s7890_s2 + $0x38] sm:$0xff] }
 0x1d2   :  { %351 = vst [vmem:[%s7897_s9 + $0x18] sm:$0xff] %v323_v37  ;;  %v328_v37 = vld [vmem:[%s7890_s2 + $0x40] sm:$0xff] }
 0x1d3   :  { %352 = vst [vmem:[%s7897_s9 + $0x20] sm:$0xff] %v324_v32  ;;  %v329_v32 = vld [vmem:[%s7890_s2 + $0x48] sm:$0xff] }
 0x1d4   :  { %353 = vst [vmem:[%s7897_s9 + $0x28] sm:$0xff] %v325_v49  ;;  %v330_v49 = vld [vmem:[%s7890_s2 + $0x50] sm:$0xff] }
 0x1d5   :  { %354 = vst [vmem:[%s7897_s9 + $0x30] sm:$0xff] %v326_v60  ;;  %v331_v60 = vld [vmem:[%s7890_s2 + $0x58] sm:$0xff] }
 0x1d6   :  { %355 = vst [vmem:[%s7897_s9 + $0x38] sm:$0xff] %v327_v61  ;;  %v332_v61 = vld [vmem:[%s7890_s2 + $0x60] sm:$0xff] }
 0x1d7   :  { %356 = vst [vmem:[%s7897_s9 + $0x40] sm:$0xff] %v328_v37  ;;  %v333_v37 = vld [vmem:[%s7890_s2 + $0x68] sm:$0xff] }
 0x1d8   :  { %357 = vst [vmem:[%s7897_s9 + $0x48] sm:$0xff] %v329_v32  ;;  %v334_v32 = vld [vmem:[%s7890_s2 + $0x70] sm:$0xff] }
 0x1d9   :  { %358 = vst [vmem:[%s7897_s9 + $0x50] sm:$0xff] %v330_v49  ;;  %v335_v49 = vld [vmem:[%s7890_s2 + $0x78] sm:$0xff] }
 0x1da   :  { %359 = vst [vmem:[%s7897_s9 + $0x58] sm:$0xff] %v331_v60  ;;  %v336_v60 = vld [vmem:[%s7890_s2 + $0x80] sm:$0xff] }
 0x1db   :  { %360 = vst [vmem:[%s7897_s9 + $0x60] sm:$0xff] %v332_v61  ;;  %v337_v61 = vld [vmem:[%s7890_s2 + $0x88] sm:$0xff] }
 0x1dc   :  { %361 = vst [vmem:[%s7897_s9 + $0x68] sm:$0xff] %v333_v37  ;;  %v338_v37 = vld [vmem:[%s7890_s2 + $0x90] sm:$0xff] }
 0x1dd   :  { %362 = vst [vmem:[%s7897_s9 + $0x70] sm:$0xff] %v334_v32  ;;  %v339_v32 = vld [vmem:[%s7890_s2 + $0x98] sm:$0xff] }
 0x1de   :  { %363 = vst [vmem:[%s7897_s9 + $0x78] sm:$0xff] %v335_v49  ;;  %v340_v49 = vld [vmem:[%s7890_s2 + $0xa0] sm:$0xff] }
 0x1df   :  { %364 = vst [vmem:[%s7897_s9 + $0x80] sm:$0xff] %v336_v60  ;;  %v341_v60 = vld [vmem:[%s7890_s2 + $0xa8] sm:$0xff] }
 0x1e0   :  { %365 = vst [vmem:[%s7897_s9 + $0x88] sm:$0xff] %v337_v61  ;;  %v342_v61 = vld [vmem:[%s7890_s2 + $0xb0] sm:$0xff] }
 0x1e1   :  { %366 = vst [vmem:[%s7897_s9 + $0x90] sm:$0xff] %v338_v37  ;;  %v343_v37 = vld [vmem:[%s7890_s2 + $0xb8] sm:$0xff] }
 0x1e2   :  { %367 = vst [vmem:[%s7897_s9 + $0x98] sm:$0xff] %v339_v32  ;;  %v344_v32 = vld [vmem:[%s7890_s2 + $0xc0] sm:$0xff] }
 0x1e3   :  { %368 = vst [vmem:[%s7897_s9 + $0xa0] sm:$0xff] %v340_v49  ;;  %v345_v49 = vld [vmem:[%s7890_s2 + $0xc8] sm:$0xff] }
 0x1e4   :  { %369 = vst [vmem:[%s7897_s9 + $0xa8] sm:$0xff] %v341_v60  ;;  %v346_v60 = vld [vmem:[%s7890_s2 + $0xd0] sm:$0xff] }
 0x1e5   :  { %370 = vst [vmem:[%s7897_s9 + $0xb0] sm:$0xff] %v342_v61  ;;  %v347_v61 = vld [vmem:[%s7890_s2 + $0xd8] sm:$0xff] }
 0x1e6   :  { %371 = vst [vmem:[%s7897_s9 + $0xb8] sm:$0xff] %v343_v37 }
 0x1e7   :  { %372 = vst [vmem:[%s7897_s9 + $0xc0] sm:$0xff] %v344_v32 }
 0x1e8   :  { %373 = vst [vmem:[%s7897_s9 + $0xc8] sm:$0xff] %v345_v49 }
 0x1e9   :  { %374 = vst [vmem:[%s7897_s9 + $0xd0] sm:$0xff] %v346_v60 }
 0x1ea   :  { %375 = vst [vmem:[%s7897_s9 + $0xd8] sm:$0xff] %v347_v61 }
 0x1eb LB: > { %v8354_v14 = vld [vmem:[#allocation23_spill] sm:$0xff]  ;;  %v8355_v15 = vld [vmem:[#allocation24_spill] sm:$0xff]  ;;  %v6749_v32 = vor.u32 %v4299_v31, %v4294_v30  ;;  %v8356_v12 = vld [vmem:[#allocation21_spill] sm:$0xff]  ;;  %v6756_v60 = vor.u32 %v4289_v29, %v4284_v28  ;;  %s384_s2 = sld [smem:[#allocation3 + %s4076_s3]]  ;;  %s4076_s3 = sphi %s6739_s3, %s382_s3   ;;  %v4072_v35 = vphi %v376_v35, %v8806_v35  }
 0x1ec   : > { %v2847_v37 = vor.u32 %v8355_v15, %v8354_v14  ;;  %v8357_v13 = vld [vmem:[#allocation22_spill] sm:$0xff]  ;;  %v8358_v10 = vld [vmem:[#allocation19_spill] sm:$0xff]  ;;  %v8359_v11 = vld [vmem:[#allocation20_spill] sm:$0xff]  ;;  %s385_s15 = sld [smem:[#allocation5 + %s4076_s3]]  ;;  %s382_s3 = sadd.s32 1, %s4076_s3  }
 0x1ed   : > { %635 = vmatpush.bf16.msra.mxu1 %v6749_v32  ;;  %v2843_v49 = vor.u32 %v8357_v13, %v8356_v12  ;;  %652 = vmatpush.bf16.msra.mxu2 %v6749_v32  ;;  %v2839_v61 = vor.u32 %v8359_v11, %v8358_v10  ;;  %v8360_v8 = vld [vmem:[#allocation17_spill] sm:$0xff]  ;;  %v8361_v9 = vld [vmem:[#allocation18_spill] sm:$0xff]  ;;  %v8362_v6 = vld [vmem:[#allocation15_spill] sm:$0xff]  ;;  %p379_p0 = scmp.ge.s32.totalorder %s382_s3, 50  }
 0x1ee   : > { %479 = vmatpush.bf16.msra.mxu0 %v2847_v37  ;;  %669 = vmatpush.bf16.msra.mxu3 %v6749_v32  ;;  %v6765_v37 = vor.u32 %v4279_v27, %v4274_v26  ;;  %v2835_v12 = vor.u32 %v8361_v9, %v8360_v8  ;;  %v8363_v7 = vld [vmem:[#allocation16_spill] sm:$0xff]  ;;  %v8364_v22 = vld [vmem:[#allocation31_spill] sm:$0xff]  ;;  %v8366_v4 = vld [vmem:[#allocation13_spill] sm:$0xff] }
 0x1ef   : > { %v2831_v10 = vor.u32 %v8363_v7, %v8362_v6  ;;  %v8365_v23 = vld [vmem:[#allocation32_spill] sm:$0xff]  ;;  %v8367_v5 = vld [vmem:[#allocation14_spill] sm:$0xff]  ;;  %v8368_v20 = vld [vmem:[#allocation29_spill] sm:$0xff] }
 0x1f0   : > { %v2827_v8 = vor.u32 %v8367_v5, %v8366_v4  ;;  %v8369_v21 = vld [vmem:[#allocation30_spill] sm:$0xff]  ;;  %v8370_v2 = vld [vmem:[#allocation11_spill] sm:$0xff]  ;;  %v8371_v3 = vld [vmem:[#allocation12_spill] sm:$0xff]  ;;  %v586_v5 = vpack.c.bf16 %v4072_v35, %v4072_v35 }
 0x1f1   : > { %636 = vmatpush.bf16.msra.mxu1 %v6756_v60  ;;  %653 = vmatpush.bf16.msra.mxu2 %v6756_v60  ;;  %v2823_v6 = vor.u32 %v8371_v3, %v8370_v2  ;;  %v8372_v18 = vld [vmem:[#allocation27_spill] sm:$0xff]  ;;  %v8373_v19 = vld [vmem:[#allocation28_spill] sm:$0xff]  ;;  %v8374_v0 = vld [vmem:[#allocation9_spill] sm:$0xff] }
 0x1f2   : > { %480 = vmatpush.bf16.msra.mxu0 %v2843_v49  ;;  %670 = vmatpush.bf16.msra.mxu3 %v6756_v60  ;;  %v6774_v49 = vor.u32 %v4269_v25, %v4264_v24  ;;  %v8375_v1 = vld [vmem:[#allocation10_spill] sm:$0xff]  ;;  %v8376_v16 = vld [vmem:[#allocation25_spill] sm:$0xff] }
 0x1f3   : > { %v2819_v4 = vor.u32 %v8375_v1, %v8374_v0  ;;  %v8377_v17 = vld [vmem:[#allocation26_spill] sm:$0xff]  ;;  %v386_v2 = vld [vmem:[%s7897_s9] sm:$0xff] }
 0x1f4   : > { %v387_v3 = vld [vmem:[%s7897_s9 + $0x8] sm:$0xff] }
 0x1f5   : > { %637 = vmatpush.bf16.msra.mxu1 %v6765_v37  ;;  %654 = vmatpush.bf16.msra.mxu2 %v6765_v37 }
 0x1f6   : > { %481 = vmatpush.bf16.msra.mxu0 %v2839_v61  ;;  %671 = vmatpush.bf16.msra.mxu3 %v6765_v37  ;;  %v6783_v61 = vor.u32 %v8365_v23, %v8364_v22  ;;  %v8769_v22 = vld [vmem:[#allocation310_spill] sm:$0xff] }
 0x1f9   : > { %638 = vmatpush.bf16.msra.mxu1 %v6774_v49  ;;  %655 = vmatpush.bf16.msra.mxu2 %v6774_v49 }
 0x1fa   : > { %482 = vmatpush.bf16.msra.mxu0 %v2835_v12  ;;  %672 = vmatpush.bf16.msra.mxu3 %v6774_v49  ;;  %v6792_v12 = vor.u32 %v8369_v21, %v8368_v20  ;;  %v8761_v20 = vld [vmem:[#allocation358_spill] sm:$0xff] }
 0x1fb   : > { %v8762_v21 = vld [vmem:[#allocation334_spill] sm:$0xff] }
 0x1fd   : > { %639 = vmatpush.bf16.msra.mxu1 %v6783_v61  ;;  %656 = vmatpush.bf16.msra.mxu2 %v6783_v61 }
 0x1fe   : > { %483 = vmatpush.bf16.msra.mxu0 %v2831_v10  ;;  %673 = vmatpush.bf16.msra.mxu3 %v6783_v61  ;;  %v6801_v10 = vor.u32 %v8373_v19, %v8372_v18 }
 0x201   : > { %640 = vmatpush.bf16.msra.mxu1 %v6792_v12  ;;  %657 = vmatpush.bf16.msra.mxu2 %v6792_v12 }
 0x202   : > { %484 = vmatpush.bf16.msra.mxu0 %v2827_v8  ;;  %674 = vmatpush.bf16.msra.mxu3 %v6792_v12  ;;  %v6810_v8 = vor.u32 %v8377_v17, %v8376_v16 }
 0x205   : > { %641 = vmatpush.bf16.msra.mxu1 %v6801_v10  ;;  %658 = vmatpush.bf16.msra.mxu2 %v6801_v10 }
 0x206   : > { %485 = vmatpush.bf16.msra.mxu0 %v2823_v6  ;;  %675 = vmatpush.bf16.msra.mxu3 %v6801_v10  ;;  %v414_v6 = vpack.c.bf16 %v387_v3, %v386_v2  ;;  %v6872_v2 = vperm.slane %v6564_v63, 0 }
 0x209   : > { %642 = vmatpush.bf16.msra.mxu1 %v6810_v8  ;;  %659 = vmatpush.bf16.msra.mxu2 %v6810_v8 }
 0x20a   : > { %486 = vmatpush.bf16.msra.mxu0 %v2819_v4  ;;  %676 = vmatpush.bf16.msra.mxu3 %v6810_v8 }
 0x20c   : > { %643 = vmatmul.bf16.vlgmr.msra.gmra.mxu1 %v586_v5 }
 0x20d   : > { %686 = vmatpush.bf16.msrb.mxu1 %v6749_v32  ;;  %703 = vmatpush.bf16.msrb.mxu2 %v6749_v32 }
 0x20e   : > { %487 = vmatmul.bf16.vlgmr.msra.gmra.mxu0 %v414_v6  ;;  %720 = vmatpush.bf16.msrb.mxu3 %v6749_v32 }
 0x20f   : > { %992 = vmatpush.bf16.msrb.mxu0 %v6749_v32 }
 0x211   : > { %687 = vmatpush.bf16.msrb.mxu1 %v6756_v60  ;;  %704 = vmatpush.bf16.msrb.mxu2 %v6756_v60 }
 0x212   : > { %721 = vmatpush.bf16.msrb.mxu3 %v6756_v60 }
 0x213   : > { %993 = vmatpush.bf16.msrb.mxu0 %v6756_v60 }
 0x215   : > { %688 = vmatpush.bf16.msrb.mxu1 %v6765_v37  ;;  %705 = vmatpush.bf16.msrb.mxu2 %v6765_v37 }
 0x216   : > { %722 = vmatpush.bf16.msrb.mxu3 %v6765_v37 }
 0x217   : > { %994 = vmatpush.bf16.msrb.mxu0 %v6765_v37 }
 0x219   : > { %689 = vmatpush.bf16.msrb.mxu1 %v6774_v49  ;;  %706 = vmatpush.bf16.msrb.mxu2 %v6774_v49 }
 0x21a   : > { %723 = vmatpush.bf16.msrb.mxu3 %v6774_v49 }
 0x21b   : > { %995 = vmatpush.bf16.msrb.mxu0 %v6774_v49 }
 0x21d   : > { %690 = vmatpush.bf16.msrb.mxu1 %v6783_v61  ;;  %707 = vmatpush.bf16.msrb.mxu2 %v6783_v61 }
 0x21e   : > { %724 = vmatpush.bf16.msrb.mxu3 %v6783_v61 }
 0x21f   : > { %996 = vmatpush.bf16.msrb.mxu0 %v6783_v61 }
 0x221   : > { %691 = vmatpush.bf16.msrb.mxu1 %v6792_v12  ;;  %708 = vmatpush.bf16.msrb.mxu2 %v6792_v12 }
 0x222   : > { %725 = vmatpush.bf16.msrb.mxu3 %v6792_v12 }
 0x223   : > { %997 = vmatpush.bf16.msrb.mxu0 %v6792_v12 }
 0x225   : > { %692 = vmatpush.bf16.msrb.mxu1 %v6801_v10  ;;  %709 = vmatpush.bf16.msrb.mxu2 %v6801_v10 }
 0x226   : > { %726 = vmatpush.bf16.msrb.mxu3 %v6801_v10 }
 0x227   : > { %998 = vmatpush.bf16.msrb.mxu0 %v6801_v10 }
 0x229   : > { %693 = vmatpush.bf16.msrb.mxu1 %v6810_v8  ;;  %710 = vmatpush.bf16.msrb.mxu2 %v6810_v8 }
 0x22a   : > { %727 = vmatpush.bf16.msrb.mxu3 %v6810_v8 }
 0x22b   : > { %999 = vmatpush.bf16.msrb.mxu0 %v6810_v8 }
 0x22d   : > { %737 = vmatpush.bf16.msra.mxu1 %v6749_v32 }
 0x22f   : > { %1060 = vmatpush.bf16.msra.mxu0 %v6749_v32 }
 0x231   : > { %738 = vmatpush.bf16.msra.mxu1 %v6756_v60 }
 0x233   : > { %1061 = vmatpush.bf16.msra.mxu0 %v6756_v60 }
 0x235   : > { %739 = vmatpush.bf16.msra.mxu1 %v6765_v37 }
 0x237   : > { %1062 = vmatpush.bf16.msra.mxu0 %v6765_v37 }
 0x239   : > { %740 = vmatpush.bf16.msra.mxu1 %v6774_v49 }
 0x23b   : > { %1063 = vmatpush.bf16.msra.mxu0 %v6774_v49 }
 0x23d   : > { %741 = vmatpush.bf16.msra.mxu1 %v6783_v61 }
 0x23f   : > { %1064 = vmatpush.bf16.msra.mxu0 %v6783_v61 }
 0x241   : > { %742 = vmatpush.bf16.msra.mxu1 %v6792_v12 }
 0x243   : > { %1065 = vmatpush.bf16.msra.mxu0 %v6792_v12 }
 0x245   : > { %743 = vmatpush.bf16.msra.mxu1 %v6801_v10 }
 0x247   : > { %1066 = vmatpush.bf16.msra.mxu0 %v6801_v10 }
 0x249   : > { %744 = vmatpush.bf16.msra.mxu1 %v6810_v8 }
 0x24b   : > { %1067 = vmatpush.bf16.msra.mxu0 %v6810_v8 }
 0x289   : > { %v644_v4 = vpop.f32.mrf.mxu1 }
 0x28b   : > { %v488_v3 = vpop.f32.mrf.mxu0 }
 0x28c   : > { %v489_v5 = vadd.f32 %v488_v3, %v6872_v2 }
 0x28e   : > { %v649_v35 = vadd.f32 %v644_v4, %v489_v5 }
 0x290   : > { %v650_v6 = vmax.f32 %v649_v35, 0.0 }
 0x291   : > { %v646_v1 = vpop.f32.mrf.mxu1 }
 0x292   : > { %v651_v0 = vpack.c.bf16 %v650_v6, %v650_v6  ;;  %v389_v1 = vld [vmem:[%s7897_s9 + $0x18] sm:$0xff] }
 0x293   : > { %v490_v4 = vpop.f32.mrf.mxu0 }
 0x294   : > { %660 = vmatmul.bf16.vlgmr.msra.gmra.mxu2 %v651_v0  ;;  %v388_v0 = vld [vmem:[%s7897_s9 + $0x10] sm:$0xff]  ;;  %v491_v5 = vadd.f32 %v490_v4, %v6872_v2 }
 0x295   : > { %754 = vmatpush.bf16.msra.mxu2 %v6749_v32  ;;  %v415_v3 = vpack.c.bf16 %v389_v1, %v388_v0 }
 0x297   : > { %492 = vmatmul.bf16.gmra.mxu0 %v415_v3 }
 0x299   : > { %755 = vmatpush.bf16.msra.mxu2 %v6756_v60 }
 0x29d   : > { %756 = vmatpush.bf16.msra.mxu2 %v6765_v37 }
 0x2a1   : > { %757 = vmatpush.bf16.msra.mxu2 %v6774_v49 }
 0x2a5   : > { %758 = vmatpush.bf16.msra.mxu2 %v6783_v61 }
 0x2a9   : > { %759 = vmatpush.bf16.msra.mxu2 %v6792_v12 }
 0x2ad   : > { %760 = vmatpush.bf16.msra.mxu2 %v6801_v10 }
 0x2b1   : > { %761 = vmatpush.bf16.msra.mxu2 %v6810_v8 }
 0x314   : > { %v493_v0 = vpop.f32.mrf.mxu0 }
 0x317   : > { %v661_v35 = vpop.f32.mrf.mxu2 }
 0x318   : > { %v666_v6 = vadd.f32 %v661_v35, %v491_v5  ;;  %v390_v5 = vld [vmem:[%s7897_s9 + $0x20] sm:$0xff]  ;;  %v391_v35 = vld [vmem:[%s7897_s9 + $0x28] sm:$0xff] }
 0x31a   : > { %v667_v7 = vmax.f32 %v666_v6, 0.0  ;;  %v416_v6 = vpack.c.bf16 %v391_v35, %v390_v5  ;;  %v392_v5 = vld [vmem:[%s7897_s9 + $0x30] sm:$0xff]  ;;  %v393_v35 = vld [vmem:[%s7897_s9 + $0x38] sm:$0xff] }
 0x31c   : > { %v668_v9 = vpack.c.bf16 %v667_v7, %v667_v7  ;;  %v494_v7 = vadd.f32 %v493_v0, %v6872_v2  ;;  %497 = vmatmul.bf16.gmra.mxu0 %v416_v6  ;;  %v495_v0 = vpop.f32.mrf.mxu0  ;;  %v417_v6 = vpack.c.bf16 %v393_v35, %v392_v5 }
 0x31e   : > { %677 = vmatmul.bf16.vlgmr.msra.gmra.mxu3 %v668_v9 }
 0x31f   : > { %v663_v11 = vpop.f32.mrf.mxu2  ;;  %771 = vmatpush.bf16.msra.mxu3 %v6749_v32 }
 0x323   : > { %772 = vmatpush.bf16.msra.mxu3 %v6756_v60 }
 0x327   : > { %773 = vmatpush.bf16.msra.mxu3 %v6765_v37 }
 0x32b   : > { %774 = vmatpush.bf16.msra.mxu3 %v6774_v49 }
 0x32c   : > { %502 = vmatmul.bf16.gmra.mxu0 %v417_v6 }
 0x32f   : > { %775 = vmatpush.bf16.msra.mxu3 %v6783_v61 }
 0x333   : > { %776 = vmatpush.bf16.msra.mxu3 %v6792_v12 }
 0x337   : > { %777 = vmatpush.bf16.msra.mxu3 %v6801_v10 }
 0x33b   : > { %778 = vmatpush.bf16.msra.mxu3 %v6810_v8 }
 0x3a1   : > { %v678_v9 = vpop.f32.mrf.mxu3 }
 0x3a2   : > { %v683_v11 = vadd.f32 %v678_v9, %v494_v7  ;;  %v496_v7 = vadd.f32 %v495_v0, %v6872_v2  ;;  %v498_v0 = vpop.f32.mrf.mxu0 }
 0x3a4   : > { %v684_v1 = vmax.f32 %v683_v11, 0.0 }
 0x3a6   : > { %v685_v3 = vpack.c.bf16 %v684_v1, %v684_v1 }
 0x3a8   : > { %694 = vmatmul.bf16.vlgmr.msrb.gmra.mxu1 %v685_v3 }
 0x3a9   : > { %v680_v4 = vpop.f32.mrf.mxu3  ;;  %788 = vmatpush.bf16.msrb.mxu1 %v6749_v32 }
 0x3aa   : > { %v500_v5 = vpop.f32.mrf.mxu0 }
 0x3ab   : > { %v501_v35 = vadd.f32 %v500_v5, %v6872_v2 }
 0x3ad   : > { %789 = vmatpush.bf16.msrb.mxu1 %v6756_v60 }
 0x3b1   : > { %790 = vmatpush.bf16.msrb.mxu1 %v6765_v37 }
 0x3b5   : > { %791 = vmatpush.bf16.msrb.mxu1 %v6774_v49 }
 0x3b9   : > { %792 = vmatpush.bf16.msrb.mxu1 %v6783_v61 }
 0x3bd   : > { %793 = vmatpush.bf16.msrb.mxu1 %v6792_v12 }
 0x3c1   : > { %794 = vmatpush.bf16.msrb.mxu1 %v6801_v10 }
 0x3c5   : > { %795 = vmatpush.bf16.msrb.mxu1 %v6810_v8 }
 0x425   : > { %v695_v9 = vpop.f32.mrf.mxu1 }
 0x426   : > { %v700_v11 = vadd.f32 %v695_v9, %v496_v7  ;;  %v499_v7 = vadd.f32 %v498_v0, %v6872_v2 }
 0x428   : > { %v701_v1 = vmax.f32 %v700_v11, 0.0 }
 0x42a   : > { %v702_v3 = vpack.c.bf16 %v701_v1, %v701_v1 }
 0x42c   : > { %711 = vmatmul.bf16.vlgmr.msrb.gmra.mxu2 %v702_v3 }
 0x42d   : > { %v697_v4 = vpop.f32.mrf.mxu1  ;;  %805 = vmatpush.bf16.msrb.mxu2 %v6749_v32 }
 0x431   : > { %806 = vmatpush.bf16.msrb.mxu2 %v6756_v60 }
 0x435   : > { %807 = vmatpush.bf16.msrb.mxu2 %v6765_v37 }
 0x439   : > { %808 = vmatpush.bf16.msrb.mxu2 %v6774_v49 }
 0x43d   : > { %809 = vmatpush.bf16.msrb.mxu2 %v6783_v61 }
 0x441   : > { %810 = vmatpush.bf16.msrb.mxu2 %v6792_v12 }
 0x445   : > { %811 = vmatpush.bf16.msrb.mxu2 %v6801_v10 }
 0x449   : > { %812 = vmatpush.bf16.msrb.mxu2 %v6810_v8 }
 0x4af   : > { %v712_v9 = vpop.f32.mrf.mxu2 }
 0x4b0   : > { %v717_v11 = vadd.f32 %v712_v9, %v499_v7 }
 0x4b2   : > { %v718_v1 = vmax.f32 %v717_v11, 0.0 }
 0x4b4   : > { %v719_v3 = vpack.c.bf16 %v718_v1, %v718_v1  ;;  %v503_v1 = vpop.f32.mrf.mxu0 }
 0x4b6   : > { %728 = vmatmul.bf16.vlgmr.msrb.gmra.mxu3 %v719_v3  ;;  %v504_v3 = vadd.f32 %v503_v1, %v6872_v2 }
 0x4b7   : > { %v714_v4 = vpop.f32.mrf.mxu2  ;;  %822 = vmatpush.bf16.msrb.mxu3 %v6749_v32 }
 0x4bb   : > { %823 = vmatpush.bf16.msrb.mxu3 %v6756_v60 }
 0x4bc   : > { %v505_v1 = vpop.f32.mrf.mxu0 }
 0x4bf   : > { %824 = vmatpush.bf16.msrb.mxu3 %v6765_v37 }
 0x4c3   : > { %825 = vmatpush.bf16.msrb.mxu3 %v6774_v49 }
 0x4c7   : > { %826 = vmatpush.bf16.msrb.mxu3 %v6783_v61 }
 0x4cb   : > { %827 = vmatpush.bf16.msrb.mxu3 %v6792_v12 }
 0x4cf   : > { %828 = vmatpush.bf16.msrb.mxu3 %v6801_v10 }
 0x4d3   : > { %829 = vmatpush.bf16.msrb.mxu3 %v6810_v8 }
 0x539   : > { %v729_v6 = vpop.f32.mrf.mxu3 }
 0x53a   : > { %v734_v0 = vadd.f32 %v729_v6, %v501_v35 }
 0x53c   : > { %v735_v7 = vmax.f32 %v734_v0, 0.0 }
 0x53e   : > { %v736_v9 = vpack.c.bf16 %v735_v7, %v735_v7  ;;  %v394_v7 = vld [vmem:[%s7897_s9 + $0x40] sm:$0xff] }
 0x540   : > { %745 = vmatmul.bf16.vlgmr.msra.gmra.mxu1 %v736_v9  ;;  %v395_v9 = vld [vmem:[%s7897_s9 + $0x48] sm:$0xff] }
 0x541   : > { %v731_v11 = vpop.f32.mrf.mxu3  ;;  %839 = vmatpush.bf16.msra.mxu1 %v6749_v32 }
 0x542   : > { %v418_v11 = vpack.c.bf16 %v395_v9, %v394_v7 }
 0x544   : > { %507 = vmatmul.bf16.gmra.mxu0 %v418_v11 }
 0x545   : > { %840 = vmatpush.bf16.msra.mxu1 %v6756_v60 }
 0x549   : > { %841 = vmatpush.bf16.msra.mxu1 %v6765_v37 }
 0x54d   : > { %842 = vmatpush.bf16.msra.mxu1 %v6774_v49 }
 0x551   : > { %843 = vmatpush.bf16.msra.mxu1 %v6783_v61 }
 0x555   : > { %844 = vmatpush.bf16.msra.mxu1 %v6792_v12 }
 0x559   : > { %845 = vmatpush.bf16.msra.mxu1 %v6801_v10 }
 0x55d   : > { %846 = vmatpush.bf16.msra.mxu1 %v6810_v8 }
 0x5bd   : > { %v746_v4 = vpop.f32.mrf.mxu1 }
 0x5be   : > { %v751_v5 = vadd.f32 %v746_v4, %v504_v3  ;;  %v506_v3 = vadd.f32 %v505_v1, %v6872_v2 }
 0x5c0   : > { %v752_v35 = vmax.f32 %v751_v5, 0.0 }
 0x5c1   : > { %v508_v7 = vpop.f32.mrf.mxu0 }
 0x5c2   : > { %v753_v6 = vpack.c.bf16 %v752_v35, %v752_v35  ;;  %v509_v9 = vadd.f32 %v508_v7, %v6872_v2 }
 0x5c4   : > { %762 = vmatmul.bf16.vlgmr.msra.gmra.mxu2 %v753_v6 }
 0x5c5   : > { %v748_v0 = vpop.f32.mrf.mxu1  ;;  %856 = vmatpush.bf16.msra.mxu2 %v6749_v32 }
 0x5c9   : > { %857 = vmatpush.bf16.msra.mxu2 %v6756_v60  ;;  %v510_v7 = vpop.f32.mrf.mxu0 }
 0x5cd   : > { %858 = vmatpush.bf16.msra.mxu2 %v6765_v37 }
 0x5d1   : > { %859 = vmatpush.bf16.msra.mxu2 %v6774_v49 }
 0x5d5   : > { %860 = vmatpush.bf16.msra.mxu2 %v6783_v61 }
 0x5d9   : > { %861 = vmatpush.bf16.msra.mxu2 %v6792_v12 }
 0x5dd   : > { %862 = vmatpush.bf16.msra.mxu2 %v6801_v10 }
 0x5e1   : > { %863 = vmatpush.bf16.msra.mxu2 %v6810_v8 }
 0x647   : > { %v763_v4 = vpop.f32.mrf.mxu2 }
 0x648   : > { %v768_v5 = vadd.f32 %v763_v4, %v506_v3 }
 0x64a   : > { %v769_v35 = vmax.f32 %v768_v5, 0.0 }
 0x64c   : > { %v770_v6 = vpack.c.bf16 %v769_v35, %v769_v35  ;;  %v396_v35 = vld [vmem:[%s7897_s9 + $0x50] sm:$0xff] }
 0x64e   : > { %779 = vmatmul.bf16.vlgmr.msra.gmra.mxu3 %v770_v6  ;;  %v397_v6 = vld [vmem:[%s7897_s9 + $0x58] sm:$0xff] }
 0x64f   : > { %v765_v0 = vpop.f32.mrf.mxu2  ;;  %873 = vmatpush.bf16.msra.mxu3 %v6749_v32 }
 0x650   : > { %v419_v0 = vpack.c.bf16 %v397_v6, %v396_v35  ;;  %v398_v35 = vld [vmem:[%s7897_s9 + $0x60] sm:$0xff]  ;;  %v399_v6 = vld [vmem:[%s7897_s9 + $0x68] sm:$0xff] }
 0x652   : > { %512 = vmatmul.bf16.gmra.mxu0 %v419_v0  ;;  %v420_v0 = vpack.c.bf16 %v399_v6, %v398_v35 }
 0x653   : > { %874 = vmatpush.bf16.msra.mxu3 %v6756_v60 }
 0x657   : > { %875 = vmatpush.bf16.msra.mxu3 %v6765_v37 }
 0x65b   : > { %876 = vmatpush.bf16.msra.mxu3 %v6774_v49 }
 0x65f   : > { %877 = vmatpush.bf16.msra.mxu3 %v6783_v61 }
 0x662   : > { %517 = vmatmul.bf16.gmra.mxu0 %v420_v0 }
 0x663   : > { %878 = vmatpush.bf16.msra.mxu3 %v6792_v12 }
 0x667   : > { %879 = vmatpush.bf16.msra.mxu3 %v6801_v10 }
 0x66b   : > { %880 = vmatpush.bf16.msra.mxu3 %v6810_v8 }
 0x6d1   : > { %v780_v11 = vpop.f32.mrf.mxu3 }
 0x6d2   : > { %v785_v1 = vadd.f32 %v780_v11, %v509_v9  ;;  %v511_v9 = vadd.f32 %v510_v7, %v6872_v2  ;;  %v513_v7 = vpop.f32.mrf.mxu0 }
 0x6d4   : > { %v786_v3 = vmax.f32 %v785_v1, 0.0 }
 0x6d6   : > { %v787_v4 = vpack.c.bf16 %v786_v3, %v786_v3 }
 0x6d8   : > { %796 = vmatmul.bf16.vlgmr.msrb.gmra.mxu1 %v787_v4 }
 0x6d9   : > { %v782_v5 = vpop.f32.mrf.mxu3  ;;  %890 = vmatpush.bf16.msrb.mxu1 %v6749_v32 }
 0x6da   : > { %v515_v35 = vpop.f32.mrf.mxu0 }
 0x6db   : > { %v516_v6 = vadd.f32 %v515_v35, %v6872_v2 }
 0x6dd   : > { %891 = vmatpush.bf16.msrb.mxu1 %v6756_v60 }
 0x6e1   : > { %892 = vmatpush.bf16.msrb.mxu1 %v6765_v37 }
 0x6e5   : > { %893 = vmatpush.bf16.msrb.mxu1 %v6774_v49 }
 0x6e9   : > { %894 = vmatpush.bf16.msrb.mxu1 %v6783_v61 }
 0x6ed   : > { %895 = vmatpush.bf16.msrb.mxu1 %v6792_v12 }
 0x6f1   : > { %896 = vmatpush.bf16.msrb.mxu1 %v6801_v10 }
 0x6f5   : > { %897 = vmatpush.bf16.msrb.mxu1 %v6810_v8 }
 0x755   : > { %v797_v11 = vpop.f32.mrf.mxu1 }
 0x756   : > { %v802_v1 = vadd.f32 %v797_v11, %v511_v9  ;;  %v514_v9 = vadd.f32 %v513_v7, %v6872_v2 }
 0x758   : > { %v803_v3 = vmax.f32 %v802_v1, 0.0 }
 0x75a   : > { %v804_v4 = vpack.c.bf16 %v803_v3, %v803_v3 }
 0x75c   : > { %813 = vmatmul.bf16.vlgmr.msrb.gmra.mxu2 %v804_v4 }
 0x75d   : > { %v799_v5 = vpop.f32.mrf.mxu1  ;;  %907 = vmatpush.bf16.msrb.mxu2 %v6749_v32 }
 0x761   : > { %908 = vmatpush.bf16.msrb.mxu2 %v6756_v60 }
 0x765   : > { %909 = vmatpush.bf16.msrb.mxu2 %v6765_v37 }
 0x769   : > { %910 = vmatpush.bf16.msrb.mxu2 %v6774_v49 }
 0x76d   : > { %911 = vmatpush.bf16.msrb.mxu2 %v6783_v61 }
 0x771   : > { %912 = vmatpush.bf16.msrb.mxu2 %v6792_v12 }
 0x775   : > { %913 = vmatpush.bf16.msrb.mxu2 %v6801_v10 }
 0x779   : > { %914 = vmatpush.bf16.msrb.mxu2 %v6810_v8 }
 0x7df   : > { %v814_v11 = vpop.f32.mrf.mxu2 }
 0x7e0   : > { %v819_v1 = vadd.f32 %v814_v11, %v514_v9 }
 0x7e2   : > { %v820_v3 = vmax.f32 %v819_v1, 0.0 }
 0x7e4   : > { %v821_v4 = vpack.c.bf16 %v820_v3, %v820_v3  ;;  %v518_v3 = vpop.f32.mrf.mxu0 }
 0x7e6   : > { %830 = vmatmul.bf16.vlgmr.msrb.gmra.mxu3 %v821_v4  ;;  %v519_v4 = vadd.f32 %v518_v3, %v6872_v2 }
 0x7e7   : > { %v816_v5 = vpop.f32.mrf.mxu2  ;;  %924 = vmatpush.bf16.msrb.mxu3 %v6749_v32 }
 0x7eb   : > { %925 = vmatpush.bf16.msrb.mxu3 %v6756_v60 }
 0x7ec   : > { %v520_v3 = vpop.f32.mrf.mxu0 }
 0x7ef   : > { %926 = vmatpush.bf16.msrb.mxu3 %v6765_v37 }
 0x7f3   : > { %927 = vmatpush.bf16.msrb.mxu3 %v6774_v49 }
 0x7f7   : > { %928 = vmatpush.bf16.msrb.mxu3 %v6783_v61 }
 0x7fb   : > { %929 = vmatpush.bf16.msrb.mxu3 %v6792_v12 }
 0x7ff   : > { %930 = vmatpush.bf16.msrb.mxu3 %v6801_v10 }
 0x803   : > { %931 = vmatpush.bf16.msrb.mxu3 %v6810_v8 }
 0x869   : > { %v831_v0 = vpop.f32.mrf.mxu3 }
 0x86a   : > { %v836_v7 = vadd.f32 %v831_v0, %v516_v6 }
 0x86c   : > { %v837_v9 = vmax.f32 %v836_v7, 0.0 }
 0x86e   : > { %v838_v11 = vpack.c.bf16 %v837_v9, %v837_v9  ;;  %v400_v9 = vld [vmem:[%s7897_s9 + $0x70] sm:$0xff] }
 0x870   : > { %847 = vmatmul.bf16.vlgmr.msra.gmra.mxu1 %v838_v11  ;;  %v401_v11 = vld [vmem:[%s7897_s9 + $0x78] sm:$0xff] }
 0x871   : > { %v833_v1 = vpop.f32.mrf.mxu3  ;;  %941 = vmatpush.bf16.msra.mxu1 %v6749_v32 }
 0x872   : > { %v421_v1 = vpack.c.bf16 %v401_v11, %v400_v9 }
 0x874   : > { %522 = vmatmul.bf16.gmra.mxu0 %v421_v1 }
 0x875   : > { %942 = vmatpush.bf16.msra.mxu1 %v6756_v60 }
 0x879   : > { %943 = vmatpush.bf16.msra.mxu1 %v6765_v37 }
 0x87d   : > { %944 = vmatpush.bf16.msra.mxu1 %v6774_v49 }
 0x881   : > { %945 = vmatpush.bf16.msra.mxu1 %v6783_v61 }
 0x885   : > { %946 = vmatpush.bf16.msra.mxu1 %v6792_v12 }
 0x889   : > { %947 = vmatpush.bf16.msra.mxu1 %v6801_v10 }
 0x88d   : > { %948 = vmatpush.bf16.msra.mxu1 %v6810_v8 }
 0x8ed   : > { %v848_v5 = vpop.f32.mrf.mxu1 }
 0x8ee   : > { %v853_v35 = vadd.f32 %v848_v5, %v519_v4  ;;  %v521_v4 = vadd.f32 %v520_v3, %v6872_v2 }
 0x8f0   : > { %v854_v6 = vmax.f32 %v853_v35, 0.0 }
 0x8f1   : > { %v523_v9 = vpop.f32.mrf.mxu0 }
 0x8f2   : > { %v855_v0 = vpack.c.bf16 %v854_v6, %v854_v6  ;;  %v524_v11 = vadd.f32 %v523_v9, %v6872_v2 }
 0x8f4   : > { %864 = vmatmul.bf16.vlgmr.msra.gmra.mxu2 %v855_v0 }
 0x8f5   : > { %v850_v7 = vpop.f32.mrf.mxu1  ;;  %958 = vmatpush.bf16.msra.mxu2 %v6749_v32 }
 0x8f9   : > { %959 = vmatpush.bf16.msra.mxu2 %v6756_v60  ;;  %v525_v9 = vpop.f32.mrf.mxu0 }
 0x8fd   : > { %960 = vmatpush.bf16.msra.mxu2 %v6765_v37 }
 0x901   : > { %961 = vmatpush.bf16.msra.mxu2 %v6774_v49 }
 0x905   : > { %962 = vmatpush.bf16.msra.mxu2 %v6783_v61 }
 0x909   : > { %963 = vmatpush.bf16.msra.mxu2 %v6792_v12 }
 0x90d   : > { %964 = vmatpush.bf16.msra.mxu2 %v6801_v10 }
 0x911   : > { %965 = vmatpush.bf16.msra.mxu2 %v6810_v8 }
 0x977   : > { %v865_v5 = vpop.f32.mrf.mxu2 }
 0x978   : > { %v870_v35 = vadd.f32 %v865_v5, %v521_v4 }
 0x97a   : > { %v871_v6 = vmax.f32 %v870_v35, 0.0 }
 0x97c   : > { %v872_v0 = vpack.c.bf16 %v871_v6, %v871_v6  ;;  %v402_v6 = vld [vmem:[%s7897_s9 + $0x80] sm:$0xff] }
 0x97e   : > { %881 = vmatmul.bf16.vlgmr.msra.gmra.mxu3 %v872_v0  ;;  %v403_v0 = vld [vmem:[%s7897_s9 + $0x88] sm:$0xff] }
 0x97f   : > { %v867_v7 = vpop.f32.mrf.mxu2  ;;  %975 = vmatpush.bf16.msra.mxu3 %v6749_v32 }
 0x980   : > { %v422_v7 = vpack.c.bf16 %v403_v0, %v402_v6  ;;  %v404_v6 = vld [vmem:[%s7897_s9 + $0x90] sm:$0xff]  ;;  %v405_v0 = vld [vmem:[%s7897_s9 + $0x98] sm:$0xff] }
 0x982   : > { %527 = vmatmul.bf16.gmra.mxu0 %v422_v7  ;;  %v423_v7 = vpack.c.bf16 %v405_v0, %v404_v6 }
 0x983   : > { %976 = vmatpush.bf16.msra.mxu3 %v6756_v60 }
 0x987   : > { %977 = vmatpush.bf16.msra.mxu3 %v6765_v37 }
 0x98b   : > { %978 = vmatpush.bf16.msra.mxu3 %v6774_v49 }
 0x98f   : > { %979 = vmatpush.bf16.msra.mxu3 %v6783_v61 }
 0x992   : > { %532 = vmatmul.bf16.gmra.mxu0 %v423_v7 }
 0x993   : > { %980 = vmatpush.bf16.msra.mxu3 %v6792_v12 }
 0x997   : > { %981 = vmatpush.bf16.msra.mxu3 %v6801_v10 }
 0x99b   : > { %982 = vmatpush.bf16.msra.mxu3 %v6810_v8 }
 0xa01   : > { %v882_v1 = vpop.f32.mrf.mxu3 }
 0xa02   : > { %v887_v3 = vadd.f32 %v882_v1, %v524_v11  ;;  %v526_v11 = vadd.f32 %v525_v9, %v6872_v2  ;;  %v528_v9 = vpop.f32.mrf.mxu0 }
 0xa04   : > { %v888_v4 = vmax.f32 %v887_v3, 0.0 }
 0xa06   : > { %v889_v5 = vpack.c.bf16 %v888_v4, %v888_v4 }
 0xa08   : > { %898 = vmatmul.bf16.vlgmr.msrb.gmra.mxu1 %v889_v5 }
 0xa09   : > { %v884_v35 = vpop.f32.mrf.mxu3  ;;  %1009 = vmatpush.bf16.msrb.mxu1 %v6749_v32 }
 0xa0a   : > { %v530_v6 = vpop.f32.mrf.mxu0 }
 0xa0b   : > { %v531_v0 = vadd.f32 %v530_v6, %v6872_v2 }
 0xa0d   : > { %1010 = vmatpush.bf16.msrb.mxu1 %v6756_v60 }
 0xa11   : > { %1011 = vmatpush.bf16.msrb.mxu1 %v6765_v37 }
 0xa15   : > { %1012 = vmatpush.bf16.msrb.mxu1 %v6774_v49 }
 0xa19   : > { %1013 = vmatpush.bf16.msrb.mxu1 %v6783_v61 }
 0xa1d   : > { %1014 = vmatpush.bf16.msrb.mxu1 %v6792_v12 }
 0xa21   : > { %1015 = vmatpush.bf16.msrb.mxu1 %v6801_v10 }
 0xa25   : > { %1016 = vmatpush.bf16.msrb.mxu1 %v6810_v8 }
 0xa85   : > { %v899_v1 = vpop.f32.mrf.mxu1 }
 0xa86   : > { %v904_v3 = vadd.f32 %v899_v1, %v526_v11  ;;  %v529_v11 = vadd.f32 %v528_v9, %v6872_v2 }
 0xa88   : > { %v905_v4 = vmax.f32 %v904_v3, 0.0 }
 0xa8a   : > { %v906_v5 = vpack.c.bf16 %v905_v4, %v905_v4 }
 0xa8c   : > { %915 = vmatmul.bf16.vlgmr.msrb.gmra.mxu2 %v906_v5 }
 0xa8d   : > { %v901_v35 = vpop.f32.mrf.mxu1  ;;  %1026 = vmatpush.bf16.msrb.mxu2 %v6749_v32 }
 0xa91   : > { %1027 = vmatpush.bf16.msrb.mxu2 %v6756_v60 }
 0xa95   : > { %1028 = vmatpush.bf16.msrb.mxu2 %v6765_v37 }
 0xa99   : > { %1029 = vmatpush.bf16.msrb.mxu2 %v6774_v49 }
 0xa9d   : > { %1030 = vmatpush.bf16.msrb.mxu2 %v6783_v61 }
 0xaa1   : > { %1031 = vmatpush.bf16.msrb.mxu2 %v6792_v12 }
 0xaa5   : > { %1032 = vmatpush.bf16.msrb.mxu2 %v6801_v10 }
 0xaa9   : > { %1033 = vmatpush.bf16.msrb.mxu2 %v6810_v8 }
 0xb0f   : > { %v916_v1 = vpop.f32.mrf.mxu2 }
 0xb10   : > { %v921_v3 = vadd.f32 %v916_v1, %v529_v11 }
 0xb12   : > { %v922_v4 = vmax.f32 %v921_v3, 0.0 }
 0xb14   : > { %v923_v5 = vpack.c.bf16 %v922_v4, %v922_v4  ;;  %v533_v4 = vpop.f32.mrf.mxu0 }
 0xb16   : > { %932 = vmatmul.bf16.vlgmr.msrb.gmra.mxu3 %v923_v5  ;;  %v534_v5 = vadd.f32 %v533_v4, %v6872_v2 }
 0xb17   : > { %v918_v35 = vpop.f32.mrf.mxu2  ;;  %1043 = vmatpush.bf16.msrb.mxu3 %v6749_v32 }
 0xb1b   : > { %1044 = vmatpush.bf16.msrb.mxu3 %v6756_v60 }
 0xb1f   : > { %1045 = vmatpush.bf16.msrb.mxu3 %v6765_v37 }
 0xb23   : > { %1046 = vmatpush.bf16.msrb.mxu3 %v6774_v49 }
 0xb27   : > { %1047 = vmatpush.bf16.msrb.mxu3 %v6783_v61 }
 0xb2b   : > { %1048 = vmatpush.bf16.msrb.mxu3 %v6792_v12 }
 0xb2f   : > { %1049 = vmatpush.bf16.msrb.mxu3 %v6801_v10 }
 0xb33   : > { %1050 = vmatpush.bf16.msrb.mxu3 %v6810_v8 }
 0xb99   : > { %v933_v7 = vpop.f32.mrf.mxu3 }
 0xb9a   : > { %v938_v9 = vadd.f32 %v933_v7, %v531_v0 }
 0xb9c   : > { %v939_v11 = vmax.f32 %v938_v9, 0.0 }
 0xb9e   : > { %v940_v1 = vpack.c.bf16 %v939_v11, %v939_v11  ;;  %v406_v11 = vld [vmem:[%s7897_s9 + $0xa0] sm:$0xff] }
 0xba0   : > { %949 = vmatmul.bf16.vlgmr.msra.gmra.mxu1 %v940_v1 }
 0xba1   : > { %v935_v3 = vpop.f32.mrf.mxu3  ;;  %1077 = vmatpush.bf16.msra.mxu1 %v6749_v32 }
 0xba5   : > { %1078 = vmatpush.bf16.msra.mxu1 %v6756_v60 }
 0xba9   : > { %1079 = vmatpush.bf16.msra.mxu1 %v6765_v37 }
 0xbad   : > { %1080 = vmatpush.bf16.msra.mxu1 %v6774_v49 }
 0xbb1   : > { %1081 = vmatpush.bf16.msra.mxu1 %v6783_v61 }
 0xbb5   : > { %1082 = vmatpush.bf16.msra.mxu1 %v6792_v12 }
 0xbb9   : > { %1083 = vmatpush.bf16.msra.mxu1 %v6801_v10 }
 0xbbd   : > { %1084 = vmatpush.bf16.msra.mxu1 %v6810_v8 }
 0xc1d   : > { %v950_v35 = vpop.f32.mrf.mxu1 }
 0xc1e   : > { %v955_v6 = vadd.f32 %v950_v35, %v534_v5 }
 0xc20   : > { %v956_v0 = vmax.f32 %v955_v6, 0.0 }
 0xc22   : > { %v957_v7 = vpack.c.bf16 %v956_v0, %v956_v0 }
 0xc24   : > { %966 = vmatmul.bf16.vlgmr.msra.gmra.mxu2 %v957_v7  ;;  %v412_v7 = vld [vmem:[%s7897_s9 + $0xd0] sm:$0xff] }
 0xc25   : > { %v952_v9 = vpop.f32.mrf.mxu1  ;;  %1094 = vmatpush.bf16.msra.mxu2 %v6749_v32  ;;  %v407_v32 = vld [vmem:[%s7897_s9 + $0xa8] sm:$0xff] }
 0xc26   : > { %v413_v9 = vld [vmem:[%s7897_s9 + $0xd8] sm:$0xff] }
 0xc29   : > { %1095 = vmatpush.bf16.msra.mxu2 %v6756_v60  ;;  %v424_v60 = vpack.c.bf16 %v407_v32, %v406_v11  ;;  %v427_v11 = vpack.c.bf16 %v413_v9, %v412_v7 }
 0xc2b   : > { %537 = vmatmul.bf16.gmra.mxu0 %v424_v60 }
 0xc2d   : > { %1096 = vmatpush.bf16.msra.mxu2 %v6765_v37  ;;  %v408_v37 = vld [vmem:[%s7897_s9 + $0xb0] sm:$0xff] }
 0xc31   : > { %1097 = vmatpush.bf16.msra.mxu2 %v6774_v49  ;;  %v409_v49 = vld [vmem:[%s7897_s9 + $0xb8] sm:$0xff] }
 0xc35   : > { %1098 = vmatpush.bf16.msra.mxu2 %v6783_v61  ;;  %v425_v61 = vpack.c.bf16 %v409_v49, %v408_v37 }
 0xc39   : > { %1099 = vmatpush.bf16.msra.mxu2 %v6792_v12  ;;  %v535_v12 = vpop.f32.mrf.mxu0 }
 0xc3a   : > { %v536_v1 = vadd.f32 %v535_v12, %v6872_v2 }
 0xc3b   : > { %542 = vmatmul.bf16.gmra.mxu0 %v425_v61 }
 0xc3d   : > { %1100 = vmatpush.bf16.msra.mxu2 %v6801_v10  ;;  %v410_v10 = vld [vmem:[%s7897_s9 + $0xc0] sm:$0xff] }
 0xc41   : > { %1101 = vmatpush.bf16.msra.mxu2 %v6810_v8  ;;  %v411_v8 = vld [vmem:[%s7897_s9 + $0xc8] sm:$0xff] }
 0xc42   : > { %v426_v3 = vpack.c.bf16 %v411_v8, %v410_v10 }
 0xc4b   : > { %547 = vmatmul.bf16.gmra.mxu0 %v426_v3 }
 0xc5b   : > { %552 = vmatmul.bf16.gmra.mxu0 %v427_v11 }
 0xca7   : > { %v967_v4 = vpop.f32.mrf.mxu2 }
 0xca8   : > { %v972_v5 = vadd.f32 %v967_v4, %v536_v1  ;;  %v538_v32 = vpop.f32.mrf.mxu0 }
 0xca9   : > { %v539_v60 = vadd.f32 %v538_v32, %v6872_v2 }
 0xcaa   : > { %v973_v35 = vmax.f32 %v972_v5, 0.0 }
 0xcac   : > { %v974_v6 = vpack.c.bf16 %v973_v35, %v973_v35 }
 0xcae   : > { %983 = vmatmul.bf16.vlgmr.msra.gmra.mxu3 %v974_v6 }
 0xcaf   : > { %v969_v0 = vpop.f32.mrf.mxu2 }
 0xcb0   : > { %v540_v8 = vpop.f32.mrf.mxu0 }
 0xcb1   : > { %v541_v0 = vadd.f32 %v540_v8, %v6872_v2 }
 0xcb8   : > { %v543_v1 = vpop.f32.mrf.mxu0 }
 0xcc0   : > { %v545_v3 = vpop.f32.mrf.mxu0 }
 0xcc1   : > { %v546_v14 = vadd.f32 %v545_v3, %v6872_v2 }
 0xcc8   : > { %v548_v4 = vpop.f32.mrf.mxu0 }
 0xcd0   : > { %v550_v5 = vpop.f32.mrf.mxu0 }
 0xcd8   : > { %v7125_v35 = vpop.f32.mrf.mxu0 }
 0xce0   : > { %v7127_v6 = vpop.f32.mrf.mxu0 }
 0xd31   : > { %v984_v37 = vpop.f32.mrf.mxu3 }
 0xd32   : > { %v989_v49 = vadd.f32 %v984_v37, %v539_v60  ;;  %v544_v37 = vadd.f32 %v543_v1, %v6872_v2 }
 0xd34   : > { %v990_v61 = vmax.f32 %v989_v49, 0.0 }
 0xd36   : > { %v991_v12 = vpack.c.bf16 %v990_v61, %v990_v61 }
 0xd38   : > { %1000 = vmatmul.bf16.vlgmr.msrb.gmra.mxu0 %v991_v12 }
 0xd39   : > { %v986_v10 = vpop.f32.mrf.mxu3 }
 0xdb5   : > { %v1001_v7 = vpop.f32.mrf.mxu0 }
 0xdb6   : > { %v1006_v9 = vadd.f32 %v1001_v7, %v541_v0  ;;  %v549_v7 = vadd.f32 %v548_v4, %v6872_v2  ;;  %v3679_v4 = vor.u32 %v6274_v47, %v6414_v34 }
 0xdb8   : > { %v1007_v11 = vmax.f32 %v1006_v9, 0.0 }
 0xdba   : > { %v1008_v32 = vpack.c.bf16 %v1007_v11, %v1007_v11 }
 0xdbc   : > { %1017 = vmatmul.bf16.vlgmr.msrb.gmra.mxu1 %v1008_v32 }
 0xdbd   : > { %v1003_v60 = vpop.f32.mrf.mxu0 }
 0xe39   : > { %v1018_v49 = vpop.f32.mrf.mxu1 }
 0xe3a   : > { %v1023_v61 = vadd.f32 %v1018_v49, %v544_v37  ;;  %v551_v37 = vadd.f32 %v550_v5, %v6872_v2  ;;  %v3555_v5 = vor.u32 %v6129_v39, %v5989_v48 }
 0xe3c   : > { %v1024_v12 = vmax.f32 %v1023_v61, 0.0 }
 0xe3e   : > { %v1025_v10 = vpack.c.bf16 %v1024_v12, %v1024_v12  ;;  %v3559_v12 = vor.u32 %v5984_v38, %v6124_v36 }
 0xe40   : > { %1034 = vmatmul.bf16.vlgmr.msrb.gmra.mxu2 %v1025_v10  ;;  %v3563_v10 = vor.u32 %v6139_v42, %v5999_v45 }
 0xe41   : > { %v1020_v13 = vpop.f32.mrf.mxu1  ;;  %2330 = vmatpush.bf16.msrb.mxu2 %v3679_v4  ;;  %v8386_v4 = vld [vmem:[#allocation230_spill] sm:$0xff] }
 0xec3   : > { %v1035_v15 = vpop.f32.mrf.mxu2 }
 0xec4   : > { %v1040_v16 = vadd.f32 %v1035_v15, %v546_v14  ;;  %v3667_v15 = vor.u32 %v6409_v43, %v6269_v56 }
 0xec6   : > { %v1041_v17 = vmax.f32 %v1040_v16, 0.0  ;;  %v3671_v16 = vor.u32 %v6264_v59, %v6404_v62  ;;  %2291 = vmatpush.bf16.msra.mxu3 %v3667_v15  ;;  %v8384_v15 = vld [vmem:[#allocation258_spill] sm:$0xff] }
 0xec8   : > { %v1042_v8 = vpack.c.bf16 %v1041_v17, %v1041_v17  ;;  %v3675_v17 = vor.u32 %v6419_v50, %v6279_v40  ;;  %2304 = vmatpush.bf16.msrb.mxu0 %v3671_v16 }
 0xeca   : > { %1051 = vmatmul.bf16.vlgmr.msrb.gmra.mxu3 %v1042_v8  ;;  %2317 = vmatpush.bf16.msrb.mxu1 %v3675_v17  ;;  %v3567_v8 = vor.u32 %v5994_v52, %v6134_v51  ;;  %v8385_v17 = vld [vmem:[#allocation202_spill] sm:$0xff] }
 0xecb   : > { %v1037_v0 = vpop.f32.mrf.mxu2  ;;  %2292 = vmatpush.bf16.msra.mxu3 %v3555_v5  ;;  %v3219_v5 = vor.u32 %v8386_v4, %v8385_v17  ;;  %v8398_v17 = vld [vmem:[#allocation176_spill] sm:$0xff]  ;;  %v8400_v4 = vld [vmem:[#allocation147_spill] sm:$0xff] }
 0xecc   : > { %2305 = vmatpush.bf16.msrb.mxu0 %v3559_v12  ;;  %v3443_v0 = vor.u32 %v5849_v46, %v5709_v33  ;;  %2331 = vmatpush.bf16.msrb.mxu2 %v3567_v8  ;;  %v8387_v12 = vld [vmem:[#allocation229_spill] sm:$0xff] }
 0xece   : > { %2318 = vmatpush.bf16.msrb.mxu1 %v3563_v10  ;;  %v8388_v10 = vld [vmem:[#allocation201_spill] sm:$0xff] }
 0xecf   : > { %2293 = vmatpush.bf16.msra.mxu3 %v3443_v0  ;;  %v3223_v8 = vor.u32 %v8388_v10, %v8387_v12  ;;  %v8389_v0 = vld [vmem:[#allocation204_spill] sm:$0xff]  ;;  %v8401_v10 = vld [vmem:[#allocation90_spill] sm:$0xff] }
 0xf4d   : > { %v1052_v9 = vpop.f32.mrf.mxu3 }
 0xf4e   : > { %v1057_v11 = vadd.f32 %v1052_v9, %v549_v7  ;;  %v3447_v7 = vor.u32 %v5704_v44, %v5844_v57  ;;  %v3451_v9 = vor.u32 %v5859_v55, %v5719_v53 }
 0xf50   : > { %v1058_v32 = vmax.f32 %v1057_v11, 0.0  ;;  %v3455_v11 = vor.u32 %v5714_v41, %v5854_v54  ;;  %2306 = vmatpush.bf16.msrb.mxu0 %v3447_v7  ;;  %2319 = vmatpush.bf16.msrb.mxu1 %v3451_v9  ;;  %v8390_v7 = vld [vmem:[#allocation232_spill] sm:$0xff] }
 0xf51   : > { %v3227_v9 = vor.u32 %v8390_v7, %v8389_v0  ;;  %v8402_v0 = vld [vmem:[#allocation118_spill] sm:$0xff]  ;;  %v8404_v7 = vld [vmem:[#allocation89_spill] sm:$0xff] }
 0xf52   : > { %v1059_v1 = vpack.c.bf16 %v1058_v32, %v1058_v32  ;;  %v8378_v32 = vld [vmem:[#allocation285_spill] sm:$0xff]  ;;  %2332 = vmatpush.bf16.msrb.mxu2 %v3455_v11  ;;  %v8391_v11 = vld [vmem:[#allocation231_spill] sm:$0xff] }
 0xf54   : > { %1068 = vmatmul.bf16.vlgmr.msra.gmra.mxu0 %v1059_v1  ;;  %v3331_v1 = vor.u32 %v8378_v32, %v5429_v58  ;;  %v8392_v32 = vld [vmem:[#allocation203_spill] sm:$0xff] }
 0xf55   : > { %v1054_v60 = vpop.f32.mrf.mxu3 }
 0xf56   : > { %v8379_v60 = vld [vmem:[#allocation284_spill] sm:$0xff]  ;;  %2294 = vmatpush.bf16.msra.mxu3 %v3331_v1 }
 0xf5a   : > { %2295 = vmatpush.bf16.msra.mxu3 %v3219_v5  ;;  %v2995_v5 = vor.u32 %v8402_v0, %v8401_v10  ;;  %v8412_v10 = vld [vmem:[#allocation33_spill] sm:$0xff] }
 0xfd1   : > { %v1069_v49 = vpop.f32.mrf.mxu0 }
 0xfd2   : > { %v1074_v13 = vadd.f32 %v1069_v49, %v551_v37  ;;  %v8380_v37 = vld [vmem:[#allocation257_spill] sm:$0xff] }
 0xfd3   : > { %v3335_v49 = vor.u32 %v8380_v37, %v8379_v60  ;;  %v3231_v60 = vor.u32 %v8392_v32, %v8391_v11  ;;  %v8393_v37 = vld [vmem:[#allocation146_spill] sm:$0xff]  ;;  %v554_v32 = vadd.f32 %v7125_v35, %v6872_v2  ;;  %v8413_v35 = vld [vmem:[#allocation36_spill] sm:$0xff] }
 0xfd4   : > { %v1075_v61 = vmax.f32 %v1074_v13, 0.0  ;;  %v8381_v13 = vld [vmem:[#allocation259_spill] sm:$0xff] }
 0xfd5   : > { %2307 = vmatpush.bf16.msrb.mxu0 %v3335_v49  ;;  %v8395_v49 = vld [vmem:[#allocation173_spill] sm:$0xff] }
 0xfd6   : > { %v1076_v3 = vpack.c.bf16 %v1075_v61, %v1075_v61  ;;  %v8382_v61 = vld [vmem:[#allocation287_spill] sm:$0xff] }
 0xfd8   : > { %1085 = vmatmul.bf16.vlgmr.msra.gmra.mxu1 %v1076_v3  ;;  %v3339_v3 = vor.u32 %v8382_v61, %v8381_v13  ;;  %v8394_v13 = vld [vmem:[#allocation174_spill] sm:$0xff]  ;;  %v8396_v61 = vld [vmem:[#allocation145_spill] sm:$0xff] }
 0xfd9   : > { %v1071_v14 = vpop.f32.mrf.mxu0  ;;  %2308 = vmatpush.bf16.msrb.mxu0 %v3223_v8  ;;  %v3107_v1 = vor.u32 %v8394_v13, %v8393_v37  ;;  %v8403_v8 = vld [vmem:[#allocation117_spill] sm:$0xff]  ;;  %v8407_v13 = vld [vmem:[#allocation119_spill] sm:$0xff] }
 0xfda   : > { %v8383_v14 = vld [vmem:[#allocation286_spill] sm:$0xff]  ;;  %2320 = vmatpush.bf16.msrb.mxu1 %v3339_v3  ;;  %v2999_v11 = vor.u32 %v8404_v7, %v8403_v8  ;;  %v8415_v7 = vld [vmem:[#allocation63_spill] sm:$0xff] }
 0xfdb   : > { %v3343_v16 = vor.u32 %v8384_v15, %v8383_v14  ;;  %v3111_v14 = vor.u32 %v8396_v61, %v8395_v49  ;;  %v8397_v15 = vld [vmem:[#allocation148_spill] sm:$0xff]  ;;  %2296 = vmatpush.bf16.msra.mxu3 %v3107_v1  ;;  %v8408_v49 = vld [vmem:[#allocation91_spill] sm:$0xff] }
 0xfdc   : > { %v3115_v3 = vor.u32 %v8398_v17, %v8397_v15  ;;  %v3007_v61 = vor.u32 %v8408_v49, %v8407_v13  ;;  %v8410_v17 = vld [vmem:[#allocation62_spill] sm:$0xff]  ;;  %v8417_v13 = vld [vmem:[#allocation409_spill] sm:$0xff] }
 0xfdd   : > { %2333 = vmatpush.bf16.msrb.mxu2 %v3343_v16  ;;  %v8399_v16 = vld [vmem:[#allocation175_spill] sm:$0xff]  ;;  %2309 = vmatpush.bf16.msrb.mxu0 %v3111_v14  ;;  %v8409_v14 = vld [vmem:[#allocation34_spill] sm:$0xff]  ;;  %v8418_v49 = vld [vmem:[#allocation433_spill] sm:$0xff] }
 0xfde   : > { %2321 = vmatpush.bf16.msrb.mxu1 %v3227_v9  ;;  %v3119_v12 = vor.u32 %v8400_v4, %v8399_v16  ;;  %v8405_v9 = vld [vmem:[#allocation92_spill] sm:$0xff]  ;;  %v2883_v16 = vor.u32 %v8410_v17, %v8409_v14  ;;  %v8411_v4 = vld [vmem:[#allocation61_spill] sm:$0xff]  ;;  %v8421_v14 = vld [vmem:[#allocation411_spill] sm:$0xff] }
 0xfdf   : > { %2297 = vmatpush.bf16.msra.mxu3 %v2995_v5  ;;  %v2887_v0 = vor.u32 %v8412_v10, %v8411_v4  ;;  %v8422_v17 = vld [vmem:[#allocation435_spill] sm:$0xff]  ;;  %v8425_v10 = vld [vmem:[#allocation361_spill] sm:$0xff] }
 0xfe0   : > { %v3691_v19 = vor.u32 %v8422_v17, %v8421_v14  ;;  %v8436_v14 = vld [vmem:[#allocation312_spill] sm:$0xff]  ;;  %v8438_v17 = vld [vmem:[#allocation339_spill] sm:$0xff] }
 0xfe1   : > { %2334 = vmatpush.bf16.msrb.mxu2 %v3231_v60  ;;  %v8406_v60 = vld [vmem:[#allocation120_spill] sm:$0xff]  ;;  %2310 = vmatpush.bf16.msrb.mxu0 %v2999_v11 }
 0xfe2   : > { %2322 = vmatpush.bf16.msrb.mxu1 %v3115_v3  ;;  %v3003_v37 = vor.u32 %v8406_v60, %v8405_v9  ;;  %v8414_v3 = vld [vmem:[#allocation64_spill] sm:$0xff]  ;;  %v8416_v9 = vld [vmem:[#allocation35_spill] sm:$0xff] }
 0xfe3   : > { %v2895_v60 = vor.u32 %v8416_v9, %v8415_v7  ;;  %v8419_v11 = vld [vmem:[#allocation432_spill] sm:$0xff]  ;;  %2298 = vmatpush.bf16.msra.mxu3 %v2883_v16 }
 0xfe4   : > { %v8428_v7 = vld [vmem:[#allocation360_spill] sm:$0xff] }
 0xfe5   : > { %2335 = vmatpush.bf16.msrb.mxu2 %v3119_v12  ;;  %v2891_v12 = vor.u32 %v8414_v3, %v8413_v35  ;;  %2311 = vmatpush.bf16.msrb.mxu0 %v2887_v0  ;;  %v8426_v35 = vld [vmem:[#allocation385_spill] sm:$0xff]  ;;  %v8431_v0 = vld [vmem:[#allocation386_spill] sm:$0xff] }
 0xfe6   : > { %2323 = vmatpush.bf16.msrb.mxu1 %v3003_v37  ;;  %v8423_v37 = vld [vmem:[#allocation434_spill] sm:$0xff]  ;;  %v3571_v3 = vor.u32 %v8426_v35, %v8425_v10  ;;  %v8442_v35 = vld [vmem:[#allocation289_spill] sm:$0xff] }
 0xfe9   : > { %2336 = vmatpush.bf16.msrb.mxu2 %v3007_v61  ;;  %v8424_v61 = vld [vmem:[#allocation410_spill] sm:$0xff] }
 0xfea   : > { %2324 = vmatpush.bf16.msrb.mxu1 %v2891_v12  ;;  %v8433_v12 = vld [vmem:[#allocation313_spill] sm:$0xff] }
 0xfed   : > { %2337 = vmatpush.bf16.msrb.mxu2 %v2895_v60 }
 0xfee   : > { %2369 = vmatpush.bf16.msra.mxu1 %v3691_v19  ;;  %v8437_v19 = vld [vmem:[#allocation315_spill] sm:$0xff] }
0x1055   : > { %v1086_v15 = vpop.f32.mrf.mxu1 }
0x1056   : > { %v1091_v1 = vadd.f32 %v1086_v15, %v554_v32  ;;  %v3683_v32 = vor.u32 %v8418_v49, %v8417_v13  ;;  %v8420_v15 = vld [vmem:[#allocation408_spill] sm:$0xff]  ;;  %v8429_v13 = vld [vmem:[#allocation363_spill] sm:$0xff] }
0x1057   : > { %v3687_v18 = vor.u32 %v8420_v15, %v8419_v11  ;;  %v8430_v49 = vld [vmem:[#allocation387_spill] sm:$0xff]  ;;  %v8432_v11 = vld [vmem:[#allocation362_spill] sm:$0xff] }
0x1058   : > { %v1092_v8 = vmax.f32 %v1091_v1, 0.0  ;;  %v3695_v1 = vor.u32 %v8424_v61, %v8423_v37  ;;  %2343 = vmatpush.bf16.msrb.mxu3 %v3683_v32  ;;  %v3579_v16 = vor.u32 %v8430_v49, %v8429_v13  ;;  %v3583_v15 = vor.u32 %v8432_v11, %v8431_v0  ;;  %v8435_v32 = vld [vmem:[#allocation336_spill] sm:$0xff]  ;;  %v8439_v61 = vld [vmem:[#allocation338_spill] sm:$0xff]  ;;  %v8445_v13 = vld [vmem:[#allocation263_spill] sm:$0xff] }
0x1059   : > { %2356 = vmatpush.bf16.msra.mxu0 %v3687_v18  ;;  %v3463_v18 = vor.u32 %v8436_v14, %v8435_v32  ;;  %v3467_v37 = vor.u32 %v8438_v17, %v8437_v19  ;;  %v8446_v49 = vld [vmem:[#allocation291_spill] sm:$0xff]  ;;  %v8447_v0 = vld [vmem:[#allocation290_spill] sm:$0xff]  ;;  %v8452_v14 = vld [vmem:[#allocation205_spill] sm:$0xff] }
0x105a   : > { %v1093_v5 = vpack.c.bf16 %v1092_v8, %v1092_v8  ;;  %v8427_v8 = vld [vmem:[#allocation384_spill] sm:$0xff]  ;;  %2370 = vmatpush.bf16.msra.mxu1 %v3579_v16  ;;  %v3355_v16 = vor.u32 %v8446_v49, %v8445_v13  ;;  %v8448_v11 = vld [vmem:[#allocation262_spill] sm:$0xff] }
0x105b   : > { %v3575_v9 = vor.u32 %v8428_v7, %v8427_v8  ;;  %v8444_v7 = vld [vmem:[#allocation260_spill] sm:$0xff] }
0x105c   : > { %1102 = vmatmul.bf16.vlgmr.msra.gmra.mxu2 %v1093_v5  ;;  %2344 = vmatpush.bf16.msrb.mxu3 %v3571_v3  ;;  %v8434_v5 = vld [vmem:[#allocation337_spill] sm:$0xff]  ;;  %v8443_v3 = vld [vmem:[#allocation288_spill] sm:$0xff] }
0x105d   : > { %v1088_v4 = vpop.f32.mrf.mxu1  ;;  %2382 = vmatpush.bf16.msra.mxu2 %v3695_v1  ;;  %v3459_v60 = vor.u32 %v8434_v5, %v8433_v12  ;;  %2357 = vmatpush.bf16.msra.mxu0 %v3575_v9  ;;  %v8441_v1 = vld [vmem:[#allocation261_spill] sm:$0xff]  ;;  %v3351_v9 = vor.u32 %v8444_v7, %v8443_v3  ;;  %v3359_v12 = vor.u32 %v8448_v11, %v8447_v0  ;;  %v8450_v5 = vld [vmem:[#allocation234_spill] sm:$0xff]  ;;  %v8453_v19 = vld [vmem:[#allocation208_spill] sm:$0xff] }
0x105e   : > { %v8440_v4 = vld [vmem:[#allocation314_spill] sm:$0xff]  ;;  %v3347_v8 = vor.u32 %v8442_v35, %v8441_v1  ;;  %2371 = vmatpush.bf16.msra.mxu1 %v3467_v37  ;;  %v8454_v17 = vld [vmem:[#allocation236_spill] sm:$0xff]  ;;  %v8460_v7 = vld [vmem:[#allocation149_spill] sm:$0xff] }
0x105f   : > { %v3471_v10 = vor.u32 %v8440_v4, %v8439_v61  ;;  %v3243_v37 = vor.u32 %v8454_v17, %v8453_v19  ;;  %v8455_v61 = vld [vmem:[#allocation235_spill] sm:$0xff]  ;;  %v8458_v35 = vld [vmem:[#allocation178_spill] sm:$0xff]  ;;  %v8461_v13 = vld [vmem:[#allocation152_spill] sm:$0xff] }
0x1060   : > { %2345 = vmatpush.bf16.msrb.mxu3 %v3459_v60  ;;  %v8451_v60 = vld [vmem:[#allocation233_spill] sm:$0xff]  ;;  %v8456_v4 = vld [vmem:[#allocation207_spill] sm:$0xff]  ;;  %v8462_v49 = vld [vmem:[#allocation180_spill] sm:$0xff] }
0x1061   : > { %2383 = vmatpush.bf16.msra.mxu2 %v3583_v15  ;;  %2358 = vmatpush.bf16.msra.mxu0 %v3463_v18  ;;  %v8449_v15 = vld [vmem:[#allocation206_spill] sm:$0xff]  ;;  %v3239_v18 = vor.u32 %v8452_v14, %v8451_v60  ;;  %v3247_v1 = vor.u32 %v8456_v4, %v8455_v61  ;;  %v8463_v0 = vld [vmem:[#allocation179_spill] sm:$0xff]  ;;  %v8467_v60 = vld [vmem:[#allocation121_spill] sm:$0xff] }
0x1062   : > { %v3235_v32 = vor.u32 %v8450_v5, %v8449_v15  ;;  %2372 = vmatpush.bf16.msra.mxu1 %v3355_v16  ;;  %v3131_v16 = vor.u32 %v8462_v49, %v8461_v13  ;;  %v8464_v11 = vld [vmem:[#allocation151_spill] sm:$0xff]  ;;  %v8466_v5 = vld [vmem:[#allocation122_spill] sm:$0xff]  ;;  %v8468_v14 = vld [vmem:[#allocation93_spill] sm:$0xff] }
0x1063   : > { %v3135_v15 = vor.u32 %v8464_v11, %v8463_v0  ;;  %v8469_v19 = vld [vmem:[#allocation96_spill] sm:$0xff]  ;;  %v8471_v61 = vld [vmem:[#allocation123_spill] sm:$0xff] }
0x1064   : > { %2346 = vmatpush.bf16.msrb.mxu3 %v3347_v8  ;;  %v8459_v8 = vld [vmem:[#allocation177_spill] sm:$0xff]  ;;  %v8470_v17 = vld [vmem:[#allocation124_spill] sm:$0xff]  ;;  %v8472_v4 = vld [vmem:[#allocation95_spill] sm:$0xff] }
0x1065   : > { %2384 = vmatpush.bf16.msra.mxu2 %v3471_v10  ;;  %2359 = vmatpush.bf16.msra.mxu0 %v3351_v9  ;;  %v8457_v10 = vld [vmem:[#allocation150_spill] sm:$0xff]  ;;  %v3127_v9 = vor.u32 %v8460_v7, %v8459_v8  ;;  %v8475_v8 = vld [vmem:[#allocation65_spill] sm:$0xff]  ;;  %v8477_v13 = vld [vmem:[#allocation40_spill] sm:$0xff] }
0x1066   : > { %v3123_v3 = vor.u32 %v8458_v35, %v8457_v10  ;;  %2373 = vmatpush.bf16.msra.mxu1 %v3243_v37  ;;  %v3019_v37 = vor.u32 %v8470_v17, %v8469_v19  ;;  %v3023_v10 = vor.u32 %v8472_v4, %v8471_v61  ;;  %v8474_v35 = vld [vmem:[#allocation66_spill] sm:$0xff]  ;;  %v8476_v7 = vld [vmem:[#allocation37_spill] sm:$0xff]  ;;  %v8478_v49 = vld [vmem:[#allocation68_spill] sm:$0xff] }
0x1067   : > { %v8479_v0 = vld [vmem:[#allocation67_spill] sm:$0xff]  ;;  %v8483_v19 = vld [vmem:[#allocation437_spill] sm:$0xff]  ;;  %v8485_v61 = vld [vmem:[#allocation412_spill] sm:$0xff] }
0x1068   : > { %2347 = vmatpush.bf16.msrb.mxu3 %v3235_v32  ;;  %v8480_v11 = vld [vmem:[#allocation39_spill] sm:$0xff] }
0x1069   : > { %2385 = vmatpush.bf16.msra.mxu2 %v3359_v12  ;;  %2360 = vmatpush.bf16.msra.mxu0 %v3239_v18  ;;  %v8465_v12 = vld [vmem:[#allocation94_spill] sm:$0xff]  ;;  %v3015_v18 = vor.u32 %v8468_v14, %v8467_v60 }
0x106a   : > { %2374 = vmatpush.bf16.msra.mxu1 %v3131_v16  ;;  %v3011_v32 = vor.u32 %v8466_v5, %v8465_v12  ;;  %v2907_v16 = vor.u32 %v8478_v49, %v8477_v13  ;;  %v556_v12 = vadd.f32 %v7127_v6, %v6872_v2  ;;  %v8492_v49 = vld [vmem:[#allocation388_spill] sm:$0xff] }
0x106c   : > { %2348 = vmatpush.bf16.msrb.mxu3 %v3123_v3 }
0x106d   : > { %2386 = vmatpush.bf16.msra.mxu2 %v3247_v1  ;;  %2361 = vmatpush.bf16.msra.mxu0 %v3127_v9  ;;  %v8473_v1 = vld [vmem:[#allocation38_spill] sm:$0xff]  ;;  %v2903_v9 = vor.u32 %v8476_v7, %v8475_v8 }
0x106e   : > { %2375 = vmatpush.bf16.msra.mxu1 %v3019_v37  ;;  %v2899_v3 = vor.u32 %v8474_v35, %v8473_v1  ;;  %v8484_v37 = vld [vmem:[#allocation436_spill] sm:$0xff]  ;;  %v8487_v1 = vld [vmem:[#allocation439_spill] sm:$0xff]  ;;  %v8488_v8 = vld [vmem:[#allocation438_spill] sm:$0xff] }
0x106f   : > { %v3703_v4 = vor.u32 %v8485_v61, %v8484_v37  ;;  %v8489_v7 = vld [vmem:[#allocation414_spill] sm:$0xff]  ;;  %v8499_v37 = vld [vmem:[#allocation341_spill] sm:$0xff]  ;;  %v8500_v61 = vld [vmem:[#allocation340_spill] sm:$0xff] }
0x1070   : > { %2349 = vmatpush.bf16.msrb.mxu3 %v3011_v32  ;;  %v3711_v2 = vor.u32 %v8489_v7, %v8488_v8  ;;  %v8503_v8 = vld [vmem:[#allocation343_spill] sm:$0xff]  ;;  %v8504_v7 = vld [vmem:[#allocation342_spill] sm:$0xff] }
0x1071   : > { %2387 = vmatpush.bf16.msra.mxu2 %v3135_v15  ;;  %2362 = vmatpush.bf16.msra.mxu0 %v3015_v18  ;;  %v2911_v15 = vor.u32 %v8480_v11, %v8479_v0  ;;  %v8482_v18 = vld [vmem:[#allocation413_spill] sm:$0xff]  ;;  %v8494_v11 = vld [vmem:[#allocation367_spill] sm:$0xff] }
0x1072   : > { %2376 = vmatpush.bf16.msra.mxu1 %v2907_v16  ;;  %v3699_v17 = vor.u32 %v8483_v19, %v8482_v18  ;;  %v8493_v16 = vld [vmem:[#allocation364_spill] sm:$0xff]  ;;  %v8498_v19 = vld [vmem:[#allocation317_spill] sm:$0xff] }
0x1073   : > { %v3591_v0 = vor.u32 %v8493_v16, %v8492_v49  ;;  %v8508_v49 = vld [vmem:[#allocation292_spill] sm:$0xff] }
0x1074   : > { %2350 = vmatpush.bf16.msrb.mxu3 %v2899_v3  ;;  %v8509_v16 = vld [vmem:[#allocation264_spill] sm:$0xff] }
0x1075   : > { %2388 = vmatpush.bf16.msra.mxu2 %v3023_v10  ;;  %2363 = vmatpush.bf16.msra.mxu0 %v2903_v9  ;;  %v8486_v10 = vld [vmem:[#allocation415_spill] sm:$0xff]  ;;  %v8491_v9 = vld [vmem:[#allocation389_spill] sm:$0xff] }
0x1076   : > { %v3707_v3 = vor.u32 %v8487_v1, %v8486_v10  ;;  %v8502_v1 = vld [vmem:[#allocation319_spill] sm:$0xff] }
0x1079   : > { %2389 = vmatpush.bf16.msra.mxu2 %v2911_v15  ;;  %v8495_v15 = vld [vmem:[#allocation391_spill] sm:$0xff] }
0x10df   : > { %v1103_v5 = vpop.f32.mrf.mxu2 }
0x10e0   : > { %v1108_v32 = vadd.f32 %v1103_v5, %v556_v12  ;;  %v3595_v12 = vor.u32 %v8495_v15, %v8494_v11  ;;  %v8496_v5 = vld [vmem:[#allocation390_spill] sm:$0xff]  ;;  %v8510_v11 = vld [vmem:[#allocation267_spill] sm:$0xff] }
0x10e1   : > { %v8511_v15 = vld [vmem:[#allocation295_spill] sm:$0xff] }
0x10e2   : > { %v7266_v35 = vmax.f32 %v1108_v32, 0.0   ;;  %v8497_v32 = vld [vmem:[#allocation366_spill] sm:$0xff] }
0x10e3   : > { %v3599_v18 = vor.u32 %v8497_v32, %v8496_v5  ;;  %v8512_v5 = vld [vmem:[#allocation294_spill] sm:$0xff] }
0x10e4   : > { %v8481_v60 = vmov %v7266_v35  ;;  %v8490_v35 = vld [vmem:[#allocation365_spill] sm:$0xff]  ;;  %v8513_v32 = vld [vmem:[#allocation266_spill] sm:$0xff] }
0x10e5   : > { %v7270_v14 = vpack.c.bf16 %v8481_v60, %v8481_v60  ;;  %v3587_v13 = vor.u32 %v8491_v9, %v8490_v35  ;;  %v8506_v35 = vld [vmem:[#allocation265_spill] sm:$0xff]  ;;  %2797 = vst [vmem:[%s7898_s10] sm:$0xff] (%p379_p0), %v8481_v60 }
0x10e6   : > { %v8507_v9 = vld [vmem:[#allocation293_spill] sm:$0xff] }
0x10e7   : > { %2299 = vmatmul.bf16.vlgmr.msra.gmra.mxu3 %v7270_v14  ;;  %2312 = vmatmul.bf16.vlgmr.msrb.gmra.mxu0 %v7270_v14  ;;  %v1105_v6 = vpop.f32.mrf.mxu2 }
0x10e8   : > { %2325 = vmatmul.bf16.vlgmr.msrb.gmra.mxu1 %v7270_v14  ;;  %2338 = vmatmul.bf16.vlgmr.msrb.gmra.mxu2 %v7270_v14 }
0x10e9   : > { %2395 = vmatpush.bf16.msra.mxu3 %v3699_v17  ;;  %2408 = vmatpush.bf16.msrb.mxu0 %v3703_v4  ;;  %v3475_v17 = vor.u32 %v8499_v37, %v8498_v19  ;;  %v8501_v4 = vld [vmem:[#allocation316_spill] sm:$0xff]  ;;  %v8514_v19 = vld [vmem:[#allocation210_spill] sm:$0xff] }
0x10ea   : > { %2421 = vmatpush.bf16.msrb.mxu1 %v3707_v3  ;;  %2434 = vmatpush.bf16.msrb.mxu2 %v3711_v2  ;;  %v3479_v10 = vor.u32 %v8501_v4, %v8500_v61  ;;  %v3483_v3 = vor.u32 %v8503_v8, %v8502_v1  ;;  %v8505_v2 = vld [vmem:[#allocation318_spill] sm:$0xff]  ;;  %v8516_v61 = vld [vmem:[#allocation237_spill] sm:$0xff]  ;;  %v8518_v1 = vld [vmem:[#allocation212_spill] sm:$0xff] }
0x10eb   : > { %v3487_v6 = vor.u32 %v8505_v2, %v8504_v7  ;;  %v8515_v37 = vld [vmem:[#allocation238_spill] sm:$0xff]  ;;  %v8517_v4 = vld [vmem:[#allocation209_spill] sm:$0xff]  ;;  %v8519_v8 = vld [vmem:[#allocation240_spill] sm:$0xff] }
0x10ec   : > { %v8520_v7 = vld [vmem:[#allocation239_spill] sm:$0xff] }
0x10ed   : > { %2396 = vmatpush.bf16.msra.mxu3 %v3587_v13  ;;  %2409 = vmatpush.bf16.msrb.mxu0 %v3591_v0  ;;  %v3363_v13 = vor.u32 %v8507_v9, %v8506_v35  ;;  %v3367_v0 = vor.u32 %v8509_v16, %v8508_v49  ;;  %v8521_v2 = vld [vmem:[#allocation211_spill] sm:$0xff]  ;;  %v8522_v35 = vld [vmem:[#allocation154_spill] sm:$0xff]  ;;  %v8524_v49 = vld [vmem:[#allocation181_spill] sm:$0xff] }
0x10ee   : > { %2422 = vmatpush.bf16.msrb.mxu1 %v3595_v12  ;;  %2435 = vmatpush.bf16.msrb.mxu2 %v3599_v18  ;;  %v3371_v12 = vor.u32 %v8511_v15, %v8510_v11  ;;  %v3375_v18 = vor.u32 %v8513_v32, %v8512_v5  ;;  %v8523_v9 = vld [vmem:[#allocation182_spill] sm:$0xff]  ;;  %v8525_v16 = vld [vmem:[#allocation153_spill] sm:$0xff]  ;;  %v8526_v11 = vld [vmem:[#allocation156_spill] sm:$0xff] }
0x10ef   : > { %v8527_v15 = vld [vmem:[#allocation184_spill] sm:$0xff]  ;;  %v8528_v5 = vld [vmem:[#allocation183_spill] sm:$0xff] }
0x10f0   : > { %v8529_v32 = vld [vmem:[#allocation155_spill] sm:$0xff] }
0x10f1   : > { %2397 = vmatpush.bf16.msra.mxu3 %v3475_v17  ;;  %2410 = vmatpush.bf16.msrb.mxu0 %v3479_v10  ;;  %v3251_v17 = vor.u32 %v8515_v37, %v8514_v19  ;;  %v3255_v10 = vor.u32 %v8517_v4, %v8516_v61  ;;  %v8530_v19 = vld [vmem:[#allocation98_spill] sm:$0xff]  ;;  %v8532_v61 = vld [vmem:[#allocation125_spill] sm:$0xff] }
0x10f2   : > { %2423 = vmatpush.bf16.msrb.mxu1 %v3483_v3  ;;  %2436 = vmatpush.bf16.msrb.mxu2 %v3487_v6  ;;  %v3259_v3 = vor.u32 %v8519_v8, %v8518_v1  ;;  %v3263_v6 = vor.u32 %v8521_v2, %v8520_v7  ;;  %v8531_v37 = vld [vmem:[#allocation126_spill] sm:$0xff]  ;;  %v8533_v4 = vld [vmem:[#allocation97_spill] sm:$0xff]  ;;  %v8534_v1 = vld [vmem:[#allocation100_spill] sm:$0xff] }
0x10f3   : > { %v8535_v8 = vld [vmem:[#allocation128_spill] sm:$0xff]  ;;  %v8536_v7 = vld [vmem:[#allocation127_spill] sm:$0xff] }
0x10f4   : > { %v8537_v2 = vld [vmem:[#allocation99_spill] sm:$0xff] }
0x10f5   : > { %2398 = vmatpush.bf16.msra.mxu3 %v3363_v13  ;;  %2411 = vmatpush.bf16.msrb.mxu0 %v3367_v0  ;;  %v3139_v13 = vor.u32 %v8523_v9, %v8522_v35  ;;  %v3143_v0 = vor.u32 %v8525_v16, %v8524_v49  ;;  %v8538_v35 = vld [vmem:[#allocation42_spill] sm:$0xff]  ;;  %v8540_v49 = vld [vmem:[#allocation69_spill] sm:$0xff] }
0x10f6   : > { %2424 = vmatpush.bf16.msrb.mxu1 %v3371_v12  ;;  %2437 = vmatpush.bf16.msrb.mxu2 %v3375_v18  ;;  %v3147_v12 = vor.u32 %v8527_v15, %v8526_v11  ;;  %v3151_v18 = vor.u32 %v8529_v32, %v8528_v5  ;;  %v8539_v9 = vld [vmem:[#allocation70_spill] sm:$0xff]  ;;  %v8541_v16 = vld [vmem:[#allocation41_spill] sm:$0xff]  ;;  %v8542_v11 = vld [vmem:[#allocation44_spill] sm:$0xff] }
0x10f7   : > { %2351 = vmatmul.bf16.vlgmr.msrb.gmra.mxu3 %v7270_v14  ;;  %2364 = vmatmul.bf16.vlgmr.msra.gmra.mxu0 %v7270_v14  ;;  %v8543_v15 = vld [vmem:[#allocation72_spill] sm:$0xff]  ;;  %v8544_v5 = vld [vmem:[#allocation71_spill] sm:$0xff] }
0x10f8   : > { %2377 = vmatmul.bf16.vlgmr.msra.gmra.mxu1 %v7270_v14  ;;  %2390 = vmatmul.bf16.vlgmr.msra.gmra.mxu2 %v7270_v14  ;;  %v8545_v32 = vld [vmem:[#allocation43_spill] sm:$0xff] }
0x10f9   : > { %2399 = vmatpush.bf16.msra.mxu3 %v3251_v17  ;;  %2412 = vmatpush.bf16.msrb.mxu0 %v3255_v10  ;;  %v3027_v17 = vor.u32 %v8531_v37, %v8530_v19  ;;  %v3031_v10 = vor.u32 %v8533_v4, %v8532_v61  ;;  %v8546_v19 = vld [vmem:[#allocation417_spill] sm:$0xff]  ;;  %v8548_v4 = vld [vmem:[#allocation440_spill] sm:$0xff] }
0x10fa   : > { %2425 = vmatpush.bf16.msrb.mxu1 %v3259_v3  ;;  %2438 = vmatpush.bf16.msrb.mxu2 %v3263_v6  ;;  %v3035_v3 = vor.u32 %v8535_v8, %v8534_v1  ;;  %v3039_v6 = vor.u32 %v8537_v2, %v8536_v7  ;;  %v8547_v37 = vld [vmem:[#allocation441_spill] sm:$0xff]  ;;  %v8550_v1 = vld [vmem:[#allocation419_spill] sm:$0xff]  ;;  %v8552_v2 = vld [vmem:[#allocation442_spill] sm:$0xff] }
0x10fb   : > { %v3715_v61 = vor.u32 %v8547_v37, %v8546_v19  ;;  %v8551_v8 = vld [vmem:[#allocation443_spill] sm:$0xff]  ;;  %v8560_v37 = vld [vmem:[#allocation394_spill] sm:$0xff] }
0x10fc   : > { %v3723_v7 = vor.u32 %v8551_v8, %v8550_v1  ;;  %v8566_v1 = vld [vmem:[#allocation323_spill] sm:$0xff] }
0x10fd   : > { %2400 = vmatpush.bf16.msra.mxu3 %v3139_v13  ;;  %2413 = vmatpush.bf16.msrb.mxu0 %v3143_v0  ;;  %v2915_v13 = vor.u32 %v8539_v9, %v8538_v35  ;;  %v2919_v0 = vor.u32 %v8541_v16, %v8540_v49  ;;  %v8553_v35 = vld [vmem:[#allocation418_spill] sm:$0xff]  ;;  %v8556_v16 = vld [vmem:[#allocation392_spill] sm:$0xff]  ;;  %v8567_v8 = vld [vmem:[#allocation347_spill] sm:$0xff] }
0x10fe   : > { %2426 = vmatpush.bf16.msrb.mxu1 %v3147_v12  ;;  %2439 = vmatpush.bf16.msrb.mxu2 %v3151_v18  ;;  %v2923_v12 = vor.u32 %v8543_v15, %v8542_v11  ;;  %v2927_v18 = vor.u32 %v8545_v32, %v8544_v5  ;;  %v3727_v9 = vor.u32 %v8553_v35, %v8552_v2  ;;  %v8557_v11 = vld [vmem:[#allocation368_spill] sm:$0xff]  ;;  %v8558_v5 = vld [vmem:[#allocation371_spill] sm:$0xff]  ;;  %v8568_v2 = vld [vmem:[#allocation346_spill] sm:$0xff] }
0x10ff   : > { %v3607_v15 = vor.u32 %v8557_v11, %v8556_v16  ;;  %v8559_v32 = vld [vmem:[#allocation395_spill] sm:$0xff]  ;;  %v8569_v35 = vld [vmem:[#allocation322_spill] sm:$0xff]  ;;  %v8572_v16 = vld [vmem:[#allocation296_spill] sm:$0xff] }
0x1100   : > { %v3611_v19 = vor.u32 %v8559_v32, %v8558_v5  ;;  %v8573_v11 = vld [vmem:[#allocation268_spill] sm:$0xff]  ;;  %v8574_v5 = vld [vmem:[#allocation271_spill] sm:$0xff] }
0x1101   : > { %2401 = vmatpush.bf16.msra.mxu3 %v3027_v17  ;;  %2414 = vmatpush.bf16.msrb.mxu0 %v3031_v10  ;;  %v8549_v17 = vld [vmem:[#allocation416_spill] sm:$0xff]  ;;  %v8575_v32 = vld [vmem:[#allocation299_spill] sm:$0xff] }
0x1102   : > { %2427 = vmatpush.bf16.msrb.mxu1 %v3035_v3  ;;  %2440 = vmatpush.bf16.msrb.mxu2 %v3039_v6  ;;  %v3719_v10 = vor.u32 %v8549_v17, %v8548_v4  ;;  %v8554_v3 = vld [vmem:[#allocation369_spill] sm:$0xff]  ;;  %v8561_v4 = vld [vmem:[#allocation370_spill] sm:$0xff] }
0x1103   : > { %v8555_v6 = vld [vmem:[#allocation393_spill] sm:$0xff]  ;;  %v3615_v17 = vor.u32 %v8561_v4, %v8560_v37  ;;  %v8576_v37 = vld [vmem:[#allocation298_spill] sm:$0xff] }
0x1104   : > { %v3603_v49 = vor.u32 %v8555_v6, %v8554_v3  ;;  %v8570_v3 = vld [vmem:[#allocation269_spill] sm:$0xff]  ;;  %v8577_v4 = vld [vmem:[#allocation270_spill] sm:$0xff] }
0x1105   : > { %2402 = vmatpush.bf16.msra.mxu3 %v2915_v13  ;;  %2415 = vmatpush.bf16.msrb.mxu0 %v2919_v0  ;;  %v8562_v13 = vld [vmem:[#allocation321_spill] sm:$0xff] }
0x1106   : > { %2428 = vmatpush.bf16.msrb.mxu1 %v2923_v12  ;;  %2441 = vmatpush.bf16.msrb.mxu2 %v2927_v18  ;;  %v8563_v0 = vld [vmem:[#allocation345_spill] sm:$0xff]  ;;  %v8564_v18 = vld [vmem:[#allocation344_spill] sm:$0xff] }
0x1107   : > { %v3491_v12 = vor.u32 %v8563_v0, %v8562_v13  ;;  %v8571_v6 = vld [vmem:[#allocation297_spill] sm:$0xff]  ;;  %v8578_v13 = vld [vmem:[#allocation214_spill] sm:$0xff] }
0x1108   : > { %2403 = vmatmul.bf16.vlgmr.msra.gmra.mxu3 %v7270_v14  ;;  %2416 = vmatmul.bf16.vlgmr.msrb.gmra.mxu0 %v7270_v14  ;;  %v8579_v0 = vld [vmem:[#allocation242_spill] sm:$0xff] }
0x1109   : > { %2447 = vmatpush.bf16.msrb.mxu3 %v3715_v61  ;;  %2460 = vmatpush.bf16.msra.mxu0 %v3719_v10  ;;  %v8565_v61 = vld [vmem:[#allocation320_spill] sm:$0xff] }
0x110a   : > { %2473 = vmatpush.bf16.msra.mxu1 %v3723_v7  ;;  %2486 = vmatpush.bf16.msra.mxu2 %v3727_v9  ;;  %v3495_v10 = vor.u32 %v8565_v61, %v8564_v18  ;;  %v3499_v7 = vor.u32 %v8567_v8, %v8566_v1  ;;  %v3503_v9 = vor.u32 %v8569_v35, %v8568_v2  ;;  %v8580_v18 = vld [vmem:[#allocation241_spill] sm:$0xff]  ;;  %v8582_v1 = vld [vmem:[#allocation216_spill] sm:$0xff]  ;;  %v8584_v2 = vld [vmem:[#allocation243_spill] sm:$0xff] }
0x110b   : > { %2429 = vmatmul.bf16.vlgmr.msrb.gmra.mxu1 %v7270_v14  ;;  %2442 = vmatmul.bf16.vlgmr.msrb.gmra.mxu2 %v7270_v14  ;;  %v8581_v61 = vld [vmem:[#allocation213_spill] sm:$0xff]  ;;  %v8583_v8 = vld [vmem:[#allocation244_spill] sm:$0xff]  ;;  %v8585_v35 = vld [vmem:[#allocation215_spill] sm:$0xff] }
0x110d   : > { %2448 = vmatpush.bf16.msrb.mxu3 %v3603_v49  ;;  %2461 = vmatpush.bf16.msra.mxu0 %v3607_v15  ;;  %v3379_v49 = vor.u32 %v8571_v6, %v8570_v3  ;;  %v3383_v15 = vor.u32 %v8573_v11, %v8572_v16  ;;  %v8586_v3 = vld [vmem:[#allocation158_spill] sm:$0xff]  ;;  %v8588_v16 = vld [vmem:[#allocation185_spill] sm:$0xff] }
0x110e   : > { %2474 = vmatpush.bf16.msra.mxu1 %v3611_v19  ;;  %2487 = vmatpush.bf16.msra.mxu2 %v3615_v17  ;;  %v3387_v19 = vor.u32 %v8575_v32, %v8574_v5  ;;  %v3391_v17 = vor.u32 %v8577_v4, %v8576_v37  ;;  %v8587_v6 = vld [vmem:[#allocation186_spill] sm:$0xff]  ;;  %v8589_v11 = vld [vmem:[#allocation157_spill] sm:$0xff]  ;;  %v8590_v5 = vld [vmem:[#allocation160_spill] sm:$0xff] }
0x110f   : > { %v8591_v32 = vld [vmem:[#allocation188_spill] sm:$0xff]  ;;  %v8592_v37 = vld [vmem:[#allocation187_spill] sm:$0xff] }
0x1110   : > { %v8593_v4 = vld [vmem:[#allocation159_spill] sm:$0xff] }
0x1111   : > { %2449 = vmatpush.bf16.msrb.mxu3 %v3491_v12  ;;  %2462 = vmatpush.bf16.msra.mxu0 %v3495_v10  ;;  %v3267_v12 = vor.u32 %v8579_v0, %v8578_v13  ;;  %v3271_v10 = vor.u32 %v8581_v61, %v8580_v18  ;;  %v8594_v13 = vld [vmem:[#allocation102_spill] sm:$0xff]  ;;  %v8596_v18 = vld [vmem:[#allocation129_spill] sm:$0xff] }
0x1112   : > { %2475 = vmatpush.bf16.msra.mxu1 %v3499_v7  ;;  %2488 = vmatpush.bf16.msra.mxu2 %v3503_v9  ;;  %v3275_v7 = vor.u32 %v8583_v8, %v8582_v1  ;;  %v3279_v9 = vor.u32 %v8585_v35, %v8584_v2  ;;  %v8595_v0 = vld [vmem:[#allocation130_spill] sm:$0xff]  ;;  %v8597_v61 = vld [vmem:[#allocation101_spill] sm:$0xff]  ;;  %v8598_v1 = vld [vmem:[#allocation104_spill] sm:$0xff] }
0x1113   : > { %v8599_v8 = vld [vmem:[#allocation132_spill] sm:$0xff]  ;;  %v8600_v2 = vld [vmem:[#allocation131_spill] sm:$0xff] }
0x1114   : > { %v8601_v35 = vld [vmem:[#allocation103_spill] sm:$0xff] }
0x1115   : > { %2450 = vmatpush.bf16.msrb.mxu3 %v3379_v49  ;;  %2463 = vmatpush.bf16.msra.mxu0 %v3383_v15  ;;  %v3155_v49 = vor.u32 %v8587_v6, %v8586_v3  ;;  %v3159_v15 = vor.u32 %v8589_v11, %v8588_v16  ;;  %v8602_v3 = vld [vmem:[#allocation46_spill] sm:$0xff]  ;;  %v8604_v16 = vld [vmem:[#allocation73_spill] sm:$0xff] }
0x1116   : > { %2476 = vmatpush.bf16.msra.mxu1 %v3387_v19  ;;  %2489 = vmatpush.bf16.msra.mxu2 %v3391_v17  ;;  %v3163_v19 = vor.u32 %v8591_v32, %v8590_v5  ;;  %v3167_v17 = vor.u32 %v8593_v4, %v8592_v37  ;;  %v8603_v6 = vld [vmem:[#allocation74_spill] sm:$0xff]  ;;  %v8605_v11 = vld [vmem:[#allocation45_spill] sm:$0xff]  ;;  %v8606_v5 = vld [vmem:[#allocation48_spill] sm:$0xff] }
0x1117   : > { %v8607_v32 = vld [vmem:[#allocation76_spill] sm:$0xff]  ;;  %v8608_v37 = vld [vmem:[#allocation75_spill] sm:$0xff] }
0x1118   : > { %v8609_v4 = vld [vmem:[#allocation47_spill] sm:$0xff] }
0x1119   : > { %2451 = vmatpush.bf16.msrb.mxu3 %v3267_v12  ;;  %2464 = vmatpush.bf16.msra.mxu0 %v3271_v10  ;;  %v3043_v12 = vor.u32 %v8595_v0, %v8594_v13  ;;  %v3047_v10 = vor.u32 %v8597_v61, %v8596_v18  ;;  %v8610_v13 = vld [vmem:[#allocation421_spill] sm:$0xff]  ;;  %v8612_v61 = vld [vmem:[#allocation444_spill] sm:$0xff] }
0x111a   : > { %2477 = vmatpush.bf16.msra.mxu1 %v3275_v7  ;;  %2490 = vmatpush.bf16.msra.mxu2 %v3279_v9  ;;  %v3051_v7 = vor.u32 %v8599_v8, %v8598_v1  ;;  %v3055_v9 = vor.u32 %v8601_v35, %v8600_v2  ;;  %v8611_v0 = vld [vmem:[#allocation445_spill] sm:$0xff]  ;;  %v8614_v1 = vld [vmem:[#allocation423_spill] sm:$0xff]  ;;  %v8616_v35 = vld [vmem:[#allocation446_spill] sm:$0xff] }
0x111b   : > { %v3731_v18 = vor.u32 %v8611_v0, %v8610_v13  ;;  %v8615_v8 = vld [vmem:[#allocation447_spill] sm:$0xff]  ;;  %v8624_v0 = vld [vmem:[#allocation398_spill] sm:$0xff] }
0x111c   : > { %v3739_v2 = vor.u32 %v8615_v8, %v8614_v1  ;;  %v8630_v1 = vld [vmem:[#allocation327_spill] sm:$0xff] }
0x111d   : > { %2452 = vmatpush.bf16.msrb.mxu3 %v3155_v49  ;;  %2465 = vmatpush.bf16.msra.mxu0 %v3159_v15  ;;  %v2931_v49 = vor.u32 %v8603_v6, %v8602_v3  ;;  %v2935_v15 = vor.u32 %v8605_v11, %v8604_v16  ;;  %v8617_v3 = vld [vmem:[#allocation422_spill] sm:$0xff]  ;;  %v8620_v11 = vld [vmem:[#allocation396_spill] sm:$0xff]  ;;  %v8631_v8 = vld [vmem:[#allocation351_spill] sm:$0xff] }
0x111e   : > { %2478 = vmatpush.bf16.msra.mxu1 %v3163_v19  ;;  %2491 = vmatpush.bf16.msra.mxu2 %v3167_v17  ;;  %v2939_v19 = vor.u32 %v8607_v32, %v8606_v5  ;;  %v2943_v17 = vor.u32 %v8609_v4, %v8608_v37  ;;  %v3743_v6 = vor.u32 %v8617_v3, %v8616_v35  ;;  %v8621_v5 = vld [vmem:[#allocation372_spill] sm:$0xff]  ;;  %v8622_v37 = vld [vmem:[#allocation375_spill] sm:$0xff]  ;;  %v8632_v35 = vld [vmem:[#allocation350_spill] sm:$0xff] }
0x111f   : > { %v3623_v32 = vor.u32 %v8621_v5, %v8620_v11  ;;  %v8623_v4 = vld [vmem:[#allocation399_spill] sm:$0xff]  ;;  %v8633_v3 = vld [vmem:[#allocation326_spill] sm:$0xff]  ;;  %v8636_v11 = vld [vmem:[#allocation300_spill] sm:$0xff] }
0x1120   : > { %v3627_v13 = vor.u32 %v8623_v4, %v8622_v37  ;;  %v8637_v5 = vld [vmem:[#allocation272_spill] sm:$0xff]  ;;  %v8638_v37 = vld [vmem:[#allocation275_spill] sm:$0xff] }
0x1121   : > { %2453 = vmatpush.bf16.msrb.mxu3 %v3043_v12  ;;  %2466 = vmatpush.bf16.msra.mxu0 %v3047_v10  ;;  %v8613_v12 = vld [vmem:[#allocation420_spill] sm:$0xff]  ;;  %v8639_v4 = vld [vmem:[#allocation303_spill] sm:$0xff] }
0x1122   : > { %2479 = vmatpush.bf16.msra.mxu1 %v3051_v7  ;;  %2492 = vmatpush.bf16.msra.mxu2 %v3055_v9  ;;  %v3735_v10 = vor.u32 %v8613_v12, %v8612_v61  ;;  %v8618_v7 = vld [vmem:[#allocation373_spill] sm:$0xff]  ;;  %v8625_v61 = vld [vmem:[#allocation374_spill] sm:$0xff] }
0x1123   : > { %v8619_v9 = vld [vmem:[#allocation397_spill] sm:$0xff]  ;;  %v3631_v12 = vor.u32 %v8625_v61, %v8624_v0  ;;  %v8640_v0 = vld [vmem:[#allocation302_spill] sm:$0xff] }
0x1124   : > { %v3619_v16 = vor.u32 %v8619_v9, %v8618_v7  ;;  %v8634_v7 = vld [vmem:[#allocation273_spill] sm:$0xff]  ;;  %v8641_v61 = vld [vmem:[#allocation274_spill] sm:$0xff] }
0x1125   : > { %2454 = vmatpush.bf16.msrb.mxu3 %v2931_v49  ;;  %2467 = vmatpush.bf16.msra.mxu0 %v2935_v15  ;;  %v8626_v49 = vld [vmem:[#allocation325_spill] sm:$0xff] }
0x1126   : > { %2480 = vmatpush.bf16.msra.mxu1 %v2939_v19  ;;  %2493 = vmatpush.bf16.msra.mxu2 %v2943_v17  ;;  %v8627_v15 = vld [vmem:[#allocation349_spill] sm:$0xff]  ;;  %v8628_v17 = vld [vmem:[#allocation348_spill] sm:$0xff] }
0x1127   : > { %v3507_v19 = vor.u32 %v8627_v15, %v8626_v49  ;;  %v8635_v9 = vld [vmem:[#allocation301_spill] sm:$0xff]  ;;  %v8642_v49 = vld [vmem:[#allocation218_spill] sm:$0xff] }
0x1128   : > { %2455 = vmatmul.bf16.vlgmr.msrb.gmra.mxu3 %v7270_v14  ;;  %2468 = vmatmul.bf16.vlgmr.msra.gmra.mxu0 %v7270_v14  ;;  %v8643_v15 = vld [vmem:[#allocation246_spill] sm:$0xff] }
0x1129   : > { %2499 = vmatpush.bf16.msra.mxu3 %v3731_v18  ;;  %2512 = vmatpush.bf16.msrb.mxu0 %v3735_v10  ;;  %v8629_v18 = vld [vmem:[#allocation324_spill] sm:$0xff] }
0x112a   : > { %2525 = vmatpush.bf16.msrb.mxu1 %v3739_v2  ;;  %2538 = vmatpush.bf16.msrb.mxu2 %v3743_v6  ;;  %v3511_v10 = vor.u32 %v8629_v18, %v8628_v17  ;;  %v3515_v2 = vor.u32 %v8631_v8, %v8630_v1  ;;  %v3519_v6 = vor.u32 %v8633_v3, %v8632_v35  ;;  %v8644_v17 = vld [vmem:[#allocation245_spill] sm:$0xff]  ;;  %v8646_v1 = vld [vmem:[#allocation220_spill] sm:$0xff]  ;;  %v8648_v35 = vld [vmem:[#allocation247_spill] sm:$0xff] }
0x112b   : > { %2481 = vmatmul.bf16.vlgmr.msra.gmra.mxu1 %v7270_v14  ;;  %2494 = vmatmul.bf16.vlgmr.msra.gmra.mxu2 %v7270_v14  ;;  %v8645_v18 = vld [vmem:[#allocation217_spill] sm:$0xff]  ;;  %v8647_v8 = vld [vmem:[#allocation248_spill] sm:$0xff]  ;;  %v8649_v3 = vld [vmem:[#allocation219_spill] sm:$0xff] }
0x112d   : > { %2500 = vmatpush.bf16.msra.mxu3 %v3619_v16  ;;  %2513 = vmatpush.bf16.msrb.mxu0 %v3623_v32  ;;  %v3395_v16 = vor.u32 %v8635_v9, %v8634_v7  ;;  %v3399_v32 = vor.u32 %v8637_v5, %v8636_v11  ;;  %v8650_v7 = vld [vmem:[#allocation162_spill] sm:$0xff]  ;;  %v8652_v11 = vld [vmem:[#allocation189_spill] sm:$0xff] }
0x112e   : > { %2526 = vmatpush.bf16.msrb.mxu1 %v3627_v13  ;;  %2539 = vmatpush.bf16.msrb.mxu2 %v3631_v12  ;;  %v3403_v13 = vor.u32 %v8639_v4, %v8638_v37  ;;  %v3407_v12 = vor.u32 %v8641_v61, %v8640_v0  ;;  %v8651_v9 = vld [vmem:[#allocation190_spill] sm:$0xff]  ;;  %v8653_v5 = vld [vmem:[#allocation161_spill] sm:$0xff]  ;;  %v8654_v37 = vld [vmem:[#allocation164_spill] sm:$0xff] }
0x112f   : > { %v8655_v4 = vld [vmem:[#allocation192_spill] sm:$0xff]  ;;  %v8656_v0 = vld [vmem:[#allocation191_spill] sm:$0xff] }
0x1130   : > { %v8657_v61 = vld [vmem:[#allocation163_spill] sm:$0xff] }
0x1131   : > { %2501 = vmatpush.bf16.msra.mxu3 %v3507_v19  ;;  %2514 = vmatpush.bf16.msrb.mxu0 %v3511_v10  ;;  %v3283_v19 = vor.u32 %v8643_v15, %v8642_v49  ;;  %v3287_v10 = vor.u32 %v8645_v18, %v8644_v17  ;;  %v8658_v49 = vld [vmem:[#allocation106_spill] sm:$0xff]  ;;  %v8660_v17 = vld [vmem:[#allocation133_spill] sm:$0xff] }
0x1132   : > { %2527 = vmatpush.bf16.msrb.mxu1 %v3515_v2  ;;  %2540 = vmatpush.bf16.msrb.mxu2 %v3519_v6  ;;  %v3291_v2 = vor.u32 %v8647_v8, %v8646_v1  ;;  %v3295_v6 = vor.u32 %v8649_v3, %v8648_v35  ;;  %v8659_v15 = vld [vmem:[#allocation134_spill] sm:$0xff]  ;;  %v8661_v18 = vld [vmem:[#allocation105_spill] sm:$0xff]  ;;  %v8662_v1 = vld [vmem:[#allocation108_spill] sm:$0xff] }
0x1133   : > { %v8663_v8 = vld [vmem:[#allocation136_spill] sm:$0xff]  ;;  %v8664_v35 = vld [vmem:[#allocation135_spill] sm:$0xff] }
0x1134   : > { %v8665_v3 = vld [vmem:[#allocation107_spill] sm:$0xff] }
0x1135   : > { %2502 = vmatpush.bf16.msra.mxu3 %v3395_v16  ;;  %2515 = vmatpush.bf16.msrb.mxu0 %v3399_v32  ;;  %v3171_v16 = vor.u32 %v8651_v9, %v8650_v7  ;;  %v3175_v32 = vor.u32 %v8653_v5, %v8652_v11  ;;  %v8666_v7 = vld [vmem:[#allocation50_spill] sm:$0xff]  ;;  %v8668_v11 = vld [vmem:[#allocation77_spill] sm:$0xff] }
0x1136   : > { %2528 = vmatpush.bf16.msrb.mxu1 %v3403_v13  ;;  %2541 = vmatpush.bf16.msrb.mxu2 %v3407_v12  ;;  %v3179_v13 = vor.u32 %v8655_v4, %v8654_v37  ;;  %v3183_v12 = vor.u32 %v8657_v61, %v8656_v0  ;;  %v8667_v9 = vld [vmem:[#allocation78_spill] sm:$0xff]  ;;  %v8669_v5 = vld [vmem:[#allocation49_spill] sm:$0xff]  ;;  %v8670_v37 = vld [vmem:[#allocation52_spill] sm:$0xff] }
0x1137   : > { %v8671_v4 = vld [vmem:[#allocation80_spill] sm:$0xff]  ;;  %v8672_v0 = vld [vmem:[#allocation79_spill] sm:$0xff] }
0x1138   : > { %v8673_v61 = vld [vmem:[#allocation51_spill] sm:$0xff] }
0x1139   : > { %2503 = vmatpush.bf16.msra.mxu3 %v3283_v19  ;;  %2516 = vmatpush.bf16.msrb.mxu0 %v3287_v10  ;;  %v3059_v19 = vor.u32 %v8659_v15, %v8658_v49  ;;  %v3063_v10 = vor.u32 %v8661_v18, %v8660_v17  ;;  %v8674_v49 = vld [vmem:[#allocation425_spill] sm:$0xff]  ;;  %v8676_v18 = vld [vmem:[#allocation448_spill] sm:$0xff] }
0x113a   : > { %2529 = vmatpush.bf16.msrb.mxu1 %v3291_v2  ;;  %2542 = vmatpush.bf16.msrb.mxu2 %v3295_v6  ;;  %v3067_v2 = vor.u32 %v8663_v8, %v8662_v1  ;;  %v3071_v6 = vor.u32 %v8665_v3, %v8664_v35  ;;  %v8675_v15 = vld [vmem:[#allocation449_spill] sm:$0xff]  ;;  %v8678_v1 = vld [vmem:[#allocation427_spill] sm:$0xff]  ;;  %v8680_v3 = vld [vmem:[#allocation450_spill] sm:$0xff] }
0x113b   : > { %v3747_v17 = vor.u32 %v8675_v15, %v8674_v49  ;;  %v8679_v8 = vld [vmem:[#allocation451_spill] sm:$0xff]  ;;  %v8688_v15 = vld [vmem:[#allocation402_spill] sm:$0xff] }
0x113c   : > { %v3755_v35 = vor.u32 %v8679_v8, %v8678_v1  ;;  %v8694_v1 = vld [vmem:[#allocation331_spill] sm:$0xff] }
0x113d   : > { %2504 = vmatpush.bf16.msra.mxu3 %v3171_v16  ;;  %2517 = vmatpush.bf16.msrb.mxu0 %v3175_v32  ;;  %v2947_v16 = vor.u32 %v8667_v9, %v8666_v7  ;;  %v2951_v32 = vor.u32 %v8669_v5, %v8668_v11  ;;  %v8681_v7 = vld [vmem:[#allocation426_spill] sm:$0xff]  ;;  %v8684_v5 = vld [vmem:[#allocation400_spill] sm:$0xff]  ;;  %v8695_v8 = vld [vmem:[#allocation355_spill] sm:$0xff] }
0x113e   : > { %2530 = vmatpush.bf16.msrb.mxu1 %v3179_v13  ;;  %2543 = vmatpush.bf16.msrb.mxu2 %v3183_v12  ;;  %v2955_v13 = vor.u32 %v8671_v4, %v8670_v37  ;;  %v2959_v12 = vor.u32 %v8673_v61, %v8672_v0  ;;  %v3759_v9 = vor.u32 %v8681_v7, %v8680_v3  ;;  %v8685_v37 = vld [vmem:[#allocation376_spill] sm:$0xff]  ;;  %v8686_v0 = vld [vmem:[#allocation379_spill] sm:$0xff]  ;;  %v8696_v3 = vld [vmem:[#allocation354_spill] sm:$0xff] }
0x113f   : > { %v3639_v4 = vor.u32 %v8685_v37, %v8684_v5  ;;  %v8687_v61 = vld [vmem:[#allocation403_spill] sm:$0xff]  ;;  %v8697_v7 = vld [vmem:[#allocation330_spill] sm:$0xff]  ;;  %v8700_v5 = vld [vmem:[#allocation304_spill] sm:$0xff] }
0x1140   : > { %v3643_v49 = vor.u32 %v8687_v61, %v8686_v0  ;;  %v8701_v37 = vld [vmem:[#allocation276_spill] sm:$0xff]  ;;  %v8702_v0 = vld [vmem:[#allocation279_spill] sm:$0xff] }
0x1141   : > { %2505 = vmatpush.bf16.msra.mxu3 %v3059_v19  ;;  %2518 = vmatpush.bf16.msrb.mxu0 %v3063_v10  ;;  %v8677_v19 = vld [vmem:[#allocation424_spill] sm:$0xff]  ;;  %v8703_v61 = vld [vmem:[#allocation307_spill] sm:$0xff] }
0x1142   : > { %2531 = vmatpush.bf16.msrb.mxu1 %v3067_v2  ;;  %2544 = vmatpush.bf16.msrb.mxu2 %v3071_v6  ;;  %v3751_v10 = vor.u32 %v8677_v19, %v8676_v18  ;;  %v8682_v2 = vld [vmem:[#allocation377_spill] sm:$0xff]  ;;  %v8689_v18 = vld [vmem:[#allocation378_spill] sm:$0xff] }
0x1143   : > { %v8683_v6 = vld [vmem:[#allocation401_spill] sm:$0xff]  ;;  %v3647_v19 = vor.u32 %v8689_v18, %v8688_v15  ;;  %v8704_v15 = vld [vmem:[#allocation306_spill] sm:$0xff] }
0x1144   : > { %v3635_v11 = vor.u32 %v8683_v6, %v8682_v2  ;;  %v8698_v2 = vld [vmem:[#allocation277_spill] sm:$0xff]  ;;  %v8705_v18 = vld [vmem:[#allocation278_spill] sm:$0xff] }
0x1145   : > { %2506 = vmatpush.bf16.msra.mxu3 %v2947_v16  ;;  %2519 = vmatpush.bf16.msrb.mxu0 %v2951_v32  ;;  %v8690_v16 = vld [vmem:[#allocation329_spill] sm:$0xff] }
0x1146   : > { %2532 = vmatpush.bf16.msrb.mxu1 %v2955_v13  ;;  %2545 = vmatpush.bf16.msrb.mxu2 %v2959_v12  ;;  %v8691_v32 = vld [vmem:[#allocation353_spill] sm:$0xff]  ;;  %v8692_v12 = vld [vmem:[#allocation352_spill] sm:$0xff] }
0x1147   : > { %v3523_v13 = vor.u32 %v8691_v32, %v8690_v16  ;;  %v8699_v6 = vld [vmem:[#allocation305_spill] sm:$0xff]  ;;  %v8706_v16 = vld [vmem:[#allocation222_spill] sm:$0xff] }
0x1148   : > { %2507 = vmatmul.bf16.vlgmr.msra.gmra.mxu3 %v7270_v14  ;;  %2520 = vmatmul.bf16.vlgmr.msrb.gmra.mxu0 %v7270_v14  ;;  %v8707_v32 = vld [vmem:[#allocation250_spill] sm:$0xff] }
0x1149   : > { %2551 = vmatpush.bf16.msrb.mxu3 %v3747_v17  ;;  %2564 = vmatpush.bf16.msra.mxu0 %v3751_v10  ;;  %v8693_v17 = vld [vmem:[#allocation328_spill] sm:$0xff] }
0x114a   : > { %2577 = vmatpush.bf16.msra.mxu1 %v3755_v35  ;;  %2590 = vmatpush.bf16.msra.mxu2 %v3759_v9  ;;  %v3527_v10 = vor.u32 %v8693_v17, %v8692_v12  ;;  %v3531_v35 = vor.u32 %v8695_v8, %v8694_v1  ;;  %v3535_v9 = vor.u32 %v8697_v7, %v8696_v3  ;;  %v8708_v12 = vld [vmem:[#allocation249_spill] sm:$0xff]  ;;  %v8710_v1 = vld [vmem:[#allocation224_spill] sm:$0xff]  ;;  %v8712_v3 = vld [vmem:[#allocation251_spill] sm:$0xff] }
0x114b   : > { %2533 = vmatmul.bf16.vlgmr.msrb.gmra.mxu1 %v7270_v14  ;;  %2546 = vmatmul.bf16.vlgmr.msrb.gmra.mxu2 %v7270_v14  ;;  %v8709_v17 = vld [vmem:[#allocation221_spill] sm:$0xff]  ;;  %v8711_v8 = vld [vmem:[#allocation252_spill] sm:$0xff]  ;;  %v8713_v7 = vld [vmem:[#allocation223_spill] sm:$0xff] }
0x114d   : > { %2552 = vmatpush.bf16.msrb.mxu3 %v3635_v11  ;;  %2565 = vmatpush.bf16.msra.mxu0 %v3639_v4  ;;  %v3411_v11 = vor.u32 %v8699_v6, %v8698_v2  ;;  %v3415_v4 = vor.u32 %v8701_v37, %v8700_v5  ;;  %v8714_v2 = vld [vmem:[#allocation166_spill] sm:$0xff]  ;;  %v8716_v5 = vld [vmem:[#allocation193_spill] sm:$0xff] }
0x114e   : > { %2578 = vmatpush.bf16.msra.mxu1 %v3643_v49  ;;  %2591 = vmatpush.bf16.msra.mxu2 %v3647_v19  ;;  %v3419_v49 = vor.u32 %v8703_v61, %v8702_v0  ;;  %v3423_v19 = vor.u32 %v8705_v18, %v8704_v15  ;;  %v8715_v6 = vld [vmem:[#allocation194_spill] sm:$0xff]  ;;  %v8717_v37 = vld [vmem:[#allocation165_spill] sm:$0xff]  ;;  %v8718_v0 = vld [vmem:[#allocation168_spill] sm:$0xff] }
0x114f   : > { %v8719_v61 = vld [vmem:[#allocation196_spill] sm:$0xff]  ;;  %v8720_v15 = vld [vmem:[#allocation195_spill] sm:$0xff] }
0x1150   : > { %v8721_v18 = vld [vmem:[#allocation167_spill] sm:$0xff] }
0x1151   : > { %2553 = vmatpush.bf16.msrb.mxu3 %v3523_v13  ;;  %2566 = vmatpush.bf16.msra.mxu0 %v3527_v10  ;;  %v3299_v13 = vor.u32 %v8707_v32, %v8706_v16  ;;  %v3303_v10 = vor.u32 %v8709_v17, %v8708_v12  ;;  %v8722_v16 = vld [vmem:[#allocation110_spill] sm:$0xff]  ;;  %v8724_v12 = vld [vmem:[#allocation137_spill] sm:$0xff] }
0x1152   : > { %2579 = vmatpush.bf16.msra.mxu1 %v3531_v35  ;;  %2592 = vmatpush.bf16.msra.mxu2 %v3535_v9  ;;  %v3307_v35 = vor.u32 %v8711_v8, %v8710_v1  ;;  %v3311_v9 = vor.u32 %v8713_v7, %v8712_v3  ;;  %v8723_v32 = vld [vmem:[#allocation138_spill] sm:$0xff]  ;;  %v8725_v17 = vld [vmem:[#allocation109_spill] sm:$0xff]  ;;  %v8726_v1 = vld [vmem:[#allocation112_spill] sm:$0xff] }
0x1153   : > { %v8727_v8 = vld [vmem:[#allocation140_spill] sm:$0xff]  ;;  %v8728_v3 = vld [vmem:[#allocation139_spill] sm:$0xff] }
0x1154   : > { %v8729_v7 = vld [vmem:[#allocation111_spill] sm:$0xff] }
0x1155   : > { %2554 = vmatpush.bf16.msrb.mxu3 %v3411_v11  ;;  %2567 = vmatpush.bf16.msra.mxu0 %v3415_v4  ;;  %v3187_v11 = vor.u32 %v8715_v6, %v8714_v2  ;;  %v3191_v4 = vor.u32 %v8717_v37, %v8716_v5  ;;  %v8730_v2 = vld [vmem:[#allocation54_spill] sm:$0xff]  ;;  %v8732_v5 = vld [vmem:[#allocation81_spill] sm:$0xff] }
0x1156   : > { %2580 = vmatpush.bf16.msra.mxu1 %v3419_v49  ;;  %2593 = vmatpush.bf16.msra.mxu2 %v3423_v19  ;;  %v3195_v49 = vor.u32 %v8719_v61, %v8718_v0  ;;  %v3199_v19 = vor.u32 %v8721_v18, %v8720_v15  ;;  %v8731_v6 = vld [vmem:[#allocation82_spill] sm:$0xff]  ;;  %v8733_v37 = vld [vmem:[#allocation53_spill] sm:$0xff]  ;;  %v8734_v0 = vld [vmem:[#allocation56_spill] sm:$0xff] }
0x1157   : > { %v8735_v61 = vld [vmem:[#allocation84_spill] sm:$0xff]  ;;  %v8736_v15 = vld [vmem:[#allocation83_spill] sm:$0xff] }
0x1158   : > { %v8737_v18 = vld [vmem:[#allocation55_spill] sm:$0xff] }
0x1159   : > { %2555 = vmatpush.bf16.msrb.mxu3 %v3299_v13  ;;  %2568 = vmatpush.bf16.msra.mxu0 %v3303_v10  ;;  %v3075_v13 = vor.u32 %v8723_v32, %v8722_v16  ;;  %v3079_v10 = vor.u32 %v8725_v17, %v8724_v12  ;;  %v8738_v16 = vld [vmem:[#allocation429_spill] sm:$0xff]  ;;  %v8741_v17 = vld [vmem:[#allocation428_spill] sm:$0xff] }
0x115a   : > { %2581 = vmatpush.bf16.msra.mxu1 %v3307_v35  ;;  %2594 = vmatpush.bf16.msra.mxu2 %v3311_v9  ;;  %v3083_v35 = vor.u32 %v8727_v8, %v8726_v1  ;;  %v3087_v9 = vor.u32 %v8729_v7, %v8728_v3  ;;  %v8739_v32 = vld [vmem:[#allocation453_spill] sm:$0xff]  ;;  %v8742_v1 = vld [vmem:[#allocation431_spill] sm:$0xff]  ;;  %v8744_v7 = vld [vmem:[#allocation454_spill] sm:$0xff] }
0x115b   : > { %v3763_v12 = vor.u32 %v8739_v32, %v8738_v16  ;;  %v8743_v8 = vld [vmem:[#allocation455_spill] sm:$0xff] }
0x115c   : > { %v3771_v3 = vor.u32 %v8743_v8, %v8742_v1  ;;  %v8751_v16 = vld [vmem:[#allocation383_spill] sm:$0xff]  ;;  %v8755_v1 = vld [vmem:[#allocation333_spill] sm:$0xff] }
0x115d   : > { %2556 = vmatpush.bf16.msrb.mxu3 %v3187_v11  ;;  %2569 = vmatpush.bf16.msra.mxu0 %v3191_v4  ;;  %v2963_v11 = vor.u32 %v8731_v6, %v8730_v2  ;;  %v2967_v4 = vor.u32 %v8733_v37, %v8732_v5  ;;  %v8745_v2 = vld [vmem:[#allocation430_spill] sm:$0xff]  ;;  %v8747_v6 = vld [vmem:[#allocation405_spill] sm:$0xff]  ;;  %v8748_v37 = vld [vmem:[#allocation404_spill] sm:$0xff] }
0x115e   : > { %2582 = vmatpush.bf16.msra.mxu1 %v3195_v49  ;;  %2595 = vmatpush.bf16.msra.mxu2 %v3199_v19  ;;  %v2971_v49 = vor.u32 %v8735_v61, %v8734_v0  ;;  %v2975_v19 = vor.u32 %v8737_v18, %v8736_v15  ;;  %v8749_v0 = vld [vmem:[#allocation380_spill] sm:$0xff]  ;;  %v8752_v32 = vld [vmem:[#allocation407_spill] sm:$0xff]  ;;  %v8756_v8 = vld [vmem:[#allocation357_spill] sm:$0xff] }
0x115f   : > { %v3655_v61 = vor.u32 %v8749_v0, %v8748_v37  ;;  %v8750_v15 = vld [vmem:[#allocation456_spill] sm:$0xff]  ;;  %v8759_v37 = vld [vmem:[#allocation335_spill] sm:$0xff] }
0x1160   : > { %v1116_v18 = vperm.slane %v8750_v15, 1  ;;  %v8760_v0 = vld [vmem:[#allocation359_spill] sm:$0xff] }
0x1161   : > { %2557 = vmatpush.bf16.msrb.mxu3 %v3075_v13  ;;  %2570 = vmatpush.bf16.msra.mxu0 %v3079_v10  ;;  %v8740_v13 = vld [vmem:[#allocation452_spill] sm:$0xff] }
0x1162   : > { %2583 = vmatpush.bf16.msra.mxu1 %v3083_v35  ;;  %2596 = vmatpush.bf16.msra.mxu2 %v3087_v9  ;;  %v3767_v10 = vor.u32 %v8741_v17, %v8740_v13  ;;  %v3775_v35 = vor.u32 %v8745_v2, %v8744_v7  ;;  %v8746_v9 = vld [vmem:[#allocation381_spill] sm:$0xff]  ;;  %v3659_v13 = vor.u32 %v8752_v32, %v8751_v16  ;;  %v8753_v17 = vld [vmem:[#allocation406_spill] sm:$0xff]  ;;  %v8757_v7 = vld [vmem:[#allocation356_spill] sm:$0xff] }
0x1163   : > { %v3651_v5 = vor.u32 %v8747_v6, %v8746_v9  ;;  %v8758_v2 = vld [vmem:[#allocation332_spill] sm:$0xff]  ;;  %v7584_v6 = vstv %s385_s15  ;;  %v3547_v16 = vor.u32 %v8760_v0, %v8759_v37 }
0x1164   : > { %v2313_v9 = vpop.f32.mrf.mxu0  ;;  %v2672_v37 = vld [vmem:[%s7897_s9 + $0x18] sm:$0xff] }
0x1165   : > { %2558 = vmatpush.bf16.msrb.mxu3 %v2963_v11  ;;  %2571 = vmatpush.bf16.msra.mxu0 %v2967_v4  ;;  %v8754_v11 = vld [vmem:[#allocation382_spill] sm:$0xff]  ;;  %v2314_v32 = vadd.f32 %v2313_v9, %v1116_v18  ;;  %v2655_v18 = vld [vmem:[%s7897_s9] sm:$0xff] }
0x1166   : > { %2584 = vmatpush.bf16.msra.mxu1 %v2971_v49  ;;  %2597 = vmatpush.bf16.msra.mxu2 %v2975_v19  ;;  %v3663_v4 = vor.u32 %v8754_v11, %v8753_v17  ;;  %v7567_v49 = vstv %s384_s2  ;;  %v2662_v19 = vld [vmem:[%s7897_s9 + $0x8] sm:$0xff]  ;;  %v2326_v11 = vpop.f32.mrf.mxu1 }
0x1167   : > { %v2663_v17 = vmul.f32 %v2662_v19, %v7567_v49  ;;  %v1118_v19 = vperm.slane %v8750_v15, 3 }
0x1168   : > { %2559 = vmatmul.bf16.vlgmr.msrb.gmra.mxu3 %v7270_v14  ;;  %2572 = vmatmul.bf16.vlgmr.msra.gmra.mxu0 %v7270_v14 }
0x1169   : > { %2603 = vmatpush.bf16.msra.mxu3 %v3763_v12  ;;  %2616 = vmatpush.bf16.msrb.mxu0 %v3767_v10  ;;  %v1117_v12 = vperm.slane %v8750_v15, 2  ;;  %v2667_v10 = vld [vmem:[%s7897_s9 + $0x10] sm:$0xff] }
0x116a   : > { %2629 = vmatpush.bf16.msrb.mxu1 %v3771_v3  ;;  %2642 = vmatpush.bf16.msrb.mxu2 %v3775_v35  ;;  %v3539_v3 = vor.u32 %v8756_v8, %v8755_v1  ;;  %v3543_v35 = vor.u32 %v8758_v2, %v8757_v7  ;;  %v3551_v1 = vor.u32 %v8762_v21, %v8761_v20  ;;  %v8764_v20 = vld [vmem:[#allocation309_spill] sm:$0xff] }
0x116b   : > { %2585 = vmatmul.bf16.vlgmr.msra.gmra.mxu1 %v7270_v14  ;;  %2598 = vmatmul.bf16.vlgmr.msra.gmra.mxu2 %v7270_v14  ;;  %v2327_v8 = vadd.f32 %v2326_v11, %v1117_v12  ;;  %v2668_v7 = vmul.f32 %v2667_v10, %v7567_v49  ;;  %v2664_v2 = vmul.f32 %v7584_v6, %v2314_v32  ;;  %v8765_v12 = vld [vmem:[#allocation308_spill] sm:$0xff]  ;;  %v8767_v32 = vld [vmem:[#allocation283_spill] sm:$0xff] }
0x116c   : > { %v8766_v10 = vld [vmem:[#allocation280_spill] sm:$0xff]  ;;  %v8768_v11 = vld [vmem:[#allocation311_spill] sm:$0xff] }
0x116d   : > { %2604 = vmatpush.bf16.msra.mxu3 %v3651_v5  ;;  %2617 = vmatpush.bf16.msrb.mxu0 %v3655_v61  ;;  %v1115_v5 = vperm.slane %v8750_v15, 0  ;;  %v2669_v61 = vmul.f32 %v7584_v6, %v2327_v8  ;;  %v3431_v9 = vor.u32 %v8766_v10, %v8765_v12  ;;  %v3435_v8 = vor.u32 %v8768_v11, %v8767_v32  ;;  %v8772_v12 = vld [vmem:[#allocation254_spill] sm:$0xff] }
0x116e   : > { %2630 = vmatpush.bf16.msrb.mxu1 %v3659_v13  ;;  %2643 = vmatpush.bf16.msrb.mxu2 %v3663_v4  ;;  %v2665_v13 = vsub.f32 %v2663_v17, %v2664_v2  ;;  %v8763_v4 = vld [vmem:[#allocation281_spill] sm:$0xff]  ;;  %v2300_v17 = vpop.f32.mrf.mxu3 }
0x116f   : > { %v3427_v21 = vor.u32 %v8764_v20, %v8763_v4  ;;  %v2670_v0 = vsub.f32 %v2668_v7, %v2669_v61  ;;  %v2301_v2 = vadd.f32 %v2300_v17, %v1115_v5  ;;  %v2657_v4 = vmul.f32 %v7567_v49, %v2655_v18  ;;  %v2339_v20 = vpop.f32.mrf.mxu2  ;;  %v2315_v7 = vpop.f32.mrf.mxu0  ;;  %v8771_v61 = vld [vmem:[#allocation226_spill] sm:$0xff]  ;;  %v8774_v5 = vld [vmem:[#allocation225_spill] sm:$0xff]  ;;  %v8778_v17 = vld [vmem:[#allocation227_spill] sm:$0xff] }
0x1170   : > { %2666 = vst [vmem:[%s7897_s9 + $0x8] sm:$0xff] %v2665_v13  ;;  %v3315_v10 = vor.u32 %v8772_v12, %v8771_v61  ;;  %v8773_v13 = vld [vmem:[#allocation253_spill] sm:$0xff]  ;;  %v2328_v18 = vpop.f32.mrf.mxu1  ;;  %v8780_v7 = vld [vmem:[#allocation198_spill] sm:$0xff]  ;;  %v1120_v12 = vperm.slane %v8750_v15, 5 }
0x1171   : > { %2605 = vmatpush.bf16.msra.mxu3 %v3539_v3  ;;  %2618 = vmatpush.bf16.msrb.mxu0 %v3543_v35  ;;  %v8770_v3 = vld [vmem:[#allocation282_spill] sm:$0xff]  ;;  %2671 = vst [vmem:[%s7897_s9 + $0x10] sm:$0xff] %v2670_v0  ;;  %v3319_v32 = vor.u32 %v8774_v5, %v8773_v13  ;;  %v8775_v0 = vld [vmem:[#allocation228_spill] sm:$0xff]  ;;  %v8782_v61 = vld [vmem:[#allocation169_spill] sm:$0xff] }
0x1172   : > { %2631 = vmatpush.bf16.msrb.mxu1 %v3547_v16  ;;  %2644 = vmatpush.bf16.msrb.mxu2 %v3551_v1  ;;  %v3439_v35 = vor.u32 %v8770_v3, %v8769_v22  ;;  %v2340_v16 = vadd.f32 %v2339_v20, %v1118_v19  ;;  %v2673_v1 = vmul.f32 %v2672_v37, %v7567_v49  ;;  %v8776_v19 = vld [vmem:[#allocation256_spill] sm:$0xff]  ;;  %v8777_v37 = vld [vmem:[#allocation255_spill] sm:$0xff]  ;;  %v2682_v18 = vld [vmem:[%s7897_s9 + $0x28] sm:$0xff] }
0x1173   : > { %v2659_v22 = vmul.f32 %v7584_v6, %v2301_v2  ;;  %v3323_v3 = vor.u32 %v8776_v19, %v8775_v0  ;;  %v8779_v2 = vld [vmem:[#allocation170_spill] sm:$0xff]  ;;  %v8785_v13 = vld [vmem:[#allocation199_spill] sm:$0xff] }
0x1174   : > { %v2674_v11 = vmul.f32 %v7584_v6, %v2340_v16  ;;  %v2687_v19 = vld [vmem:[%s7897_s9 + $0x30] sm:$0xff] }
0x1175   : > { %2606 = vmatpush.bf16.msra.mxu3 %v3427_v21  ;;  %2619 = vmatpush.bf16.msrb.mxu0 %v3431_v9  ;;  %v3327_v21 = vor.u32 %v8778_v17, %v8777_v37  ;;  %v2660_v9 = vsub.f32 %v2657_v4, %v2659_v22  ;;  %v8783_v4 = vld [vmem:[#allocation172_spill] sm:$0xff]  ;;  %v8788_v37 = vld [vmem:[#allocation142_spill] sm:$0xff] }
0x1176   : > { %2632 = vmatpush.bf16.msrb.mxu1 %v3435_v8  ;;  %2645 = vmatpush.bf16.msrb.mxu2 %v3439_v35  ;;  %v2675_v20 = vsub.f32 %v2673_v1, %v2674_v11  ;;  %v3203_v8 = vor.u32 %v8780_v7, %v8779_v2  ;;  %v8781_v35 = vld [vmem:[#allocation197_spill] sm:$0xff]  ;;  %v8784_v1 = vld [vmem:[#allocation200_spill] sm:$0xff]  ;;  %v1121_v11 = vperm.slane %v8750_v15, 6 }
0x1177   : > { %2661 = vst [vmem:[%s7897_s9] sm:$0xff] %v2660_v9  ;;  %v3207_v16 = vor.u32 %v8782_v61, %v8781_v35  ;;  %v3211_v22 = vor.u32 %v8784_v1, %v8783_v4  ;;  %v2341_v0 = vpop.f32.mrf.mxu2  ;;  %v8790_v9 = vld [vmem:[#allocation113_spill] sm:$0xff]  ;;  %v2365_v2 = vpop.f32.mrf.mxu0  ;;  %v8791_v7 = vld [vmem:[#allocation116_spill] sm:$0xff]  ;;  %v2683_v1 = vmul.f32 %v2682_v18, %v7567_v49  ;;  %v1122_v18 = vperm.slane %v8750_v15, 7 }
0x1178   : > { %2676 = vst [vmem:[%s7897_s9 + $0x18] sm:$0xff] %v2675_v20  ;;  %v8792_v35 = vld [vmem:[#allocation144_spill] sm:$0xff]  ;;  %v2366_v4 = vadd.f32 %v2365_v2, %v1120_v12  ;;  %v2677_v12 = vld [vmem:[%s7897_s9 + $0x20] sm:$0xff] }
0x1179   : > { %2607 = vmatpush.bf16.msra.mxu3 %v3315_v10  ;;  %2620 = vmatpush.bf16.msrb.mxu0 %v3319_v32  ;;  %v8786_v10 = vld [vmem:[#allocation171_spill] sm:$0xff]  ;;  %v2302_v32 = vpop.f32.mrf.mxu3  ;;  %v3099_v61 = vor.u32 %v8792_v35, %v8791_v7  ;;  %v2692_v7 = vld [vmem:[%s7897_s9 + $0x38] sm:$0xff] }
0x117a   : > { %2633 = vmatpush.bf16.msrb.mxu1 %v3323_v3  ;;  %2646 = vmatpush.bf16.msrb.mxu2 %v3327_v21  ;;  %v3215_v5 = vor.u32 %v8786_v10, %v8785_v13  ;;  %v8787_v3 = vld [vmem:[#allocation114_spill] sm:$0xff]  ;;  %v8789_v21 = vld [vmem:[#allocation141_spill] sm:$0xff]  ;;  %v2378_v13 = vpop.f32.mrf.mxu1  ;;  %v8793_v10 = vld [vmem:[#allocation143_spill] sm:$0xff] }
0x117b   : > { %v3091_v17 = vor.u32 %v8788_v37, %v8787_v3  ;;  %v3095_v20 = vor.u32 %v8790_v9, %v8789_v21  ;;  %v8794_v32 = vld [vmem:[#allocation115_spill] sm:$0xff]  ;;  %v2379_v23 = vadd.f32 %v2378_v13, %v1121_v11  ;;  %v2688_v3 = vmul.f32 %v2687_v19, %v7567_v49  ;;  %v8796_v21 = vld [vmem:[#allocation86_spill] sm:$0xff]  ;;  %v8797_v9 = vld [vmem:[#allocation85_spill] sm:$0xff] }
0x117c   : > { %v3103_v0 = vor.u32 %v8794_v32, %v8793_v10  ;;  %v2684_v37 = vmul.f32 %v7584_v6, %v2366_v4  ;;  %v8798_v19 = vld [vmem:[#allocation57_spill] sm:$0xff]  ;;  %v8799_v35 = vld [vmem:[#allocation60_spill] sm:$0xff]  ;;  %v8801_v10 = vld [vmem:[#allocation87_spill] sm:$0xff] }
0x117d   : > { %2608 = vmatpush.bf16.msra.mxu3 %v3203_v8  ;;  %2621 = vmatpush.bf16.msrb.mxu0 %v3207_v16  ;;  %v1119_v8 = vperm.slane %v8750_v15, 4  ;;  %v2689_v16 = vmul.f32 %v7584_v6, %v2379_v23  ;;  %v2983_v2 = vor.u32 %v8798_v19, %v8797_v9  ;;  %v8800_v4 = vld [vmem:[#allocation88_spill] sm:$0xff]  ;;  %v8803_v9 = vld [vmem:[#allocation457_spill] sm:$0xff] }
0x117e   : > { %2634 = vmatpush.bf16.msrb.mxu1 %v3211_v22  ;;  %2647 = vmatpush.bf16.msrb.mxu2 %v3215_v5  ;;  %v2685_v22 = vsub.f32 %v2683_v1, %v2684_v37  ;;  %v8795_v5 = vld [vmem:[#allocation58_spill] sm:$0xff]  ;;  %v2987_v13 = vor.u32 %v8800_v4, %v8799_v35  ;;  %v2678_v37 = vmul.f32 %v2677_v12, %v7567_v49  ;;  %v1124_v19 = vperm.slane %v8803_v9, 1 }
0x117f   : > { %v2979_v11 = vor.u32 %v8796_v21, %v8795_v5  ;;  %v2690_v23 = vsub.f32 %v2688_v3, %v2689_v16  ;;  %v2391_v5 = vpop.f32.mrf.mxu2  ;;  %v2367_v3 = vpop.f32.mrf.mxu0 }
0x1180   : > { %2686 = vst [vmem:[%s7897_s9 + $0x28] sm:$0xff] %v2685_v22 }
0x1181   : > { %2609 = vmatpush.bf16.msra.mxu3 %v3091_v17  ;;  %2622 = vmatpush.bf16.msrb.mxu0 %v3095_v20  ;;  %v8802_v17 = vld [vmem:[#allocation59_spill] sm:$0xff]  ;;  %v2352_v1 = vpop.f32.mrf.mxu3  ;;  %2691 = vst [vmem:[%s7897_s9 + $0x30] sm:$0xff] %v2690_v23 }
0x1182   : > { %2635 = vmatpush.bf16.msrb.mxu1 %v3099_v61  ;;  %2648 = vmatpush.bf16.msrb.mxu2 %v3103_v0  ;;  %v2991_v20 = vor.u32 %v8802_v17, %v8801_v10  ;;  %v2353_v32 = vadd.f32 %v2352_v1, %v1119_v8  ;;  %v2392_v61 = vadd.f32 %v2391_v5, %v1122_v18  ;;  %v2380_v21 = vpop.f32.mrf.mxu1  ;;  %v2707_v23 = vld [vmem:[%s7897_s9 + $0x50] sm:$0xff]  ;;  %v1123_v1 = vperm.slane %v8803_v9, 0 }
0x1183   : > { %v2693_v0 = vmul.f32 %v2692_v7, %v7567_v49  ;;  %v1125_v7 = vperm.slane %v8803_v9, 2  ;;  %v2708_v17 = vmul.f32 %v2707_v23, %v7567_v49  ;;  %v1126_v5 = vperm.slane %v8803_v9, 3 }
0x1184   : > { %v2679_v16 = vmul.f32 %v7584_v6, %v2353_v32  ;;  %v2694_v8 = vmul.f32 %v7584_v6, %v2392_v61 }
0x1185   : > { %2610 = vmatpush.bf16.msra.mxu3 %v2979_v11  ;;  %2623 = vmatpush.bf16.msrb.mxu0 %v2983_v2  ;;  %v2702_v2 = vld [vmem:[%s7897_s9 + $0x48] sm:$0xff] }
0x1186   : > { %2636 = vmatpush.bf16.msrb.mxu1 %v2987_v13  ;;  %2649 = vmatpush.bf16.msrb.mxu2 %v2991_v20  ;;  %v2680_v22 = vsub.f32 %v2678_v37, %v2679_v16  ;;  %v2695_v12 = vsub.f32 %v2693_v0, %v2694_v8  ;;  %v2703_v4 = vmul.f32 %v2702_v2, %v7567_v49  ;;  %v2697_v37 = vld [vmem:[%s7897_s9 + $0x40] sm:$0xff]  ;;  %v2712_v0 = vld [vmem:[%s7897_s9 + $0x58] sm:$0xff] }
0x1187   : > { %v2393_v11 = vpop.f32.mrf.mxu2  ;;  %v2417_v35 = vpop.f32.mrf.mxu0  ;;  %v2698_v8 = vmul.f32 %v2697_v37, %v7567_v49 }
0x1188   : > { %2611 = vmatmul.bf16.vlgmr.msra.gmra.mxu3 %v7270_v14  ;;  %2624 = vmatmul.bf16.vlgmr.msrb.gmra.mxu0 %v7270_v14  ;;  %2681 = vst [vmem:[%s7897_s9 + $0x20] sm:$0xff] %v2680_v22 }
0x1189   : > { %2637 = vmatmul.bf16.vlgmr.msrb.gmra.mxu1 %v7270_v14  ;;  %2650 = vmatmul.bf16.vlgmr.msrb.gmra.mxu2 %v7270_v14  ;;  %2696 = vst [vmem:[%s7897_s9 + $0x38] sm:$0xff] %v2695_v12  ;;  %v2354_v18 = vpop.f32.mrf.mxu3  ;;  %v2418_v14 = vadd.f32 %v2417_v35, %v1124_v19 }
0x118a   : > { %v2430_v13 = vpop.f32.mrf.mxu1  ;;  %v2713_v18 = vmul.f32 %v2712_v0, %v7567_v49 }
0x118b   : > { %v2431_v10 = vadd.f32 %v2430_v13, %v1125_v7  ;;  %v2704_v20 = vmul.f32 %v7584_v6, %v2418_v14  ;;  %v1128_v13 = vperm.slane %v8803_v9, 5 }
0x118d   : > { %v2709_v32 = vmul.f32 %v7584_v6, %v2431_v10  ;;  %v2705_v61 = vsub.f32 %v2703_v4, %v2704_v20  ;;  %v2722_v10 = vld [vmem:[%s7897_s9 + $0x68] sm:$0xff]  ;;  %v2727_v20 = vld [vmem:[%s7897_s9 + $0x70] sm:$0xff] }
0x118e   : > { %v2723_v37 = vmul.f32 %v2722_v10, %v7567_v49  ;;  %v2728_v0 = vmul.f32 %v2727_v20, %v7567_v49 }
0x118f   : > { %v2710_v3 = vsub.f32 %v2708_v17, %v2709_v32  ;;  %2706 = vst [vmem:[%s7897_s9 + $0x48] sm:$0xff] %v2705_v61  ;;  %v2443_v22 = vpop.f32.mrf.mxu2  ;;  %v2419_v11 = vpop.f32.mrf.mxu0  ;;  %v1129_v17 = vperm.slane %v8803_v9, 6 }
0x1190   : > { %v2444_v12 = vadd.f32 %v2443_v22, %v1126_v5  ;;  %v1130_v22 = vperm.slane %v8803_v9, 7 }
0x1191   : > { %v2404_v16 = vpop.f32.mrf.mxu3  ;;  %2711 = vst [vmem:[%s7897_s9 + $0x50] sm:$0xff] %v2710_v3 }
0x1192   : > { %v2405_v21 = vadd.f32 %v2404_v16, %v1123_v1  ;;  %v2432_v2 = vpop.f32.mrf.mxu1  ;;  %v2714_v7 = vmul.f32 %v7584_v6, %v2444_v12  ;;  %v1127_v16 = vperm.slane %v8803_v9, 4 }
0x1194   : > { %v2699_v19 = vmul.f32 %v7584_v6, %v2405_v21  ;;  %v2715_v35 = vsub.f32 %v2713_v18, %v2714_v7  ;;  %v2732_v18 = vld [vmem:[%s7897_s9 + $0x78] sm:$0xff] }
0x1196   : > { %v2700_v23 = vsub.f32 %v2698_v8, %v2699_v19  ;;  %2716 = vst [vmem:[%s7897_s9 + $0x58] sm:$0xff] %v2715_v35  ;;  %v2717_v8 = vld [vmem:[%s7897_s9 + $0x60] sm:$0xff] }
0x1197   : > { %v2445_v4 = vpop.f32.mrf.mxu2  ;;  %v2718_v7 = vmul.f32 %v2717_v8, %v7567_v49 }
0x1198   : > { %2701 = vst [vmem:[%s7897_s9 + $0x40] sm:$0xff] %v2700_v23 }
0x1199   : > { %v2406_v14 = vpop.f32.mrf.mxu3 }
0x119a   : > { %v2733_v14 = vmul.f32 %v2732_v18, %v7567_v49 }
0x11a5   : > { %v2469_v1 = vpop.f32.mrf.mxu0 }
0x11a6   : > { %v2470_v32 = vadd.f32 %v2469_v1, %v1128_v13 }
0x11a8   : > { %v2482_v5 = vpop.f32.mrf.mxu1  ;;  %v2724_v3 = vmul.f32 %v7584_v6, %v2470_v32 }
0x11a9   : > { %v2483_v61 = vadd.f32 %v2482_v5, %v1129_v17  ;;  %v8804_v5 = vld [vmem:[#allocation458_spill] sm:$0xff] }
0x11aa   : > { %v2725_v12 = vsub.f32 %v2723_v37, %v2724_v3  ;;  %v1133_v3 = vperm.slane %v8804_v5, 2 }
0x11ab   : > { %v2729_v21 = vmul.f32 %v7584_v6, %v2483_v61  ;;  %v2456_v19 = vpop.f32.mrf.mxu3  ;;  %v1132_v61 = vperm.slane %v8804_v5, 1 }
0x11ac   : > { %2726 = vst [vmem:[%s7897_s9 + $0x68] sm:$0xff] %v2725_v12  ;;  %v2457_v2 = vadd.f32 %v2456_v19, %v1127_v16  ;;  %v2747_v16 = vld [vmem:[%s7897_s9 + $0x90] sm:$0xff] }
0x11ad   : > { %v2730_v11 = vsub.f32 %v2728_v0, %v2729_v21  ;;  %v2471_v4 = vpop.f32.mrf.mxu0  ;;  %v2742_v0 = vld [vmem:[%s7897_s9 + $0x88] sm:$0xff] }
0x11ae   : > { %v2495_v23 = vpop.f32.mrf.mxu2  ;;  %v2719_v13 = vmul.f32 %v7584_v6, %v2457_v2  ;;  %v1131_v2 = vperm.slane %v8804_v5, 0  ;;  %v2752_v4 = vld [vmem:[%s7897_s9 + $0x98] sm:$0xff] }
0x11af   : > { %2731 = vst [vmem:[%s7897_s9 + $0x70] sm:$0xff] %v2730_v11  ;;  %v2496_v35 = vadd.f32 %v2495_v23, %v1130_v22  ;;  %v2743_v22 = vmul.f32 %v2742_v0, %v7567_v49  ;;  %v2748_v11 = vmul.f32 %v2747_v16, %v7567_v49  ;;  %v2737_v23 = vld [vmem:[%s7897_s9 + $0x80] sm:$0xff] }
0x11b0   : > { %v2484_v10 = vpop.f32.mrf.mxu1  ;;  %v2720_v20 = vsub.f32 %v2718_v7, %v2719_v13 }
0x11b1   : > { %v2734_v17 = vmul.f32 %v7584_v6, %v2496_v35  ;;  %v1134_v35 = vperm.slane %v8804_v5, 3 }
0x11b2   : > { %2721 = vst [vmem:[%s7897_s9 + $0x60] sm:$0xff] %v2720_v20  ;;  %v2738_v20 = vmul.f32 %v2737_v23, %v7567_v49 }
0x11b3   : > { %v2735_v1 = vsub.f32 %v2733_v14, %v2734_v17  ;;  %v2458_v32 = vpop.f32.mrf.mxu3 }
0x11b5   : > { %2736 = vst [vmem:[%s7897_s9 + $0x78] sm:$0xff] %v2735_v1 }
0x11b6   : > { %v2497_v37 = vpop.f32.mrf.mxu2 }
0x11b7   : > { %v2753_v37 = vmul.f32 %v2752_v4, %v7567_v49 }
0x11c5   : > { %v2521_v21 = vpop.f32.mrf.mxu0 }
0x11c6   : > { %v2522_v8 = vadd.f32 %v2521_v21, %v1132_v61 }
0x11c8   : > { %v2534_v12 = vpop.f32.mrf.mxu1  ;;  %v2744_v19 = vmul.f32 %v7584_v6, %v2522_v8 }
0x11c9   : > { %v2535_v18 = vadd.f32 %v2534_v12, %v1133_v3 }
0x11ca   : > { %v2745_v14 = vsub.f32 %v2743_v22, %v2744_v19  ;;  %v1137_v19 = vperm.slane %v8804_v5, 6 }
0x11cb   : > { %v2749_v7 = vmul.f32 %v7584_v6, %v2535_v18  ;;  %v2508_v10 = vpop.f32.mrf.mxu3  ;;  %v1136_v18 = vperm.slane %v8804_v5, 5 }
0x11cc   : > { %2746 = vst [vmem:[%s7897_s9 + $0x88] sm:$0xff] %v2745_v14  ;;  %v2509_v17 = vadd.f32 %v2508_v10, %v1131_v2  ;;  %v2767_v2 = vld [vmem:[%s7897_s9 + $0xb0] sm:$0xff] }
0x11cd   : > { %v2750_v13 = vsub.f32 %v2748_v11, %v2749_v7  ;;  %v2523_v61 = vpop.f32.mrf.mxu0  ;;  %v2762_v11 = vld [vmem:[%s7897_s9 + $0xa8] sm:$0xff] }
0x11ce   : > { %v2547_v1 = vpop.f32.mrf.mxu2  ;;  %v2739_v0 = vmul.f32 %v7584_v6, %v2509_v17  ;;  %v1135_v17 = vperm.slane %v8804_v5, 4  ;;  %v2772_v61 = vld [vmem:[%s7897_s9 + $0xb8] sm:$0xff] }
0x11cf   : > { %2751 = vst [vmem:[%s7897_s9 + $0x90] sm:$0xff] %v2750_v13  ;;  %v2548_v32 = vadd.f32 %v2547_v1, %v1134_v35  ;;  %v2763_v35 = vmul.f32 %v2762_v11, %v7567_v49  ;;  %v2768_v13 = vmul.f32 %v2767_v2, %v7567_v49  ;;  %v2757_v1 = vld [vmem:[%s7897_s9 + $0xa0] sm:$0xff] }
0x11d0   : > { %v2536_v3 = vpop.f32.mrf.mxu1  ;;  %v2740_v21 = vsub.f32 %v2738_v20, %v2739_v0 }
0x11d1   : > { %v2754_v16 = vmul.f32 %v7584_v6, %v2548_v32  ;;  %v1138_v32 = vperm.slane %v8804_v5, 7 }
0x11d2   : > { %2741 = vst [vmem:[%s7897_s9 + $0x80] sm:$0xff] %v2740_v21  ;;  %v2758_v21 = vmul.f32 %v2757_v1, %v7567_v49 }
0x11d3   : > { %v2755_v8 = vsub.f32 %v2753_v37, %v2754_v16  ;;  %v2510_v22 = vpop.f32.mrf.mxu3 }
0x11d5   : > { %2756 = vst [vmem:[%s7897_s9 + $0x98] sm:$0xff] %v2755_v8 }
0x11d6   : > { %v2549_v12 = vpop.f32.mrf.mxu2 }
0x11d7   : > { %v2773_v12 = vmul.f32 %v2772_v61, %v7567_v49 }
0x11e5   : > { %v2573_v7 = vpop.f32.mrf.mxu0 }
0x11e6   : > { %v2574_v23 = vadd.f32 %v2573_v7, %v1136_v18 }
0x11e8   : > { %v2586_v14 = vpop.f32.mrf.mxu1  ;;  %v2764_v10 = vmul.f32 %v7584_v6, %v2574_v23 }
0x11e9   : > { %v2587_v4 = vadd.f32 %v2586_v14, %v1137_v19 }
0x11ea   : > { %v2765_v37 = vsub.f32 %v2763_v35, %v2764_v10  ;;  %v2782_v10 = vld [vmem:[%s7897_s9 + $0xc8] sm:$0xff] }
0x11eb   : > { %v2769_v20 = vmul.f32 %v7584_v6, %v2587_v4  ;;  %v2560_v3 = vpop.f32.mrf.mxu3  ;;  %v8805_v4 = vld [vmem:[#allocation459_spill] sm:$0xff] }
0x11ec   : > { %2766 = vst [vmem:[%s7897_s9 + $0xa8] sm:$0xff] %v2765_v37  ;;  %v2561_v16 = vadd.f32 %v2560_v3, %v1135_v17  ;;  %v1141_v17 = vperm.slane %v8805_v4, 2  ;;  %v2783_v37 = vmul.f32 %v2782_v10, %v7567_v49 }
0x11ed   : > { %v2770_v0 = vsub.f32 %v2768_v13, %v2769_v20  ;;  %v2575_v18 = vpop.f32.mrf.mxu0  ;;  %v1140_v13 = vperm.slane %v8805_v4, 1  ;;  %v2787_v20 = vld [vmem:[%s7897_s9 + $0xd0] sm:$0xff] }
0x11ee   : > { %v2599_v8 = vpop.f32.mrf.mxu2  ;;  %v2759_v11 = vmul.f32 %v7584_v6, %v2561_v16  ;;  %v2788_v3 = vmul.f32 %v2787_v20, %v7567_v49 }
0x11ef   : > { %2771 = vst [vmem:[%s7897_s9 + $0xb0] sm:$0xff] %v2770_v0  ;;  %v2600_v22 = vadd.f32 %v2599_v8, %v1138_v32 }
0x11f0   : > { %v2588_v19 = vpop.f32.mrf.mxu1  ;;  %v2760_v7 = vsub.f32 %v2758_v21, %v2759_v11  ;;  %v1139_v21 = vperm.slane %v8805_v4, 0  ;;  %v2792_v11 = vld [vmem:[%s7897_s9 + $0xd8] sm:$0xff] }
0x11f1   : > { %v2774_v2 = vmul.f32 %v7584_v6, %v2600_v22  ;;  %v2777_v22 = vld [vmem:[%s7897_s9 + $0xc0] sm:$0xff] }
0x11f2   : > { %2761 = vst [vmem:[%s7897_s9 + $0xa0] sm:$0xff] %v2760_v7 }
0x11f3   : > { %v2775_v23 = vsub.f32 %v2773_v12, %v2774_v2  ;;  %v2562_v35 = vpop.f32.mrf.mxu3  ;;  %v1142_v12 = vperm.slane %v8805_v4, 3 }
0x11f5   : > { %2776 = vst [vmem:[%s7897_s9 + $0xb8] sm:$0xff] %v2775_v23  ;;  %v2778_v23 = vmul.f32 %v2777_v22, %v7567_v49 }
0x11f6   : > { %v2601_v14 = vpop.f32.mrf.mxu2 }
0x1205   : > { %v2625_v1 = vpop.f32.mrf.mxu0 }
0x1206   : > { %v2626_v32 = vadd.f32 %v2625_v1, %v1140_v13  ;;  %v2638_v61 = vpop.f32.mrf.mxu1  ;;  %v2793_v13 = vmul.f32 %v2792_v11, %v7567_v49 }
0x1207   : > { %v2639_v0 = vadd.f32 %v2638_v61, %v1141_v17 }
0x1208   : > { %v2784_v16 = vmul.f32 %v7584_v6, %v2626_v32 }
0x1209   : > { %v2789_v8 = vmul.f32 %v7584_v6, %v2639_v0 }
0x120a   : > { %v2785_v18 = vsub.f32 %v2783_v37, %v2784_v16 }
0x120b   : > { %v2790_v19 = vsub.f32 %v2788_v3, %v2789_v8  ;;  %v2612_v2 = vpop.f32.mrf.mxu3 }
0x120c   : > { %2786 = vst [vmem:[%s7897_s9 + $0xc8] sm:$0xff] %v2785_v18  ;;  %v2613_v7 = vadd.f32 %v2612_v2, %v1139_v21  ;;  %v2651_v35 = vpop.f32.mrf.mxu2 }
0x120d   : > { %2791 = vst [vmem:[%s7897_s9 + $0xd0] sm:$0xff] %v2790_v19  ;;  %v2652_v14 = vadd.f32 %v2651_v35, %v1142_v12  ;;  %v2627_v10 = vpop.f32.mrf.mxu0  ;;  %v8806_v35 = vmov %v8481_v60 }
0x120e   : > { %v2779_v17 = vmul.f32 %v7584_v6, %v2613_v7  ;;  %v2640_v20 = vpop.f32.mrf.mxu1 }
0x120f   : > { %v2794_v1 = vmul.f32 %v7584_v6, %v2652_v14 }
0x1210   : > { %v2780_v32 = vsub.f32 %v2778_v23, %v2779_v17  ;;  %381 = sbr.rel (!%p379_p0) target bundleno = 491 (0x1eb), region = 79 }
0x1211   : > { %v2795_v37 = vsub.f32 %v2793_v13, %v2794_v1 }
0x1212   : > { %2781 = vst [vmem:[%s7897_s9 + $0xc0] sm:$0xff] %v2780_v32 }
0x1213   : > { %2796 = vst [vmem:[%s7897_s9 + $0xd8] sm:$0xff] %v2795_v37  ;;  %v2614_v61 = vpop.f32.mrf.mxu3 }
0x1214   : > { %v2653_v0 = vpop.f32.mrf.mxu2 }
0x1215   :  { %2806 = vsyncpa [#allocation4], 1 }
0x1216   :  { %2807 = vsyncpa [#allocation6], 1 }

</bundles_post_ra>
